<compile_context>
chip_gen: v5e
topology: v5e:2x2
jax: 0.10.0
libtpu: 0.0.40
codegen_flags: <defaults>
</compile_context>

<pallas_src>
import functools

import jax
import jax.numpy as jnp
from jax.experimental import pallas as pl
from jax.experimental.pallas import tpu as pltpu


# ------------------------------ Pallas kernel -------------------------------

def _resnet_block_kernel(p_ref, w0_ref, w1_ref, w2_ref,
                         s1_ref, b1_ref, s2_ref, b2_ref, o_ref):
    # p_ref : (HW, 9*Cin)   im2col patches of the raw input (3x3 reflect-same)
    # w0_ref: (Cin, Cout)   1x1 residual conv weight
    # w1_ref: (9*Cin, Clat) conv1 weight (rows ordered (kh, kw, cin))
    # w2_ref: (9, Clat, Cout) conv2 weight, one (Clat, Cout) slab per tap
    # s*_ref/b*_ref: folded BatchNorm scale / shift (f32)
    # o_ref : (H, W, Cout)
    H, W, Cout = o_ref.shape
    HW = H * W
    Cin = w0_ref.shape[0]
    Clat = w1_ref.shape[1]
    cdt = w1_ref.dtype                      # MXU compute dtype (bf16 or f32)

    p_raw = p_ref[...]                      # (HW, 9*Cin), compute dtype
    p = p_raw.astype(jnp.float32)

    # Residual path: 1x1 conv on the raw centre tap (tap index 4 = (1,1)).
    x_centre = p_raw[:, 4 * Cin:5 * Cin]    # (HW, Cin)
    out = jnp.dot(x_centre, w0_ref[...], preferred_element_type=jnp.float32)

    # Main path: BN1 + ReLU (elementwise per channel -> commutes with the
    # reflect pad / im2col), then conv1 as one (HW, 9*Cin) @ (9*Cin, Clat).
    a1 = jnp.maximum(p * s1_ref[...] + b1_ref[...], 0.0)
    h1 = jnp.dot(a1.astype(cdt), w1_ref[...], preferred_element_type=jnp.float32)

    # BN2 + ReLU, kept in f32 in VMEM/vregs (never touches HBM).
    a2 = jnp.maximum(h1 * s2_ref[...] + b2_ref[...], 0.0)          # (HW, Clat)

    # In-register reflection pad (pad = 1) of the intermediate activation.
    a2_3d = a2.reshape(H, W, Clat)
    rp = jnp.concatenate([a2_3d[1:2], a2_3d, a2_3d[H - 2:H - 1]], axis=0)
    ap = jnp.concatenate([rp[:, 1:2], rp, rp[:, W - 2:W - 1]], axis=1)
    # ap: (H+2, W+2, Clat), f32

    # conv2: accumulate the 9 shifted taps straight onto the residual.
    t = 0
    for dh in range(3):
        for dw in range(3):
            tap = ap[dh:dh + H, dw:dw + W, :].reshape(HW, Clat).astype(cdt)
            out = out + jnp.dot(tap, w2_ref[t],
                                preferred_element_type=jnp.float32)
            t += 1

    o_ref[...] = out.reshape(H, W, Cout).astype(o_ref.dtype)


# ------------------------------ host wrapper --------------------------------

def resnet_block_forward(x, params, *, compute_dtype=jnp.bfloat16):
    """Fused ResNetBlock forward.  x: (B, H, W, Cin) f32, NHWC."""
    w0, w1, w2, (s1, sh1), (s2, sh2) = params
    B, H, W, Cin = x.shape
    k = w1.shape[0]
    assert k == 3 and w1.shape[1] == 3, "kernel assumes 3x3 convs"
    Clat = w1.shape[-1]
    Cout = w2.shape[-1]
    assert w0.shape == (1, 1, Cin, Cout)
    HW = H * W
    K1 = k * k * Cin

    # Reflect 'same' pad + im2col for the *first* (2-channel) conv only.
    # Tiny (HW x 18); avoids awkward 2-lane 3-D layouts inside the kernel.
    xp = jnp.pad(x, ((0, 0), (1, 1), (1, 1), (0, 0)), mode="reflect")
    cols = [xp[:, dh:dh + H, dw:dw + W, :] for dh in range(k) for dw in range(k)]
    patches = jnp.concatenate(cols, axis=-1).reshape(B, HW, K1).astype(compute_dtype)

    w0m = w0.reshape(Cin, Cout).astype(compute_dtype)
    w1m = w1.reshape(K1, Clat).astype(compute_dtype)       # rows = (kh, kw, cin)
    w2m = w2.reshape(k * k, Clat, Cout).astype(compute_dtype)

    # BN scale/shift for the patch layout (each (tap, cin) column gets cin's).
    s1t = jnp.tile(s1.astype(jnp.float32), k * k).reshape(1, K1)
    sh1t = jnp.tile(sh1.astype(jnp.float32), k * k).reshape(1, K1)
    s2r = s2.astype(jnp.float32).reshape(1, Clat)
    sh2r = sh2.astype(jnp.float32).reshape(1, Clat)

    isz = jnp.dtype(compute_dtype).itemsize
    osz = jnp.dtype(x.dtype).itemsize
    flops = 2 * B * HW * (Cin * Cout + K1 * Clat + k * k * Clat * Cout)
    bytes_accessed = (B * HW * K1 * isz                       # patches
                      + (Cin * Cout + K1 * Clat + k * k * Clat * Cout) * isz
                      + (2 * K1 + 2 * Clat) * 4               # BN scale/shift
                      + B * HW * Cout * osz)                  # output

    y = pl.pallas_call(
        _resnet_block_kernel,
        grid=(B,),
        in_specs=[
            pl.BlockSpec((None, HW, K1), lambda b: (b, 0, 0)),          # patches
            pl.BlockSpec((Cin, Cout), lambda b: (0, 0)),                # w0
            pl.BlockSpec((K1, Clat), lambda b: (0, 0)),                 # w1
            pl.BlockSpec((k * k, Clat, Cout), lambda b: (0, 0, 0)),     # w2
            pl.BlockSpec((1, K1), lambda b: (0, 0)),                    # bn1 scale
            pl.BlockSpec((1, K1), lambda b: (0, 0)),                    # bn1 shift
            pl.BlockSpec((1, Clat), lambda b: (0, 0)),                  # bn2 scale
            pl.BlockSpec((1, Clat), lambda b: (0, 0)),                  # bn2 shift
        ],
        out_specs=pl.BlockSpec((None, H, W, Cout), lambda b: (b, 0, 0, 0)),
        out_shape=jax.ShapeDtypeStruct((B, H, W, Cout), x.dtype),
        compiler_params=pltpu.CompilerParams(
            dimension_semantics=("parallel",),        # v7x: shard over both TCs
            vmem_limit_bytes=32 * 1024 * 1024,        # safe on v5e/v6e/v7x
        ),
        cost_estimate=pl.CostEstimate(
            flops=flops, transcendentals=0, bytes_accessed=bytes_accessed),
    )(patches, w0m, w1m, w2m, s1t, sh1t, s2r, sh2r)
    return y


# ------------------------- parameters & reference ---------------------------

def init_params(key, in_channels=2, latent_channels=64, out_channels=64,
                kernel_size=3):
    k0, k1, k2, kb = jax.random.split(key, 4)

    def conv_w(kk, kh, kw, ci, co):
        fan_in = kh * kw * ci
        return (jax.random.normal(kk, (kh, kw, ci, co), jnp.float32)
                / jnp.sqrt(float(fan_in)))

    w0 = conv_w(k0, 1, 1, in_channels, out_channels)                  # val_conv_0
    w1 = conv_w(k1, kernel_size, kernel_size, in_channels, latent_channels)
    w2 = conv_w(k2, kernel_size, kernel_size, latent_channels, out_channels)

    # Inference-mode BatchNorm2d folded to per-channel scale/shift.
    def bn(kk, c):
        kg, kb_, km, kv = jax.random.split(kk, 4)
        gamma = 1.0 + 0.1 * jax.random.normal(kg, (c,), jnp.float32)
        beta = 0.05 * jax.random.normal(kb_, (c,), jnp.float32)
        mean = 0.1 * jax.random.normal(km, (c,), jnp.float32)
        var = 0.5 + jax.random.uniform(kv, (c,), jnp.float32)
        eps = 1e-5
        scale = gamma / jnp.sqrt(var + eps)
        shift = beta - mean * scale
        return scale, shift

    kb1, kb2 = jax.random.split(kb)
    return w0, w1, w2, bn(kb1, in_channels), bn(kb2, latent_channels)


def reference_forward(x, params):
    """Pure-JAX reference of ResNetBlock.forward (eval mode, dropout=0)."""
    w0, w1, w2, (s1, sh1), (s2, sh2) = params
    dn = ("NHWC", "HWIO", "NHWC")

    def conv_same_reflect(y, w):
        yp = jnp.pad(y, ((0, 0), (1, 1), (1, 1), (0, 0)), mode="reflect")
        return jax.lax.conv_general_dilated(
            yp, w, (1, 1), "VALID", dimension_numbers=dn,
            precision=jax.lax.Precision.HIGHEST)

    residual = jax.lax.conv_general_dilated(
        x, w0, (1, 1), "VALID", dimension_numbers=dn,
        precision=jax.lax.Precision.HIGHEST)
    out = jnp.maximum(x * s1 + sh1, 0.0)         # bn1 + relu
    out = conv_same_reflect(out, w1)             # val_conv_1
    out = jnp.maximum(out * s2 + sh2, 0.0)       # bn2 + final relu
    out = conv_same_reflect(out, w2)             # val_conv_2
    return out + residual


# ---------------------------------- main ------------------------------------

if __name__ == "__main__":
    key = jax.random.PRNGKey(0)
    kx, kp = jax.random.split(key)

    B, H, W, Cin = 2, 16, 16, 2                  # module default in_channels=2
    x = jax.random.normal(kx, (B, H, W, Cin), jnp.float32)
    params = init_params(kp)

    fwd_bf16 = jax.jit(functools.partial(resnet_block_forward,
                                         compute_dtype=jnp.bfloat16))
    fwd_f32 = jax.jit(functools.partial(resnet_block_forward,
                                        compute_dtype=jnp.float32))

    out_bf16 = jax.block_until_ready(fwd_bf16(x, params))
    out_f32 = jax.block_until_ready(fwd_f32(x, params))

    assert out_bf16.shape == (B, H, W, 64) and out_bf16.dtype == x.dtype
    assert out_f32.shape == (B, H, W, 64) and out_f32.dtype == x.dtype
    assert bool(jnp.all(jnp.isfinite(out_bf16)))
    assert bool(jnp.all(jnp.isfinite(out_f32)))

    ref = reference_forward(x, params)
    err_f32 = float(jnp.max(jnp.abs(out_f32 - ref)))
    err_bf16 = float(jnp.max(jnp.abs(out_bf16 - ref)))
    # f32 mode: MXU f32 path vs HIGHEST-precision XLA reference.
    assert err_f32 < 1e-2, f"f32 max abs err vs reference: {err_f32}"
    # bf16 operands / f32 accumulation: looser but still tight for these scales.
    assert err_bf16 < 1e-1, f"bf16 max abs err vs reference: {err_bf16}"

    print("KERNEL_OK")
</pallas_src>

<mosaic_0001>
module attributes {stable_mosaic.version = 11 : i64} {
  func.func @_resnet_block_kernel(%arg0: i32, %arg1: memref<1x256x18xbf16, #tpu.memory_space<vmem>>, %arg2: memref<2x64xbf16, #tpu.memory_space<vmem>>, %arg3: memref<18x64xbf16, #tpu.memory_space<vmem>>, %arg4: memref<9x64x64xbf16, #tpu.memory_space<vmem>>, %arg5: memref<1x18xf32, #tpu.memory_space<vmem>>, %arg6: memref<1x18xf32, #tpu.memory_space<vmem>>, %arg7: memref<1x64xf32, #tpu.memory_space<vmem>>, %arg8: memref<1x64xf32, #tpu.memory_space<vmem>>, %arg9: memref<1x16x16x64xf32, #tpu.memory_space<vmem>>) attributes {dimension_semantics = [#tpu.dimension_semantics<parallel>], iteration_bounds = array<i64: 2>, scalar_prefetch = 0 : i64, scratch_operands = 0 : i64, tpu.core_type = #tpu.core_type<tc>, window_params = [{transform_indices = @transform_0, window_bounds = array<i64: 1, 256, 18>}, {pipeline_mode = #tpu.pipeline_mode<synchronous>, transform_indices = @transform_1, window_bounds = array<i64: 2, 64>}, {pipeline_mode = #tpu.pipeline_mode<synchronous>, transform_indices = @transform_2, window_bounds = array<i64: 18, 64>}, {pipeline_mode = #tpu.pipeline_mode<synchronous>, transform_indices = @transform_3, window_bounds = array<i64: 9, 64, 64>}, {pipeline_mode = #tpu.pipeline_mode<synchronous>, transform_indices = @transform_4, window_bounds = array<i64: 1, 18>}, {pipeline_mode = #tpu.pipeline_mode<synchronous>, transform_indices = @transform_5, window_bounds = array<i64: 1, 18>}, {pipeline_mode = #tpu.pipeline_mode<synchronous>, transform_indices = @transform_6, window_bounds = array<i64: 1, 64>}, {pipeline_mode = #tpu.pipeline_mode<synchronous>, transform_indices = @transform_7, window_bounds = array<i64: 1, 64>}, {transform_indices = @transform_8, window_bounds = array<i64: 1, 16, 16, 64>}]} {
    %c0 = arith.constant 0 : index
    %c0_0 = arith.constant 0 : index
    %c0_1 = arith.constant 0 : index
    %0 = vector.load %arg1[%c0, %c0_0, %c0_1] : memref<1x256x18xbf16, #tpu.memory_space<vmem>>, vector<1x256x18xbf16>
    %1 = vector.shape_cast %0 : vector<1x256x18xbf16> to vector<256x18xbf16>
    %2 = arith.extf %1 : vector<256x18xbf16> to vector<256x18xf32>
    %3 = vector.extract_strided_slice %1 {offsets = [0, 8], sizes = [256, 2], strides = [1, 1]} : vector<256x18xbf16> to vector<256x2xbf16>
    %c0_2 = arith.constant 0 : index
    %c0_3 = arith.constant 0 : index
    %4 = vector.load %arg2[%c0_2, %c0_3] : memref<2x64xbf16, #tpu.memory_space<vmem>>, vector<2x64xbf16>
    %cst = arith.constant dense<0.000000e+00> : vector<256x64xf32>
    %5 = tpu.matmul %3, %4, %cst {dimension_numbers = #tpu.dot_dimension_numbers<[1], [0], [0], [1], [0, 0, 1, 1], [], []>} : vector<256x2xbf16>, vector<2x64xbf16>, vector<256x64xf32> -> vector<256x64xf32>
    %c0_4 = arith.constant 0 : index
    %c0_5 = arith.constant 0 : index
    %6 = vector.load %arg5[%c0_4, %c0_5] : memref<1x18xf32, #tpu.memory_space<vmem>>, vector<1x18xf32>
    %7 = vector.broadcast %6 : vector<1x18xf32> to vector<256x18xf32>
    %8 = arith.mulf %2, %7 : vector<256x18xf32>
    %c0_6 = arith.constant 0 : index
    %c0_7 = arith.constant 0 : index
    %9 = vector.load %arg6[%c0_6, %c0_7] : memref<1x18xf32, #tpu.memory_space<vmem>>, vector<1x18xf32>
    %10 = vector.broadcast %9 : vector<1x18xf32> to vector<256x18xf32>
    %11 = arith.addf %8, %10 : vector<256x18xf32>
    %cst_8 = arith.constant 0.000000e+00 : f32
    %12 = vector.broadcast %cst_8 : f32 to vector<256x18xf32>
    %13 = arith.maximumf %11, %12 : vector<256x18xf32>
    %14 = arith.truncf %13 : vector<256x18xf32> to vector<256x18xbf16>
    %c0_9 = arith.constant 0 : index
    %c0_10 = arith.constant 0 : index
    %15 = vector.load %arg3[%c0_9, %c0_10] : memref<18x64xbf16, #tpu.memory_space<vmem>>, vector<18x64xbf16>
    %cst_11 = arith.constant dense<0.000000e+00> : vector<256x64xf32>
    %16 = tpu.matmul %14, %15, %cst_11 {dimension_numbers = #tpu.dot_dimension_numbers<[1], [0], [0], [1], [0, 0, 1, 1], [], []>} : vector<256x18xbf16>, vector<18x64xbf16>, vector<256x64xf32> -> vector<256x64xf32>
    %c0_12 = arith.constant 0 : index
    %c0_13 = arith.constant 0 : index
    %17 = vector.load %arg7[%c0_12, %c0_13] : memref<1x64xf32, #tpu.memory_space<vmem>>, vector<1x64xf32>
    %18 = vector.broadcast %17 : vector<1x64xf32> to vector<256x64xf32>
    %19 = arith.mulf %16, %18 : vector<256x64xf32>
    %c0_14 = arith.constant 0 : index
    %c0_15 = arith.constant 0 : index
    %20 = vector.load %arg8[%c0_14, %c0_15] : memref<1x64xf32, #tpu.memory_space<vmem>>, vector<1x64xf32>
    %21 = vector.broadcast %20 : vector<1x64xf32> to vector<256x64xf32>
    %22 = arith.addf %19, %21 : vector<256x64xf32>
    %cst_16 = arith.constant 0.000000e+00 : f32
    %23 = vector.broadcast %cst_16 : f32 to vector<256x64xf32>
    %24 = arith.maximumf %22, %23 : vector<256x64xf32>
    %25 = vector.shape_cast %24 : vector<256x64xf32> to vector<16x16x64xf32>
    %26 = vector.extract_strided_slice %25 {offsets = [1, 0, 0], sizes = [1, 16, 64], strides = [1, 1, 1]} : vector<16x16x64xf32> to vector<1x16x64xf32>
    %27 = vector.extract_strided_slice %25 {offsets = [14, 0, 0], sizes = [1, 16, 64], strides = [1, 1, 1]} : vector<16x16x64xf32> to vector<1x16x64xf32>
    %28 = tpu.concatenate %26, %25, %27 in 0 : vector<1x16x64xf32>, vector<16x16x64xf32>, vector<1x16x64xf32> -> vector<18x16x64xf32>
    %29 = vector.extract_strided_slice %28 {offsets = [0, 1, 0], sizes = [18, 1, 64], strides = [1, 1, 1]} : vector<18x16x64xf32> to vector<18x1x64xf32>
    %30 = vector.extract_strided_slice %28 {offsets = [0, 14, 0], sizes = [18, 1, 64], strides = [1, 1, 1]} : vector<18x16x64xf32> to vector<18x1x64xf32>
    %31 = tpu.concatenate %29, %28, %30 in 1 : vector<18x1x64xf32>, vector<18x16x64xf32>, vector<18x1x64xf32> -> vector<18x18x64xf32>
    %32 = vector.extract_strided_slice %31 {offsets = [0, 0, 0], sizes = [16, 16, 64], strides = [1, 1, 1]} : vector<18x18x64xf32> to vector<16x16x64xf32>
    %33 = vector.shape_cast %32 : vector<16x16x64xf32> to vector<256x64xf32>
    %34 = arith.truncf %33 : vector<256x64xf32> to vector<256x64xbf16>
    %c0_17 = arith.constant 0 : index
    %c0_18 = arith.constant 0 : index
    %c0_19 = arith.constant 0 : index
    %35 = vector.load %arg4[%c0_17, %c0_18, %c0_19] : memref<9x64x64xbf16, #tpu.memory_space<vmem>>, vector<1x64x64xbf16>
    %36 = vector.shape_cast %35 : vector<1x64x64xbf16> to vector<64x64xbf16>
    %cst_20 = arith.constant dense<0.000000e+00> : vector<256x64xf32>
    %37 = tpu.matmul %34, %36, %cst_20 {dimension_numbers = #tpu.dot_dimension_numbers<[1], [0], [0], [1], [0, 0, 1, 1], [], []>} : vector<256x64xbf16>, vector<64x64xbf16>, vector<256x64xf32> -> vector<256x64xf32>
    %38 = arith.addf %5, %37 : vector<256x64xf32>
    %39 = vector.extract_strided_slice %31 {offsets = [0, 1, 0], sizes = [16, 16, 64], strides = [1, 1, 1]} : vector<18x18x64xf32> to vector<16x16x64xf32>
    %40 = vector.shape_cast %39 : vector<16x16x64xf32> to vector<256x64xf32>
    %41 = arith.truncf %40 : vector<256x64xf32> to vector<256x64xbf16>
    %c1 = arith.constant 1 : index
    %c0_21 = arith.constant 0 : index
    %c0_22 = arith.constant 0 : index
    %42 = vector.load %arg4[%c1, %c0_21, %c0_22] : memref<9x64x64xbf16, #tpu.memory_space<vmem>>, vector<1x64x64xbf16>
    %43 = vector.shape_cast %42 : vector<1x64x64xbf16> to vector<64x64xbf16>
    %cst_23 = arith.constant dense<0.000000e+00> : vector<256x64xf32>
    %44 = tpu.matmul %41, %43, %cst_23 {dimension_numbers = #tpu.dot_dimension_numbers<[1], [0], [0], [1], [0, 0, 1, 1], [], []>} : vector<256x64xbf16>, vector<64x64xbf16>, vector<256x64xf32> -> vector<256x64xf32>
    %45 = arith.addf %38, %44 : vector<256x64xf32>
    %46 = vector.extract_strided_slice %31 {offsets = [0, 2, 0], sizes = [16, 16, 64], strides = [1, 1, 1]} : vector<18x18x64xf32> to vector<16x16x64xf32>
    %47 = vector.shape_cast %46 : vector<16x16x64xf32> to vector<256x64xf32>
    %48 = arith.truncf %47 : vector<256x64xf32> to vector<256x64xbf16>
    %c2 = arith.constant 2 : index
    %c0_24 = arith.constant 0 : index
    %c0_25 = arith.constant 0 : index
    %49 = vector.load %arg4[%c2, %c0_24, %c0_25] : memref<9x64x64xbf16, #tpu.memory_space<vmem>>, vector<1x64x64xbf16>
    %50 = vector.shape_cast %49 : vector<1x64x64xbf16> to vector<64x64xbf16>
    %cst_26 = arith.constant dense<0.000000e+00> : vector<256x64xf32>
    %51 = tpu.matmul %48, %50, %cst_26 {dimension_numbers = #tpu.dot_dimension_numbers<[1], [0], [0], [1], [0, 0, 1, 1], [], []>} : vector<256x64xbf16>, vector<64x64xbf16>, vector<256x64xf32> -> vector<256x64xf32>
    %52 = arith.addf %45, %51 : vector<256x64xf32>
    %53 = vector.extract_strided_slice %31 {offsets = [1, 0, 0], sizes = [16, 16, 64], strides = [1, 1, 1]} : vector<18x18x64xf32> to vector<16x16x64xf32>
    %54 = vector.shape_cast %53 : vector<16x16x64xf32> to vector<256x64xf32>
    %55 = arith.truncf %54 : vector<256x64xf32> to vector<256x64xbf16>
    %c3 = arith.constant 3 : index
    %c0_27 = arith.constant 0 : index
    %c0_28 = arith.constant 0 : index
    %56 = vector.load %arg4[%c3, %c0_27, %c0_28] : memref<9x64x64xbf16, #tpu.memory_space<vmem>>, vector<1x64x64xbf16>
    %57 = vector.shape_cast %56 : vector<1x64x64xbf16> to vector<64x64xbf16>
    %cst_29 = arith.constant dense<0.000000e+00> : vector<256x64xf32>
    %58 = tpu.matmul %55, %57, %cst_29 {dimension_numbers = #tpu.dot_dimension_numbers<[1], [0], [0], [1], [0, 0, 1, 1], [], []>} : vector<256x64xbf16>, vector<64x64xbf16>, vector<256x64xf32> -> vector<256x64xf32>
    %59 = arith.addf %52, %58 : vector<256x64xf32>
    %60 = vector.extract_strided_slice %31 {offsets = [1, 1, 0], sizes = [16, 16, 64], strides = [1, 1, 1]} : vector<18x18x64xf32> to vector<16x16x64xf32>
    %61 = vector.shape_cast %60 : vector<16x16x64xf32> to vector<256x64xf32>
    %62 = arith.truncf %61 : vector<256x64xf32> to vector<256x64xbf16>
    %c4 = arith.constant 4 : index
    %c0_30 = arith.constant 0 : index
    %c0_31 = arith.constant 0 : index
    %63 = vector.load %arg4[%c4, %c0_30, %c0_31] : memref<9x64x64xbf16, #tpu.memory_space<vmem>>, vector<1x64x64xbf16>
    %64 = vector.shape_cast %63 : vector<1x64x64xbf16> to vector<64x64xbf16>
    %cst_32 = arith.constant dense<0.000000e+00> : vector<256x64xf32>
    %65 = tpu.matmul %62, %64, %cst_32 {dimension_numbers = #tpu.dot_dimension_numbers<[1], [0], [0], [1], [0, 0, 1, 1], [], []>} : vector<256x64xbf16>, vector<64x64xbf16>, vector<256x64xf32> -> vector<256x64xf32>
    %66 = arith.addf %59, %65 : vector<256x64xf32>
    %67 = vector.extract_strided_slice %31 {offsets = [1, 2, 0], sizes = [16, 16, 64], strides = [1, 1, 1]} : vector<18x18x64xf32> to vector<16x16x64xf32>
    %68 = vector.shape_cast %67 : vector<16x16x64xf32> to vector<256x64xf32>
    %69 = arith.truncf %68 : vector<256x64xf32> to vector<256x64xbf16>
    %c5 = arith.constant 5 : index
    %c0_33 = arith.constant 0 : index
    %c0_34 = arith.constant 0 : index
    %70 = vector.load %arg4[%c5, %c0_33, %c0_34] : memref<9x64x64xbf16, #tpu.memory_space<vmem>>, vector<1x64x64xbf16>
    %71 = vector.shape_cast %70 : vector<1x64x64xbf16> to vector<64x64xbf16>
    %cst_35 = arith.constant dense<0.000000e+00> : vector<256x64xf32>
    %72 = tpu.matmul %69, %71, %cst_35 {dimension_numbers = #tpu.dot_dimension_numbers<[1], [0], [0], [1], [0, 0, 1, 1], [], []>} : vector<256x64xbf16>, vector<64x64xbf16>, vector<256x64xf32> -> vector<256x64xf32>
    %73 = arith.addf %66, %72 : vector<256x64xf32>
    %74 = vector.extract_strided_slice %31 {offsets = [2, 0, 0], sizes = [16, 16, 64], strides = [1, 1, 1]} : vector<18x18x64xf32> to vector<16x16x64xf32>
    %75 = vector.shape_cast %74 : vector<16x16x64xf32> to vector<256x64xf32>
    %76 = arith.truncf %75 : vector<256x64xf32> to vector<256x64xbf16>
    %c6 = arith.constant 6 : index
    %c0_36 = arith.constant 0 : index
    %c0_37 = arith.constant 0 : index
    %77 = vector.load %arg4[%c6, %c0_36, %c0_37] : memref<9x64x64xbf16, #tpu.memory_space<vmem>>, vector<1x64x64xbf16>
    %78 = vector.shape_cast %77 : vector<1x64x64xbf16> to vector<64x64xbf16>
    %cst_38 = arith.constant dense<0.000000e+00> : vector<256x64xf32>
    %79 = tpu.matmul %76, %78, %cst_38 {dimension_numbers = #tpu.dot_dimension_numbers<[1], [0], [0], [1], [0, 0, 1, 1], [], []>} : vector<256x64xbf16>, vector<64x64xbf16>, vector<256x64xf32> -> vector<256x64xf32>
    %80 = arith.addf %73, %79 : vector<256x64xf32>
    %81 = vector.extract_strided_slice %31 {offsets = [2, 1, 0], sizes = [16, 16, 64], strides = [1, 1, 1]} : vector<18x18x64xf32> to vector<16x16x64xf32>
    %82 = vector.shape_cast %81 : vector<16x16x64xf32> to vector<256x64xf32>
    %83 = arith.truncf %82 : vector<256x64xf32> to vector<256x64xbf16>
    %c7 = arith.constant 7 : index
    %c0_39 = arith.constant 0 : index
    %c0_40 = arith.constant 0 : index
    %84 = vector.load %arg4[%c7, %c0_39, %c0_40] : memref<9x64x64xbf16, #tpu.memory_space<vmem>>, vector<1x64x64xbf16>
    %85 = vector.shape_cast %84 : vector<1x64x64xbf16> to vector<64x64xbf16>
    %cst_41 = arith.constant dense<0.000000e+00> : vector<256x64xf32>
    %86 = tpu.matmul %83, %85, %cst_41 {dimension_numbers = #tpu.dot_dimension_numbers<[1], [0], [0], [1], [0, 0, 1, 1], [], []>} : vector<256x64xbf16>, vector<64x64xbf16>, vector<256x64xf32> -> vector<256x64xf32>
    %87 = arith.addf %80, %86 : vector<256x64xf32>
    %88 = vector.extract_strided_slice %31 {offsets = [2, 2, 0], sizes = [16, 16, 64], strides = [1, 1, 1]} : vector<18x18x64xf32> to vector<16x16x64xf32>
    %89 = vector.shape_cast %88 : vector<16x16x64xf32> to vector<256x64xf32>
    %90 = arith.truncf %89 : vector<256x64xf32> to vector<256x64xbf16>
    %c8 = arith.constant 8 : index
    %c0_42 = arith.constant 0 : index
    %c0_43 = arith.constant 0 : index
    %91 = vector.load %arg4[%c8, %c0_42, %c0_43] : memref<9x64x64xbf16, #tpu.memory_space<vmem>>, vector<1x64x64xbf16>
    %92 = vector.shape_cast %91 : vector<1x64x64xbf16> to vector<64x64xbf16>
    %cst_44 = arith.constant dense<0.000000e+00> : vector<256x64xf32>
    %93 = tpu.matmul %90, %92, %cst_44 {dimension_numbers = #tpu.dot_dimension_numbers<[1], [0], [0], [1], [0, 0, 1, 1], [], []>} : vector<256x64xbf16>, vector<64x64xbf16>, vector<256x64xf32> -> vector<256x64xf32>
    %94 = arith.addf %87, %93 : vector<256x64xf32>
    %95 = vector.shape_cast %94 : vector<256x64xf32> to vector<16x16x64xf32>
    %c0_45 = arith.constant 0 : index
    %c0_46 = arith.constant 0 : index
    %c0_47 = arith.constant 0 : index
    %c0_48 = arith.constant 0 : index
    %96 = vector.load %arg9[%c0_45, %c0_46, %c0_47, %c0_48] : memref<1x16x16x64xf32, #tpu.memory_space<vmem>>, vector<1x16x16x64xf32>
    %97 = vector.shape_cast %96 : vector<1x16x16x64xf32> to vector<16x16x64xf32>
    %98 = vector.shape_cast %95 : vector<16x16x64xf32> to vector<1x16x16x64xf32>
    tpu.vector_store %arg9[%c0_45, %c0_46, %c0_47, %c0_48], %98 {strides = array<i32>} : memref<1x16x16x64xf32, #tpu.memory_space<vmem>>, vector<1x16x16x64xf32>,
    return
  }
  func.func @transform_0(%arg0: i32) -> (i32, i32, i32) {
    %c0_i32 = arith.constant 0 : i32
    %c0_i32_0 = arith.constant 0 : i32
    %c0_i32_1 = arith.constant 0 : i32
    return %arg0, %c0_i32, %c0_i32_0 : i32, i32, i32
  }
  func.func @transform_1(%arg0: i32) -> (i32, i32) {
    %c0_i32 = arith.constant 0 : i32
    %c0_i32_0 = arith.constant 0 : i32
    %c0_i32_1 = arith.constant 0 : i32
    return %c0_i32, %c0_i32_0 : i32, i32
  }
  func.func @transform_2(%arg0: i32) -> (i32, i32) {
    %c0_i32 = arith.constant 0 : i32
    %c0_i32_0 = arith.constant 0 : i32
    %c0_i32_1 = arith.constant 0 : i32
    return %c0_i32, %c0_i32_0 : i32, i32
  }
  func.func @transform_3(%arg0: i32) -> (i32, i32, i32) {
    %c0_i32 = arith.constant 0 : i32
    %c0_i32_0 = arith.constant 0 : i32
    %c0_i32_1 = arith.constant 0 : i32
    %c0_i32_2 = arith.constant 0 : i32
    return %c0_i32, %c0_i32_0, %c0_i32_1 : i32, i32, i32
  }
  func.func @transform_4(%arg0: i32) -> (i32, i32) {
    %c0_i32 = arith.constant 0 : i32
    %c0_i32_0 = arith.constant 0 : i32
    %c0_i32_1 = arith.constant 0 : i32
    return %c0_i32, %c0_i32_0 : i32, i32
  }
  func.func @transform_5(%arg0: i32) -> (i32, i32) {
    %c0_i32 = arith.constant 0 : i32
    %c0_i32_0 = arith.constant 0 : i32
    %c0_i32_1 = arith.constant 0 : i32
    return %c0_i32, %c0_i32_0 : i32, i32
  }
  func.func @transform_6(%arg0: i32) -> (i32, i32) {
    %c0_i32 = arith.constant 0 : i32
    %c0_i32_0 = arith.constant 0 : i32
    %c0_i32_1 = arith.constant 0 : i32
    return %c0_i32, %c0_i32_0 : i32, i32
  }
  func.func @transform_7(%arg0: i32) -> (i32, i32) {
    %c0_i32 = arith.constant 0 : i32
    %c0_i32_0 = arith.constant 0 : i32
    %c0_i32_1 = arith.constant 0 : i32
    return %c0_i32, %c0_i32_0 : i32, i32
  }
  func.func @transform_8(%arg0: i32) -> (i32, i32, i32, i32) {
    %c0_i32 = arith.constant 0 : i32
    %c0_i32_0 = arith.constant 0 : i32
    %c0_i32_1 = arith.constant 0 : i32
    %c0_i32_2 = arith.constant 0 : i32
    return %arg0, %c0_i32, %c0_i32_0, %c0_i32_1 : i32, i32, i32, i32
  }
}

</mosaic_0001>

<bundles_post_ra>
// kernel: tile.14
= control target key start
LH: loop header
LB: loop body
LE: loop exit
PB: predicated region body
PF: predicated region fallthrough
CT: control target
= control target key end

     0   :  { %s75_s10 = smov 16   ;;  %s76_s11 = smov 12   ;;  %vm3_vm0 = vcmask 15360   ;;  %vm9_vm1 = vcmask 146560   ;;  %vm15_vm2 = vcmask 130160   ;;  %vm21_vm3 = vcmask 113760   ;;  %s123_s0 = inlined_call_operand.vmem [shape: f32[9,2], index: 0, kind: input, shape index: {}]   ;;  %s124_s1 = inlined_call_operand.vmem [shape: f32[1,18], index: 1, kind: output, shape index: {}]  }
   0x1   :  { %v59_v0 = vld [vmem:[%s123_s0 + $0x8] sm:$0x1]   ;;  %v61_v1 = vld [vmem:[%s123_s0 + $0x6] sm:$0x1]   ;;  %v63_v2 = vld [vmem:[%s123_s0 + $0x4] sm:$0x1]  }
   0x2   :  { %7 = vrot.lane.b32.xlu0 %v59_v0, %s75_s10  ;;  %19 = vrot.lane.b32.xlu1 %v61_v1, %s76_s11  ;;  %s77_s14 = smov 8   ;;  %v60_v3 = vld [vmem:[%s123_s0 + $0x7] sm:$0x1]   ;;  %v62_v4 = vld [vmem:[%s123_s0 + $0x5] sm:$0x1]   ;;  %s78_s19 = smov 14  }
   0x3   :  { %31 = vrot.lane.b32.xlu2 %v63_v2, %s77_s14  ;;  %s79_s20 = smov 10   ;;  %v64_v5 = vld [vmem:[%s123_s0 + $0x3] sm:$0x1]   ;;  %s80_s23 = smov 6   ;;  %v65_v6 = vld [vmem:[%s123_s0 + $0x2] sm:$0x1]  }
   0x4   :  { %v66_v7 = vld [vmem:[%s123_s0 + $0x1] sm:$0x1]   ;;  %s81_s28 = smov 4   ;;  %s82_s29 = smov 2   ;;  %v2_v8 = vld [vmem:[%s123_s0] sm:$0x1]  }
   0x5   :  { %4 = vst.msk [vmem:[#allocation0] sm:$0x1] %vm3_vm0, %v2_v8   ;;  %vm27_vm4 = vcmask 97360   ;;  %vm33_vm5 = vcmask 80960   ;;  %vm39_vm6 = vcmask 64560   ;;  %vm45_vm7 = vcmask 48160  }
   0x6   :  { %vm51_vm8 = vcmask 31760  }
   0xa   :  { %13 = vrot.lane.b32.xlu0 %v60_v3, %s78_s19  ;;  %25 = vrot.lane.b32.xlu1 %v62_v4, %s79_s20 }
   0xb   :  { %37 = vrot.lane.b32.xlu2 %v64_v5, %s80_s23 }
  0x12   :  { %43 = vrot.lane.b32.xlu0 %v65_v6, %s81_s28  ;;  %49 = vrot.lane.b32.xlu1 %v66_v7, %s82_s29 }
  0x5d   :  { %v32_v9 = vpop.permute.xlu2 %31  }
  0x65   :  { %v38_v10 = vpop.permute.xlu2 %37  }
  0x74   :  { %v8_v11 = vpop.permute.xlu0 %7   ;;  %v20_v12 = vpop.permute.xlu1 %19  }
  0x75   :  { %10 = vst.msk [vmem:[#allocation0] sm:$0x1] %vm9_vm1, %v8_v11  }
  0x7c   :  { %v14_v13 = vpop.permute.xlu0 %13   ;;  %v26_v14 = vpop.permute.xlu1 %25  }
  0x7d   :  { %16 = vst.msk [vmem:[#allocation0] sm:$0x1] %vm15_vm2, %v14_v13  }
  0x7e   :  { %22 = vst.msk [vmem:[#allocation0] sm:$0x1] %vm21_vm3, %v20_v12  }
  0x7f   :  { %28 = vst.msk [vmem:[#allocation0] sm:$0x1] %vm27_vm4, %v26_v14  }
  0x80   :  { %34 = vst.msk [vmem:[#allocation0] sm:$0x1] %vm33_vm5, %v32_v9  }
  0x81   :  { %40 = vst.msk [vmem:[#allocation0] sm:$0x1] %vm39_vm6, %v38_v10  }
  0x84   :  { %v44_v15 = vpop.permute.xlu0 %43   ;;  %v50_v16 = vpop.permute.xlu1 %49  }
  0x85   :  { %46 = vst.msk [vmem:[#allocation0] sm:$0x1] %vm45_vm7, %v44_v15  }
  0x86   :  { %52 = vst.msk [vmem:[#allocation0] sm:$0x1] %vm51_vm8, %v50_v16  }
  0x8d   :  { %v55_v17 = vld [vmem:[#allocation0] sm:$0x1] }
  0x8e   :  { %58 = vst [vmem:[%s124_s1] sm:$0x1] %v55_v17 }

// kernel: tile.13
= control target key start
LH: loop header
LB: loop body
LE: loop exit
PB: predicated region body
PF: predicated region fallthrough
CT: control target
= control target key end

     0   :  { %s28_s0 = inlined_call_operand.vmem [shape: f32[2], index: 0, kind: input, shape index: {}]   ;;  %s29_s1 = inlined_call_operand.vmem [shape: f32[9,2], index: 1, kind: output, shape index: {}]  }
   0x1   :  { %v4_v0 = vld [vmem:[%s28_s0] ss:$0 sm:$0xff] }
   0x2   :  { %5 = vst [vmem:[%s29_s1] sm:$0xff] %v4_v0 }
   0x3   :  { %8 = vst [vmem:[%s29_s1 + $0x8] sm:$0xff] %v4_v0 }

// kernel: resnet_block_forward.1
= control target key start
LH: loop header
LB: loop body
LE: loop exit
PB: predicated region body
PF: predicated region fallthrough
CT: control target
= control target key end

     0   :  { %13 = vsyncpa [#allocation3], 0  ;;  %s5593_s0 = inlined_call_operand.vmem [shape: bf16[2,256,18], index: 0, kind: input, shape index: {}]   ;;  %s5594_s1 = inlined_call_operand.vmem [shape: bf16[2,64], index: 1, kind: input, shape index: {}]   ;;  %s5595_s2 = inlined_call_operand.vmem [shape: bf16[18,64], index: 2, kind: input, shape index: {}]   ;;  %s5596_s3 = inlined_call_operand.vmem [shape: bf16[9,64,64], index: 3, kind: input, shape index: {}]   ;;  %s5597_s4 = inlined_call_operand.vmem [shape: f32[1,18], index: 4, kind: input, shape index: {}]   ;;  %s5598_s5 = inlined_call_operand.vmem [shape: f32[1,18], index: 5, kind: input, shape index: {}]   ;;  %s5599_s6 = inlined_call_operand.vmem [shape: f32[1,64], index: 6, kind: input, shape index: {}]   ;;  %s5600_s7 = inlined_call_operand.vmem [shape: f32[1,64], index: 7, kind: input, shape index: {}]   ;;  %s5601_s8 = inlined_call_operand.hbm [shape: f32[2,16,16,64], index: 8, kind: output, shape index: {}]  }
   0x1   :  { %15 = vsyncpa [#allocation3 + $0x1], 0  ;;  %s3825_s27 = smov 0   ;;  %s3827_s28 = smov 0  }
   0x2   :  { %s3829_s29 = smov 0   ;;  %s3831_s30 = smov 0  }
   0x3 LB: > { %s3846_s9 = sadd.s32 4294967295, %s3775_s30   ;;  %s3139_s10 = sadd.s32 4294967294, %s3775_s30   ;;  %s3775_s30 = sphi %s3831_s30, %s5881_s30   ;;  %s3771_s29 = sphi %s3829_s29, %s5880_s29   ;;  %s3767_s28 = sphi %s3827_s28, %s5879_s28   ;;  %s3763_s27 = sphi %s3825_s27, %s5878_s27  }
   0x4   : > { %s3850_s11 = sadd.s32 1, %s3775_s30   ;;  %s201_s12 = sadd.s32 1, %s3771_s29 }
   0x5   : > { %s198_s13 = ssub.s32 %s3775_s30, %s3850_s11  ;;  %p211_p0 = scmp.ne.s32.totalorder %s3771_s29, %s3767_s28 }
   0x6   : > { %p199_p1 = scmp.eq.s32.totalorder %s198_s13, 0  ;;  %p212_p2 = scmp.eq.s32.totalorder %s3846_s9, 1 }
   0x7   : > { %p217_p3 = scmp.ne.s32.totalorder %s3767_s28, %s3763_s27  ;;  %p218_p4 = scmp.eq.s32.totalorder %s3139_s10, 1 }
   0x8   : > { %s3861_s14 = scalar_select %p199_p1, %s3771_s29, %s201_s12  }
   0x9   : > { %p3863_p5 = por %p212_p2, %p211_p0  ;;  %p3867_p6 = por %p218_p4, %p217_p3 }
   0xa   : > { %p3142_p7 = scmp.ge.s32.totalorder %s3775_s30, 1  ;;  %p265_p8 = scmp.lt.s32.totalorder %s3775_s30, 3 }
   0xc   : > { %p266_p9 = pnand %p3142_p7, %p265_p8 }
   0xe   : > { %269 = sbr.rel (%p266_p9) target bundleno = 1118 (0x45e), region = 52 }
  0x13   : > { %p299_p10 = scmp.lt.s32.totalorder %s3846_s9, 1  ;;  %v492_v0 = vld [vmem:[%s5595_s2 + $0x8] sm:$0x1]  ;;  %vm551_vm0 = vcmask 1040384   ;;  %v3887_v4 = vld [vmem:[%s5597_s4] ss:$0 sm:$0xff] }
  0x14   : > { %v498_v1 = vunpack.c.l.b16 %v492_v0  ;;  %v3620_v6 = vld [vmem:[%s5595_s2] sm:$0xff]  ;;  %s3777_s17 = smov 120   ;;  %vm502_vm1 = vcmask 146432   ;;  %vm1266_vm2 = vcmask 15360   ;;  %vm1757_vm3 = vcmask 1045504   ;;  %s296_s10 = sand.u32 1, %s3767_s28  }
  0x15   : > { %s300_s19 = scalar_select %p299_p10, %s3846_s9, 1  ;;  %v3897_v10 = vld [vmem:[%s5598_s5] ss:$0 sm:$0xff]  ;;  %vm1437_vm4 = vcmask 1046528   ;;  %vm1019_vm5 = vcmask 523264  }
  0x16   : > { %v500_v2 = vpack.c.b16 %v498_v1, %v498_v1  ;;  %s3143_s12 = sshll.u32 %s296_s10, 8  ;;  %s3657_s18 = sshll.u32 %s3846_s9, 8 }
  0x17   : > { %s3603_s20 = sshll.u32 %s300_s19, 7  ;;  %s5309_s13 = scalar_lea.vmem [#allocation2], %s3143_s12 }
  0x18   : > { %s3881_s23 = scalar_lea.vmem %s5593_s0, %s3603_s20  ;;  %v553_v3 = vsel %vm551_vm0, %v500_v2, 0  ;;  %s3073_s19 = scalar_lea.hbm %s5601_s8, %s3657_s18 }
  0x19   : > { %v3604_v5 = vld [vmem:[%s3881_s23] sm:$0xff]  ;;  %561 = vmatpush.bf16.msra.mxu0 %v553_v3  ;;  %3658 = vmatpush.bf16.msra.mxu3 %v553_v3  ;;  %v3606_v11 = vld [vmem:[%s3881_s23 + $0x10] sm:$0xff]  ;;  %v307_v14 = vld [vmem:[%s3881_s23 + $0x8] sm:$0xff]   ;;  %s3074_s20 = sshll.u32 %s5309_s13, 4  ;;  %s3076_s21 = sshll.u32 %s3073_s19, 4  ;;  %s3075_s20 = int_to_ptr.vmem [resolvable:$true] %s3074_s20  ;;  %s3077_s21 = int_to_ptr.hbm [resolvable:$true] %s3076_s21 }
  0x1a   : > { %v305_v7 = vld [vmem:[%s3881_s23] sm:$0xff]   ;;  %1234 = vrot.lane.b32.xlu0 %v3604_v5, %s3777_s17  ;;  %1238 = vrot.lane.b32.xlu1 %v3606_v11, %s3777_s17  ;;  %v3605_v17 = vld [vmem:[%s3881_s23 + $0x8] sm:$0xff]  ;;  %v339_v20 = vunpack.c.l.bf16 %v307_v14  ;;  %v340_v21 = vunpack.c.h.bf16 %v307_v14  ;;  %s3062_s9 = scalar_lea.sflag [#allocation3], %s296_s10  ;;  %s3727_s22 = sshra.s32 %s3077_s21, 4  ;;  %s3728_s22 = int_to_ptr.hbm [resolvable:$true] %s3727_s22 }
  0x1b   : > { %v337_v8 = vunpack.c.l.bf16 %v305_v7  ;;  %v338_v9 = vunpack.c.h.bf16 %v305_v7  ;;  %v3607_v25 = vld [vmem:[%s3881_s23 + $0x18] sm:$0xff]  ;;  %v309_v30 = vld [vmem:[%s3881_s23 + $0x10] sm:$0xff]   ;;  %v3608_v46 = vld [vmem:[%s3881_s23 + $0x20] sm:$0xff]  ;;  %s3729_s24 = scalar_lea.hbm %s3728_s22, 256  ;;  %s3733_s12 = scalar_lea.hbm %s5601_s8, 512 }
  0x1c   : > { %v376_v23 = vmul.f32 %v3887_v4, %v339_v20  ;;  %v377_v24 = vmul.f32 %v3887_v4, %v340_v21  ;;  %v341_v32 = vunpack.c.l.bf16 %v309_v30  ;;  %v342_v33 = vunpack.c.h.bf16 %v309_v30  ;;  %v311_v40 = vld [vmem:[%s3881_s23 + $0x18] sm:$0xff]   ;;  %1242 = vrot.lane.b32.xlu2 %v3608_v46, %s3777_s17  ;;  %v313_v51 = vld [vmem:[%s3881_s23 + $0x20] sm:$0xff]   ;;  %v3610_v57 = vld [vmem:[%s3881_s23 + $0x30] sm:$0xff]  ;;  %p3730_p11 = scmp.ne.s32.totalorder %s3728_s22, %s3729_s24  ;;  %p3734_p0 = scmp.lt.s32.totalorder %s3728_s22, %s5601_s8 }
  0x1d   : > { %v374_v12 = vmul.f32 %v3887_v4, %v337_v8  ;;  %v375_v13 = vmul.f32 %v3887_v4, %v338_v9  ;;  %562 = vmatpush.bf16.msra.mxu0 %v3620_v6  ;;  %3659 = vmatpush.bf16.msra.mxu3 %v3620_v6  ;;  %v343_v42 = vunpack.c.l.bf16 %v311_v40  ;;  %v344_v43 = vunpack.c.h.bf16 %v311_v40  ;;  %v3609_v58 = vld [vmem:[%s3881_s23 + $0x28] sm:$0xff]  ;;  %v369_v6 = vld [vmem:[%s5594_s1] sm:$0x1]  ;;  %v3611_v7 = vld [vmem:[%s3881_s23 + $0x38] sm:$0xff]  ;;  %p3735_p1 = scmp.lt.s32.totalorder %s3733_s12, %s3729_s24 }
  0x1e   : > { %v412_v26 = vadd.f32 %v3897_v10, %v376_v23  ;;  %v413_v27 = vadd.f32 %v3897_v10, %v377_v24  ;;  %v378_v34 = vmul.f32 %v3887_v4, %v341_v32  ;;  %v379_v35 = vmul.f32 %v3887_v4, %v342_v33  ;;  %v315_v63 = vld [vmem:[%s3881_s23 + $0x28] sm:$0xff]   ;;  %v317_v14 = vld [vmem:[%s3881_s23 + $0x30] sm:$0xff]   ;;  %v319_v24 = vld [vmem:[%s3881_s23 + $0x38] sm:$0xff]   ;;  %p3731_p12 = pnand %p3730_p11, %p3863_p5 }
  0x1f   : > { %v410_v15 = vadd.f32 %v3897_v10, %v374_v12  ;;  %v411_v16 = vadd.f32 %v3897_v10, %v375_v13  ;;  %v380_v44 = vmul.f32 %v3887_v4, %v343_v42  ;;  %v381_v45 = vmul.f32 %v3887_v4, %v344_v43  ;;  %v3613_v32 = vld [vmem:[%s3881_s23 + $0x48] sm:$0xff]  ;;  %v3612_v40 = vld [vmem:[%s3881_s23 + $0x40] sm:$0xff]  ;;  %v3624_v43 = vld [vmem:[%s5596_s3 + $0x18] sm:$0xff]  ;;  %p3736_p2 = por %p3735_p1, %p3734_p0 }
  0x20   : > { %v444_v28 = vmax.f32 %v412_v26, 0.0  ;;  %v445_v29 = vmax.f32 %v413_v27, 0.0  ;;  %v414_v36 = vadd.f32 %v3897_v10, %v378_v34  ;;  %v415_v37 = vadd.f32 %v3897_v10, %v379_v35  ;;  %1069 = vmatpush.bf16.msra.mxu1 %v3624_v43  ;;  %v3623_v46 = vld [vmem:[%s5596_s3 + $0x10] sm:$0xff]  ;;  %p3732_p13 = pneg %p3731_p12 }
  0x21   : > { %v442_v18 = vmax.f32 %v410_v15, 0.0  ;;  %v443_v19 = vmax.f32 %v411_v16, 0.0  ;;  %v416_v47 = vadd.f32 %v3897_v10, %v380_v44  ;;  %v417_v48 = vadd.f32 %v3897_v10, %v381_v45  ;;  %3660 = vmatpush.bf16.msrb.mxu3 %v3624_v43 }
  0x22   : > { %1236 = vrot.lane.b32.xlu0 %v3605_v17, %s3777_s17  ;;  %1240 = vrot.lane.b32.xlu1 %v3607_v25, %s3777_s17  ;;  %v475_v31 = vpack.c.bf16 %v445_v29, %v444_v28  ;;  %v446_v38 = vmax.f32 %v414_v36, 0.0  ;;  %v447_v39 = vmax.f32 %v415_v37, 0.0  ;;  %v345_v53 = vunpack.c.l.bf16 %v313_v51  ;;  %v321_v36 = vld [vmem:[%s3881_s23 + $0x40] sm:$0xff]   ;;  %p3737_p3 = pnand %p3736_p2, %p3732_p13 }
  0x23   : > { %v474_v22 = vpack.c.bf16 %v443_v19, %v442_v18  ;;  %v448_v49 = vmax.f32 %v416_v47, 0.0  ;;  %v449_v50 = vmax.f32 %v417_v48, 0.0  ;;  %v346_v54 = vunpack.c.h.bf16 %v313_v51  ;;  %v3622_v51 = vld [vmem:[%s5596_s3 + $0x8] sm:$0xff] }
  0x24   : > { %v476_v41 = vpack.c.bf16 %v447_v39, %v446_v38  ;;  %v382_v55 = vmul.f32 %v3887_v4, %v345_v53  ;;  %1244 = vrot.lane.b32.xlu2 %v3609_v58, %s3777_s17  ;;  %v347_v1 = vunpack.c.l.bf16 %v315_v63  ;;  %v348_v2 = vunpack.c.h.bf16 %v315_v63  ;;  %1070 = vmatpush.bf16.msra.mxu1 %v3623_v46 }
  0x25   : > { %3150 = vmatmul.msk.bf16.vlgmr.msra.gmra.mxu0 %vm502_vm1, %v474_v22  ;;  %v477_v52 = vpack.c.bf16 %v449_v50, %v448_v49  ;;  %v383_v56 = vmul.f32 %v3887_v4, %v346_v54  ;;  %v3949_v8 = vsel %vm551_vm0, %v369_v6, 0  ;;  %v349_v16 = vunpack.c.l.bf16 %v317_v14  ;;  %3661 = vmatpush.bf16.msrb.mxu3 %v3623_v46  ;;  %v323_v50 = vld [vmem:[%s3881_s23 + $0x48] sm:$0xff]   ;;  %v3997_v54 = vld [vmem:[%s5600_s7] ss:$0 sm:$0xff]  ;;  %v3615_v6 = vld [vmem:[%s3881_s23 + $0x58] sm:$0xff] }
  0x26   : > { %v418_v59 = vadd.f32 %v3897_v10, %v382_v55  ;;  %v384_v3 = vmul.f32 %v3887_v4, %v347_v1  ;;  %v385_v5 = vmul.f32 %v3887_v4, %v348_v2  ;;  %1325 = vmatpush.bf16.msra.mxu2 %v3949_v8  ;;  %v350_v17 = vunpack.c.h.bf16 %v317_v14 }
  0x27   : > { %v419_v60 = vadd.f32 %v3897_v10, %v383_v56  ;;  %v386_v18 = vmul.f32 %v3887_v4, %v349_v16  ;;  %v351_v26 = vunpack.c.l.bf16 %v319_v24  ;;  %v352_v27 = vunpack.c.h.bf16 %v319_v24 }
  0x28   : > { %v450_v61 = vmax.f32 %v418_v59, 0.0  ;;  %v420_v9 = vadd.f32 %v3897_v10, %v384_v3  ;;  %v421_v11 = vadd.f32 %v3897_v10, %v385_v5  ;;  %v387_v19 = vmul.f32 %v3887_v4, %v350_v17  ;;  %1071 = vmatpush.bf16.msra.mxu1 %v3622_v51  ;;  %v3617_v59 = vld [vmem:[%s3881_s23 + $0x68] sm:$0xff] }
  0x29   : > { %v451_v62 = vmax.f32 %v419_v60, 0.0  ;;  %v422_v20 = vadd.f32 %v3897_v10, %v386_v18  ;;  %v388_v28 = vmul.f32 %v3887_v4, %v351_v26  ;;  %v389_v29 = vmul.f32 %v3887_v4, %v352_v27  ;;  %3662 = vmatpush.bf16.msrb.mxu3 %v3622_v51  ;;  %v3614_v27 = vld [vmem:[%s3881_s23 + $0x50] sm:$0xff] }
  0x2a   : > { %1246 = vrot.lane.b32.xlu0 %v3610_v57, %s3777_s17  ;;  %1248 = vrot.lane.b32.xlu1 %v3611_v7, %s3777_s17  ;;  %v452_v12 = vmax.f32 %v420_v9, 0.0  ;;  %v453_v13 = vmax.f32 %v421_v11, 0.0  ;;  %v423_v21 = vadd.f32 %v3897_v10, %v387_v19  ;;  %v353_v38 = vunpack.c.l.bf16 %v321_v36  ;;  %v3621_v57 = vld [vmem:[%s5596_s3] sm:$0xff]  ;;  %v325_v11 = vld [vmem:[%s3881_s23 + $0x50] sm:$0xff]  }
  0x2b   : > { %v478_v0 = vpack.c.bf16 %v451_v62, %v450_v61  ;;  %v454_v22 = vmax.f32 %v422_v20, 0.0  ;;  %v424_v30 = vadd.f32 %v3897_v10, %v388_v28  ;;  %v354_v39 = vunpack.c.h.bf16 %v321_v36  ;;  %v3618_v28 = vld [vmem:[%s3881_s23 + $0x70] sm:$0xff] }
  0x2c   : > { %v479_v15 = vpack.c.bf16 %v453_v13, %v452_v12  ;;  %v455_v23 = vmax.f32 %v423_v21, 0.0  ;;  %1250 = vrot.lane.b32.xlu2 %v3612_v40, %s3777_s17  ;;  %v355_v53 = vunpack.c.l.bf16 %v323_v50  ;;  %v356_v56 = vunpack.c.h.bf16 %v323_v50  ;;  %1072 = vmatpush.bf16.msra.mxu1 %v3621_v57  ;;  %v3616_v50 = vld [vmem:[%s3881_s23 + $0x60] sm:$0xff] }
  0x2d   : > { %v456_v33 = vmax.f32 %v424_v30, 0.0  ;;  %v391_v42 = vmul.f32 %v3887_v4, %v354_v39  ;;  %3663 = vmatpush.bf16.msrb.mxu3 %v3621_v57  ;;  %v357_v17 = vunpack.c.l.bf16 %v325_v11  ;;  %v358_v18 = vunpack.c.h.bf16 %v325_v11 }
  0x2e   : > { %v480_v25 = vpack.c.bf16 %v455_v23, %v454_v22  ;;  %v392_v61 = vmul.f32 %v3887_v4, %v355_v53  ;;  %v393_v63 = vmul.f32 %v3887_v4, %v356_v56 }
  0x2f   : > { %v427_v45 = vadd.f32 %v3897_v10, %v391_v42  ;;  %v394_v26 = vmul.f32 %v3887_v4, %v357_v17 }
  0x30   : > { %v429_v2 = vadd.f32 %v3897_v10, %v393_v63 }
  0x31   : > { %v459_v49 = vmax.f32 %v427_v45, 0.0 }
  0x32   : > { %1252 = vrot.lane.b32.xlu0 %v3613_v32, %s3777_s17  ;;  %1260 = vrot.lane.b32.xlu1 %v3617_v59, %s3777_s17  ;;  %v395_v32 = vmul.f32 %v3887_v4, %v358_v18  ;;  %v331_v59 = vld [vmem:[%s3881_s23 + $0x68] sm:$0xff]  }
  0x33   : > { %v364_v63 = vunpack.c.h.bf16 %v331_v59 }
  0x34   : > { %1254 = vrot.lane.b32.xlu2 %v3614_v27, %s3777_s17  ;;  %v431_v45 = vadd.f32 %v3897_v10, %v395_v32  ;;  %v3636_v27 = vld [vmem:[%s5596_s3 + $0x78] sm:$0xff] }
  0x35   : > { %3151 = vmatmul.msk.bf16.gmra.mxu0 %vm502_vm1, %v475_v31  ;;  %v425_v31 = vadd.f32 %v3897_v10, %v389_v29 }
  0x36   : > { %2118 = vmatpush.bf16.msrb.mxu0 %v3636_v27 }
  0x37   : > { %v457_v34 = vmax.f32 %v425_v31, 0.0 }
  0x39   : > { %v481_v37 = vpack.c.bf16 %v457_v34, %v456_v33 }
  0x3a   : > { %1256 = vrot.lane.b32.xlu1 %v3615_v6, %s3777_s17  ;;  %1262 = vrot.lane.b32.xlu0 %v3618_v28, %s3777_s17 }
  0x42   : > { %1258 = vrot.lane.b32.xlu0 %v3616_v50, %s3777_s17 }
  0x45   : > { %3152 = vmatmul.msk.bf16.gmra.mxu0 %vm502_vm1, %v476_v41  ;;  %v390_v41 = vmul.f32 %v3887_v4, %v353_v38 }
  0x47   : > { %v426_v44 = vadd.f32 %v3897_v10, %v390_v41 }
  0x49   : > { %v458_v48 = vmax.f32 %v426_v44, 0.0  ;;  %v430_v44 = vadd.f32 %v3897_v10, %v394_v26 }
  0x4b   : > { %v482_v55 = vpack.c.bf16 %v459_v49, %v458_v48  ;;  %v327_v49 = vld [vmem:[%s3881_s23 + $0x58] sm:$0xff]   ;;  %v462_v57 = vmax.f32 %v430_v44, 0.0 }
  0x55   : > { %3153 = vmatmul.msk.bf16.gmra.mxu0 %vm502_vm1, %v477_v52  ;;  %v3992_v52 = vld [vmem:[%s5599_s6] ss:$0 sm:$0xff] }
  0x65   : > { %3154 = vmatmul.msk.bf16.gmra.mxu0 %vm502_vm1, %v478_v0  ;;  %v428_v0 = vadd.f32 %v3897_v10, %v392_v61  ;;  %v360_v61 = vunpack.c.h.bf16 %v327_v49 }
  0x67   : > { %v460_v9 = vmax.f32 %v428_v0, 0.0 }
  0x75   : > { %3155 = vmatmul.msk.bf16.gmra.mxu0 %vm502_vm1, %v479_v15  ;;  %v461_v15 = vmax.f32 %v429_v2, 0.0 }
  0x77   : > { %v483_v21 = vpack.c.bf16 %v461_v15, %v460_v9 }
  0x85   : > { %3156 = vmatmul.msk.bf16.gmra.mxu0 %vm502_vm1, %v480_v25 }
  0x8c   : > { %v1235_v35 = vpop.permute.xlu0 %1234  ;;  %v1239_v7 = vpop.permute.xlu1 %1238 }
  0x8d   : > { %3262 = vmatmul.msk.bf16.vlgmr.msra.gmra.mxu2 %vm1266_vm2, %v1235_v35 }
  0x94   : > { %v1237_v47 = vpop.permute.xlu0 %1236 }
  0x95   : > { %3157 = vmatmul.msk.bf16.gmra.mxu0 %vm502_vm1, %v481_v37 }
  0x9d   : > { %3263 = vmatmul.msk.bf16.gmra.mxu2 %vm1266_vm2, %v1237_v47 }
  0xa2   : > { %v564_v58 = vpop.f32.mrf.mxu0 }
  0xa3   : > { %v648_v60 = vmul.f32 %v3992_v52, %v564_v58  ;;  %v463_v58 = vmax.f32 %v431_v45, 0.0  ;;  %v329_v45 = vld [vmem:[%s3881_s23 + $0x60] sm:$0xff]  }
  0xa5   : > { %v684_v62 = vadd.f32 %v3997_v54, %v648_v60  ;;  %3158 = vmatmul.msk.bf16.gmra.mxu0 %vm502_vm1, %v482_v55  ;;  %v1241_v55 = vpop.permute.xlu1 %1240  ;;  %v359_v60 = vunpack.c.l.bf16 %v327_v49  ;;  %v1243_v49 = vpop.permute.xlu2 %1242 }
  0xa7   : > { %v716_v1 = vmax.f32 %v684_v62, 0.0  ;;  %v363_v62 = vunpack.c.l.bf16 %v331_v59  ;;  %v396_v11 = vmul.f32 %v3887_v4, %v359_v60 }
  0xa9   : > { %v765_v12 = vrot.slane %v716_v1, 1  ;;  %v815_v13 = vrot.slane %v716_v1, 7  ;;  %v400_v2 = vmul.f32 %v3887_v4, %v363_v62 }
  0xaa   : > { %v566_v3 = vpop.f32.mrf.mxu0 }
  0xab   : > { %v649_v5 = vmul.f32 %v3992_v52, %v566_v3  ;;  %v4018_v22 = vsel %vm551_vm0, %v765_v12, %v815_v13  ;;  %v401_v3 = vmul.f32 %v3887_v4, %v364_v63  ;;  %v397_v12 = vmul.f32 %v3887_v4, %v360_v61 }
  0xac   : > { %v1443_v33 = vrot.slane %v4018_v22, 1  ;;  %v1763_v36 = vrot.slane %v4018_v22, 2 }
  0xad   : > { %v685_v14 = vadd.f32 %v3997_v54, %v649_v5  ;;  %3264 = vmatmul.msk.bf16.gmra.mxu2 %vm1266_vm2, %v1239_v7  ;;  %v484_v7 = vpack.c.bf16 %v463_v58, %v462_v57  ;;  %v361_v57 = vunpack.c.l.bf16 %v329_v45  ;;  %v362_v58 = vunpack.c.h.bf16 %v329_v45 }
  0xaf   : > { %v717_v16 = vmax.f32 %v685_v14, 0.0  ;;  %v437_v14 = vadd.f32 %v3897_v10, %v401_v3 }
  0xb1   : > { %v816_v19 = vrot.slane %v717_v16, 7  ;;  %v909_v20 = vrot.slane %v717_v16, 5 }
  0xb2   : > { %v569_v23 = vpop.f32.mrf.mxu0 }
  0xb3   : > { %v957_v24 = vsel %vm551_vm0, %v816_v19, %v909_v20  ;;  %v650_v25 = vmul.f32 %v3992_v52, %v569_v23  ;;  %v4026_v29 = vsel %vm551_vm0, %v815_v13, %v816_v19  ;;  %v436_v13 = vadd.f32 %v3897_v10, %v400_v2 }
  0xb4   : > { %v1446_v30 = vrot.slane %v957_v24, 1  ;;  %v1766_v31 = vrot.slane %v957_v24, 2  ;;  %v1444_v35 = vrot.slane %v4026_v29, 1  ;;  %v1764_v37 = vrot.slane %v4026_v29, 2 }
  0xb5   : > { %v686_v34 = vadd.f32 %v3997_v54, %v650_v25  ;;  %3159 = vmatmul.msk.bf16.gmra.mxu0 %vm502_vm1, %v483_v21  ;;  %v468_v28 = vmax.f32 %v436_v13, 0.0  ;;  %v4103_v3 = vpack.c.bf16 %v4026_v29, %v4018_v22 }
  0xb6   : > { %v1765_v38 = vsel %vm1757_vm3, %v1763_v36, %v1764_v37  ;;  %v1767_v39 = vsel %vm1757_vm3, %v1764_v37, %v1766_v31  ;;  %v1445_v40 = vsel %vm1437_vm4, %v1443_v33, %v1444_v35  ;;  %v1447_v43 = vsel %vm1437_vm4, %v1444_v35, %v1446_v30 }
  0xb7   : > { %v718_v41 = vmax.f32 %v686_v34, 0.0  ;;  %v4040_v42 = vpack.c.bf16 %v1767_v39, %v1765_v38  ;;  %v4045_v46 = vpack.c.bf16 %v1447_v43, %v1445_v40  ;;  %v469_v30 = vmax.f32 %v437_v14, 0.0 }
  0xb8   : > { %v432_v39 = vadd.f32 %v3897_v10, %v396_v11  ;;  %v433_v40 = vadd.f32 %v3897_v10, %v397_v12 }
  0xb9   : > { %5620 = vst [vmem:[#allocation5_spill] sm:$0xff] %v4040_v42  ;;  %v764_v51 = vrot.slane %v718_v41, 1  ;;  %v812_v53 = vrot.slane %v718_v41, 7  ;;  %v487_v37 = vpack.c.bf16 %v469_v30, %v468_v28  ;;  %v3635_v41 = vld [vmem:[%s5596_s3 + $0x70] sm:$0xff] }
  0xba   : > { %v571_v47 = vpop.f32.mrf.mxu0  ;;  %2119 = vmatpush.bf16.msrb.mxu0 %v3635_v41 }
  0xbb   : > { %v651_v48 = vmul.f32 %v3992_v52, %v571_v47  ;;  %v940_v1 = vsel %vm551_vm0, %v764_v51, %v812_v53  ;;  %3163 = vmatmul.msk.bf16.vlgmr.msra.gmra.mxu3 %vm502_vm1, %v487_v37  ;;  %v464_v51 = vmax.f32 %v432_v39, 0.0 }
  0xbc   : > { %v1438_v15 = vrot.slane %v940_v1, 1  ;;  %v1758_v24 = vrot.slane %v940_v1, 2  ;;  %3664 = vmatpush.bf16.msra.mxu3 %v3949_v8 }
  0xbd   : > { %v687_v56 = vadd.f32 %v3997_v54, %v651_v48  ;;  %3265 = vmatmul.msk.bf16.gmra.mxu2 %vm1266_vm2, %v1241_v55  ;;  %v3634_v55 = vld [vmem:[%s5596_s3 + $0x68] sm:$0xff] }
  0xbe   : > { %2120 = vmatpush.bf16.msrb.mxu0 %v3634_v55 }
  0xbf   : > { %v719_v0 = vmax.f32 %v687_v56, 0.0  ;;  %v333_v56 = vld [vmem:[%s3881_s23 + $0x70] sm:$0xff]  }
  0xc0   : > { %v365_v59 = vunpack.c.l.bf16 %v333_v56  ;;  %v366_v60 = vunpack.c.h.bf16 %v333_v56 }
  0xc1   : > { %v813_v5 = vrot.slane %v719_v0, 7  ;;  %v908_v6 = vrot.slane %v719_v0, 5 }
  0xc2   : > { %v574_v9 = vpop.f32.mrf.mxu0  ;;  %v402_v62 = vmul.f32 %v3887_v4, %v365_v59  ;;  %v403_v63 = vmul.f32 %v3887_v4, %v366_v60 }
  0xc3   : > { %v956_v16 = vsel %vm551_vm0, %v813_v5, %v908_v6  ;;  %v652_v17 = vmul.f32 %v3992_v52, %v574_v9  ;;  %v814_v18 = vsel %vm551_vm0, %v812_v53, %v813_v5  ;;  %v465_v53 = vmax.f32 %v433_v40, 0.0  ;;  %v3633_v5 = vld [vmem:[%s5596_s3 + $0x60] sm:$0xff]  ;;  %v1245_v40 = vpop.permute.xlu2 %1244 }
  0xc4   : > { %v1441_v19 = vrot.slane %v956_v16, 1  ;;  %v1761_v20 = vrot.slane %v956_v16, 2  ;;  %v4064_v21 = vpack.c.bf16 %v814_v18, %v940_v1  ;;  %v1439_v23 = vrot.slane %v814_v18, 1  ;;  %2121 = vmatpush.bf16.msrb.mxu0 %v3633_v5 }
  0xc5   : > { %v688_v25 = vadd.f32 %v3997_v54, %v652_v17  ;;  %3160 = vmatmul.msk.bf16.gmra.mxu0 %vm502_vm1, %v484_v7  ;;  %v1759_v26 = vrot.slane %v814_v18, 2  ;;  %v485_v2 = vpack.c.bf16 %v465_v53, %v464_v51  ;;  %v398_v7 = vmul.f32 %v3887_v4, %v361_v57 }
  0xc6   : > { %5621 = vst [vmem:[#allocation6_spill] sm:$0xff] %v4064_v21  ;;  %3182 = vmatmul.msk.bf16.vlgmr.msra.gmra.mxu1 %vm1019_vm5, %v4064_v21  ;;  %v1440_v31 = vsel %vm1437_vm4, %v1438_v15, %v1439_v23  ;;  %v1442_v32 = vsel %vm1437_vm4, %v1439_v23, %v1441_v19  ;;  %v399_v9 = vmul.f32 %v3887_v4, %v362_v58 }
  0xc7   : > { %v1760_v33 = vsel %vm1757_vm3, %v1758_v24, %v1759_v26  ;;  %v1762_v34 = vsel %vm1757_vm3, %v1759_v26, %v1761_v20  ;;  %v4077_v35 = vpack.c.bf16 %v1442_v32, %v1440_v31  ;;  %v720_v36 = vmax.f32 %v688_v25, 0.0 }
  0xc8   : > { %v4079_v38 = vpack.c.bf16 %v1762_v34, %v1760_v33  ;;  %v438_v11 = vadd.f32 %v3897_v10, %v402_v62  ;;  %v439_v12 = vadd.f32 %v3897_v10, %v403_v63  ;;  %v434_v31 = vadd.f32 %v3897_v10, %v398_v7 }
  0xc9   : > { %v766_v47 = vrot.slane %v720_v36, 1  ;;  %v818_v48 = vrot.slane %v720_v36, 7  ;;  %v435_v36 = vadd.f32 %v3897_v10, %v399_v9 }
  0xca   : > { %v576_v43 = vpop.f32.mrf.mxu0  ;;  %v470_v23 = vmax.f32 %v438_v11, 0.0  ;;  %v471_v24 = vmax.f32 %v439_v12, 0.0  ;;  %v466_v41 = vmax.f32 %v434_v31, 0.0 }
  0xcb   : > { %v653_v44 = vmul.f32 %v3992_v52, %v576_v43  ;;  %v4097_v8 = vsel %vm551_vm0, %v766_v47, %v818_v48  ;;  %v467_v47 = vmax.f32 %v435_v36, 0.0 }
  0xcc   : > { %v1448_v29 = vrot.slane %v4097_v8, 1  ;;  %v1768_v18 = vrot.slane %v4097_v8, 2  ;;  %v488_v27 = vpack.c.bf16 %v471_v24, %v470_v23 }
  0xcd   : > { %v689_v50 = vadd.f32 %v3997_v54, %v653_v44  ;;  %3266 = vmatmul.msk.bf16.gmra.mxu2 %vm1266_vm2, %v1243_v49  ;;  %v486_v51 = vpack.c.bf16 %v467_v47, %v466_v41 }
  0xce   : > { %3164 = vmatmul.msk.bf16.gmra.mxu3 %vm502_vm1, %v488_v27 }
  0xcf   : > { %v721_v61 = vmax.f32 %v689_v50, 0.0 }
  0xd1   : > { %v819_v0 = vrot.slane %v721_v61, 7  ;;  %v910_v1 = vrot.slane %v721_v61, 5 }
  0xd2   : > { %v579_v6 = vpop.f32.mrf.mxu0 }
  0xd3   : > { %v958_v13 = vsel %vm551_vm0, %v819_v0, %v910_v1  ;;  %v654_v14 = vmul.f32 %v3992_v52, %v579_v6  ;;  %v4115_v22 = vsel %vm551_vm0, %v818_v48, %v819_v0 }
  0xd4   : > { %v1451_v15 = vrot.slane %v958_v13, 1  ;;  %v1771_v16 = vrot.slane %v958_v13, 2  ;;  %v1449_v17 = vrot.slane %v4115_v22, 1  ;;  %v1769_v20 = vrot.slane %v4115_v22, 2  ;;  %v3632_v13 = vld [vmem:[%s5596_s3 + $0x58] sm:$0xff] }
  0xd5   : > { %v690_v19 = vadd.f32 %v3997_v54, %v654_v14  ;;  %3161 = vmatmul.msk.bf16.gmra.mxu0 %vm502_vm1, %v485_v2  ;;  %1960 = vmatpush.bf16.msrb.mxu2 %v3632_v13 }
  0xd6   : > { %3183 = vmatmul.msk.bf16.gmra.mxu1 %vm1019_vm5, %v4103_v3  ;;  %v1450_v25 = vsel %vm1437_vm4, %v1448_v29, %v1449_v17  ;;  %v1452_v26 = vsel %vm1437_vm4, %v1449_v17, %v1451_v15  ;;  %v1770_v28 = vsel %vm1757_vm3, %v1768_v18, %v1769_v20  ;;  %v1772_v30 = vsel %vm1757_vm3, %v1769_v20, %v1771_v16  ;;  %v1247_v15 = vpop.permute.xlu0 %1246 }
  0xd7   : > { %v4130_v32 = vpack.c.bf16 %v1772_v30, %v1770_v28  ;;  %v4132_v33 = vpack.c.bf16 %v1452_v26, %v1450_v25  ;;  %v722_v34 = vmax.f32 %v690_v19, 0.0  ;;  %v4176_v28 = vpack.c.bf16 %v4115_v22, %v4097_v8 }
  0xd9   : > { %v767_v43 = vrot.slane %v722_v34, 1  ;;  %v821_v44 = vrot.slane %v722_v34, 7  ;;  %5622 = vst [vmem:[#allocation7_spill] sm:$0xff] %v4176_v28 }
  0xda   : > { %v581_v37 = vpop.f32.mrf.mxu0 }
  0xdb   : > { %v655_v39 = vmul.f32 %v3992_v52, %v581_v37  ;;  %v4140_v53 = vsel %vm551_vm0, %v767_v43, %v821_v44 }
  0xdc   : > { %v1453_v61 = vrot.slane %v4140_v53, 1  ;;  %v1773_v0 = vrot.slane %v4140_v53, 2 }
  0xdd   : > { %v691_v45 = vadd.f32 %v3997_v54, %v655_v39  ;;  %3267 = vmatmul.msk.bf16.gmra.mxu2 %vm1266_vm2, %v1245_v40 }
  0xdf   : > { %v723_v48 = vmax.f32 %v691_v45, 0.0 }
  0xe1   : > { %v822_v49 = vrot.slane %v723_v48, 7  ;;  %v911_v50 = vrot.slane %v723_v48, 5 }
  0xe2   : > { %v584_v55 = vpop.f32.mrf.mxu0 }
  0xe3   : > { %v959_v56 = vsel %vm551_vm0, %v822_v49, %v911_v50  ;;  %v656_v57 = vmul.f32 %v3992_v52, %v584_v55  ;;  %v4145_v58 = vsel %vm551_vm0, %v821_v44, %v822_v49  ;;  %v1249_v50 = vpop.permute.xlu1 %1248 }
  0xe4   : > { %v1456_v59 = vrot.slane %v959_v56, 1  ;;  %v1776_v60 = vrot.slane %v959_v56, 2  ;;  %v1454_v62 = vrot.slane %v4145_v58, 1  ;;  %v1774_v1 = vrot.slane %v4145_v58, 2 }
  0xe5   : > { %v692_v63 = vadd.f32 %v3997_v54, %v656_v57  ;;  %3162 = vmatmul.msk.bf16.gmra.mxu0 %vm502_vm1, %v486_v51 }
  0xe6   : > { %3184 = vmatmul.msk.bf16.gmra.mxu1 %vm1019_vm5, %v4064_v21  ;;  %v1455_v2 = vsel %vm1437_vm4, %v1453_v61, %v1454_v62  ;;  %v1457_v5 = vsel %vm1437_vm4, %v1454_v62, %v1456_v59  ;;  %v1775_v6 = vsel %vm1757_vm3, %v1773_v0, %v1774_v1  ;;  %v1777_v7 = vsel %vm1757_vm3, %v1774_v1, %v1776_v60 }
  0xe7   : > { %v4159_v9 = vpack.c.bf16 %v1457_v5, %v1455_v2  ;;  %v4161_v11 = vpack.c.bf16 %v1777_v7, %v1775_v6  ;;  %v724_v12 = vmax.f32 %v692_v63, 0.0  ;;  %v4208_v1 = vpack.c.bf16 %v4145_v58, %v4140_v53 }
  0xe9   : > { %v768_v16 = vrot.slane %v724_v12, 1  ;;  %v824_v17 = vrot.slane %v724_v12, 7  ;;  %5623 = vst [vmem:[#allocation8_spill] sm:$0xff] %v4208_v1 }
  0xea   : > { %v586_v14 = vpop.f32.mrf.mxu0 }
  0xeb   : > { %v657_v29 = vmul.f32 %v3992_v52, %v586_v14  ;;  %v4170_v24 = vsel %vm551_vm0, %v768_v16, %v824_v17 }
  0xec   : > { %v1458_v36 = vrot.slane %v4170_v24, 1  ;;  %v1778_v40 = vrot.slane %v4170_v24, 2 }
  0xed   : > { %v693_v18 = vadd.f32 %v3997_v54, %v657_v29  ;;  %3268 = vmatmul.msk.bf16.gmra.mxu2 %vm1266_vm2, %v1247_v15 }
  0xef   : > { %v725_v19 = vmax.f32 %v693_v18, 0.0 }
  0xf1   : > { %v825_v20 = vrot.slane %v725_v19, 7  ;;  %v912_v23 = vrot.slane %v725_v19, 5 }
  0xf2   : > { %v589_v25 = vpop.f32.mrf.mxu0 }
  0xf3   : > { %v960_v26 = vsel %vm551_vm0, %v825_v20, %v912_v23  ;;  %v658_v27 = vmul.f32 %v3992_v52, %v589_v25  ;;  %v4179_v30 = vsel %vm551_vm0, %v824_v17, %v825_v20  ;;  %v3640_v20 = vld [vmem:[%s5596_s3 + $0x98] sm:$0xff] }
  0xf4   : > { %v1461_v31 = vrot.slane %v960_v26, 1  ;;  %v1781_v34 = vrot.slane %v960_v26, 2  ;;  %v1459_v37 = vrot.slane %v4179_v30, 1  ;;  %v1779_v41 = vrot.slane %v4179_v30, 2  ;;  %2285 = vmatpush.bf16.msrb.mxu1 %v3640_v20  ;;  %v1251_v26 = vpop.permute.xlu2 %1250 }
  0xf5   : > { %v694_v39 = vadd.f32 %v3997_v54, %v658_v27  ;;  %3382 = vmatmul.msk.bf16.vlgmr.msrb.gmra.mxu0 %vm1019_vm5, %v4103_v3 }
  0xf6   : > { %3185 = vmatmul.msk.bf16.gmra.mxu1 %vm1019_vm5, %v4176_v28  ;;  %v1460_v8 = vsel %vm1437_vm4, %v1458_v36, %v1459_v37  ;;  %v1462_v22 = vsel %vm1437_vm4, %v1459_v37, %v1461_v31  ;;  %v1780_v43 = vsel %vm1757_vm3, %v1778_v40, %v1779_v41  ;;  %v1782_v44 = vsel %vm1757_vm3, %v1779_v41, %v1781_v34 }
  0xf7   : > { %v4194_v45 = vpack.c.bf16 %v1462_v22, %v1460_v8  ;;  %v4196_v47 = vpack.c.bf16 %v1782_v44, %v1780_v43  ;;  %v726_v3 = vmax.f32 %v694_v39, 0.0  ;;  %v4245_v44 = vpack.c.bf16 %v4179_v30, %v4170_v24 }
  0xf9   : > { %v769_v51 = vrot.slane %v726_v3, 1  ;;  %v827_v55 = vrot.slane %v726_v3, 7  ;;  %5624 = vst [vmem:[#allocation9_spill] sm:$0xff] %v4245_v44 }
  0xfa   : > { %v591_v48 = vpop.f32.mrf.mxu0 }
  0xfb   : > { %v659_v49 = vmul.f32 %v3992_v52, %v591_v48  ;;  %v4202_v61 = vsel %vm551_vm0, %v769_v51, %v827_v55 }
  0xfc   : > { %v1463_v7 = vrot.slane %v4202_v61, 1  ;;  %v1783_v14 = vrot.slane %v4202_v61, 2 }
  0xfd   : > { %v695_v56 = vadd.f32 %v3997_v54, %v659_v49  ;;  %3269 = vmatmul.msk.bf16.gmra.mxu2 %vm1266_vm2, %v1249_v50 }
  0xff   : > { %v727_v57 = vmax.f32 %v695_v56, 0.0 }
 0x101   : > { %v828_v59 = vrot.slane %v727_v57, 7  ;;  %v913_v60 = vrot.slane %v727_v57, 5 }
 0x102   : > { %v594_v62 = vpop.f32.mrf.mxu0 }
 0x103   : > { %v961_v63 = vsel %vm551_vm0, %v828_v59, %v913_v60  ;;  %v660_v0 = vmul.f32 %v3992_v52, %v594_v62  ;;  %v4211_v2 = vsel %vm551_vm0, %v827_v55, %v828_v59 }
 0x104   : > { %v1466_v5 = vrot.slane %v961_v63, 1  ;;  %v1786_v6 = vrot.slane %v961_v63, 2  ;;  %v1464_v12 = vrot.slane %v4211_v2, 1  ;;  %v1784_v29 = vrot.slane %v4211_v2, 2 }
 0x105   : > { %v696_v13 = vadd.f32 %v3997_v54, %v660_v0  ;;  %3383 = vmatmul.msk.bf16.gmra.mxu0 %vm1019_vm5, %v4064_v21 }
 0x106   : > { %3186 = vmatmul.msk.bf16.gmra.mxu1 %vm1019_vm5, %v4208_v1  ;;  %v1465_v53 = vsel %vm1437_vm4, %v1463_v7, %v1464_v12  ;;  %v1467_v58 = vsel %vm1437_vm4, %v1464_v12, %v1466_v5  ;;  %v1785_v15 = vsel %vm1757_vm3, %v1783_v14, %v1784_v29  ;;  %v1787_v16 = vsel %vm1757_vm3, %v1784_v29, %v1786_v6  ;;  %v1253_v14 = vpop.permute.xlu0 %1252 }
 0x107   : > { %v4226_v17 = vpack.c.bf16 %v1467_v58, %v1465_v53  ;;  %v4228_v18 = vpack.c.bf16 %v1787_v16, %v1785_v15  ;;  %v728_v19 = vmax.f32 %v696_v13, 0.0 }
 0x109   : > { %v770_v27 = vrot.slane %v728_v19, 1  ;;  %v830_v31 = vrot.slane %v728_v19, 7 }
 0x10a   : > { %v596_v23 = vpop.f32.mrf.mxu0 }
 0x10b   : > { %v661_v25 = vmul.f32 %v3992_v52, %v596_v23  ;;  %v4237_v40 = vsel %vm551_vm0, %v770_v27, %v830_v31  ;;  %v4279_v23 = vpack.c.bf16 %v4211_v2, %v4202_v61  ;;  %v335_v2 = vld [vmem:[%s3881_s23 + $0x78] sm:$0xff]  }
 0x10c   : > { %v1468_v50 = vrot.slane %v4237_v40, 1  ;;  %v1788_v56 = vrot.slane %v4237_v40, 2 }
 0x10d   : > { %v697_v34 = vadd.f32 %v3997_v54, %v661_v25  ;;  %3270 = vmatmul.msk.bf16.gmra.mxu2 %vm1266_vm2, %v1251_v26  ;;  %5625 = vst [vmem:[#allocation10_spill] sm:$0xff] %v4279_v23 }
 0x10f   : > { %v729_v36 = vmax.f32 %v697_v34, 0.0 }
 0x110   : > { %v4239_v8 = vpop.f32.mrf.mxu2 }
 0x111   : > { %v831_v37 = vrot.slane %v729_v36, 7  ;;  %v914_v39 = vrot.slane %v729_v36, 5 }
 0x112   : > { %v599_v41 = vpop.f32.mrf.mxu0 }
 0x113   : > { %v962_v22 = vsel %vm551_vm0, %v831_v37, %v914_v39  ;;  %v662_v43 = vmul.f32 %v3992_v52, %v599_v41  ;;  %v4248_v3 = vsel %vm551_vm0, %v830_v31, %v831_v37  ;;  %v3631_v37 = vld [vmem:[%s5596_s3 + $0x50] sm:$0xff] }
 0x114   : > { %v1471_v48 = vrot.slane %v962_v22, 1  ;;  %v1791_v49 = vrot.slane %v962_v22, 2  ;;  %v1469_v51 = vrot.slane %v4248_v3, 1  ;;  %v1789_v57 = vrot.slane %v4248_v3, 2  ;;  %1961 = vmatpush.bf16.msrb.mxu2 %v3631_v37 }
 0x115   : > { %v698_v55 = vadd.f32 %v3997_v54, %v662_v43  ;;  %3384 = vmatmul.msk.bf16.gmra.mxu0 %vm1019_vm5, %v4176_v28  ;;  %v367_v43 = vunpack.c.l.bf16 %v335_v2 }
 0x116   : > { %3187 = vmatmul.msk.bf16.gmra.mxu1 %vm1019_vm5, %v4245_v44  ;;  %v1470_v24 = vsel %vm1437_vm4, %v1468_v50, %v1469_v51  ;;  %v1472_v30 = vsel %vm1437_vm4, %v1469_v51, %v1471_v48  ;;  %v1790_v59 = vsel %vm1757_vm3, %v1788_v56, %v1789_v57  ;;  %v1792_v60 = vsel %vm1757_vm3, %v1789_v57, %v1791_v49 }
 0x117   : > { %v4263_v62 = vpack.c.bf16 %v1472_v30, %v1470_v24  ;;  %v730_v63 = vmax.f32 %v698_v55, 0.0  ;;  %v4265_v0 = vpack.c.bf16 %v1792_v60, %v1790_v59  ;;  %v368_v48 = vunpack.c.h.bf16 %v335_v2 }
 0x118   : > { %v4267_v6 = vpop.f32.mrf.mxu2  ;;  %v404_v51 = vmul.f32 %v3887_v4, %v367_v43 }
 0x119   : > { %v771_v12 = vrot.slane %v730_v63, 1  ;;  %v833_v13 = vrot.slane %v730_v63, 7  ;;  %v405_v55 = vmul.f32 %v3887_v4, %v368_v48 }
 0x11a   : > { %v601_v5 = vpop.f32.mrf.mxu0  ;;  %v440_v59 = vadd.f32 %v3897_v10, %v404_v51 }
 0x11b   : > { %v663_v7 = vmul.f32 %v3992_v52, %v601_v5  ;;  %v4273_v58 = vsel %vm551_vm0, %v771_v12, %v833_v13  ;;  %v441_v60 = vadd.f32 %v3897_v10, %v405_v55  ;;  %v3630_v55 = vld [vmem:[%s5596_s3 + $0x48] sm:$0xff] }
 0x11c   : > { %v1473_v31 = vrot.slane %v4273_v58, 1  ;;  %v1793_v61 = vrot.slane %v4273_v58, 2  ;;  %1962 = vmatpush.bf16.msrb.mxu2 %v3630_v55 }
 0x11d   : > { %v699_v29 = vadd.f32 %v3997_v54, %v663_v7  ;;  %3271 = vmatmul.msk.bf16.gmra.mxu2 %vm1266_vm2, %v1253_v14  ;;  %v473_v4 = vmax.f32 %v441_v60, 0.0  ;;  %v1255_v14 = vpop.permute.xlu2 %1254 }
 0x11f   : > { %v731_v53 = vmax.f32 %v699_v29, 0.0 }
 0x120   : > { %v4275_v20 = vpop.f32.mrf.mxu2 }
 0x121   : > { %v834_v15 = vrot.slane %v731_v53, 7  ;;  %v915_v16 = vrot.slane %v731_v53, 5 }
 0x122   : > { %v604_v19 = vpop.f32.mrf.mxu0 }
 0x123   : > { %v963_v25 = vsel %vm551_vm0, %v834_v15, %v915_v16  ;;  %v664_v26 = vmul.f32 %v3992_v52, %v604_v19  ;;  %v4284_v27 = vsel %vm551_vm0, %v833_v13, %v834_v15  ;;  %v472_v13 = vmax.f32 %v440_v59, 0.0 }
 0x124   : > { %v1476_v34 = vrot.slane %v963_v25, 1  ;;  %v1796_v36 = vrot.slane %v963_v25, 2  ;;  %v1474_v39 = vrot.slane %v4284_v27, 1  ;;  %v1794_v22 = vrot.slane %v4284_v27, 2 }
 0x125   : > { %v700_v41 = vadd.f32 %v3997_v54, %v664_v26  ;;  %3385 = vmatmul.msk.bf16.gmra.mxu0 %vm1019_vm5, %v4208_v1  ;;  %v489_v16 = vpack.c.bf16 %v473_v4, %v472_v13  ;;  %v4317_v26 = vpop.permute.xlu1 %1260  ;;  %v3629_v4 = vld [vmem:[%s5596_s3 + $0x40] sm:$0xff] }
 0x126   : > { %3188 = vmatmul.msk.bf16.gmra.mxu1 %vm1019_vm5, %v4279_v23  ;;  %v1475_v49 = vsel %vm1437_vm4, %v1473_v31, %v1474_v39  ;;  %v1477_v50 = vsel %vm1437_vm4, %v1474_v39, %v1476_v34  ;;  %v1795_v56 = vsel %vm1757_vm3, %v1793_v61, %v1794_v22  ;;  %v1797_v57 = vsel %vm1757_vm3, %v1794_v22, %v1796_v36 }
 0x127   : > { %v4305_v24 = vpack.c.bf16 %v1477_v50, %v1475_v49  ;;  %v732_v30 = vmax.f32 %v700_v41, 0.0  ;;  %v4311_v7 = vpack.c.bf16 %v1797_v57, %v1795_v56  ;;  %3165 = vmatmul.msk.bf16.gmra.mxu3 %vm502_vm1, %v489_v16  ;;  %v4328_v61 = vpack.c.bf16 %v4248_v3, %v4237_v40  ;;  %1963 = vmatpush.bf16.msrb.mxu2 %v3629_v4 }
 0x128   : > { %v4309_v5 = vpop.f32.mrf.mxu2 }
 0x129   : > { %v772_v29 = vrot.slane %v732_v30, 1  ;;  %v836_v53 = vrot.slane %v732_v30, 7  ;;  %5626 = vst [vmem:[#allocation11_spill] sm:$0xff] %v4328_v61 }
 0x12a   : > { %v606_v63 = vpop.f32.mrf.mxu0 }
 0x12b   : > { %v665_v12 = vmul.f32 %v3992_v52, %v606_v63  ;;  %v4320_v31 = vsel %vm551_vm0, %v772_v29, %v836_v53  ;;  %v3639_v29 = vld [vmem:[%s5596_s3 + $0x90] sm:$0xff] }
 0x12c   : > { %v1478_v43 = vrot.slane %v4320_v31, 1  ;;  %v1798_v50 = vrot.slane %v4320_v31, 2  ;;  %2286 = vmatpush.bf16.msrb.mxu1 %v3639_v29 }
 0x12d   : > { %v701_v15 = vadd.f32 %v3997_v54, %v665_v12  ;;  %3272 = vmatmul.msk.bf16.gmra.mxu2 %vm1266_vm2, %v1255_v14  ;;  %v1257_v14 = vpop.permute.xlu1 %1256 }
 0x12f   : > { %v733_v19 = vmax.f32 %v701_v15, 0.0 }
 0x130   : > { %v4322_v36 = vpop.f32.mrf.mxu2 }
 0x131   : > { %v837_v10 = vrot.slane %v733_v19, 7  ;;  %v916_v25 = vrot.slane %v733_v19, 5 }
 0x132   : > { %v609_v34 = vpop.f32.mrf.mxu0 }
 0x133   : > { %v964_v37 = vsel %vm551_vm0, %v837_v10, %v916_v25  ;;  %v666_v39 = vmul.f32 %v3992_v52, %v609_v34  ;;  %v4331_v2 = vsel %vm551_vm0, %v836_v53, %v837_v10  ;;  %v4364_v34 = vpop.permute.xlu0 %1262 }
 0x134   : > { %v1481_v41 = vrot.slane %v964_v37, 1  ;;  %v1801_v22 = vrot.slane %v964_v37, 2  ;;  %v1479_v48 = vrot.slane %v4331_v2, 1  ;;  %v1799_v51 = vrot.slane %v4331_v2, 2 }
 0x135   : > { %v702_v49 = vadd.f32 %v3997_v54, %v666_v39  ;;  %3386 = vmatmul.msk.bf16.gmra.mxu0 %vm1019_vm5, %v4245_v44 }
 0x136   : > { %3189 = vmatmul.msk.bf16.gmra.mxu1 %vm1019_vm5, %v4328_v61  ;;  %v1480_v40 = vsel %vm1437_vm4, %v1478_v43, %v1479_v48  ;;  %v1482_v3 = vsel %vm1437_vm4, %v1479_v48, %v1481_v41  ;;  %v1800_v56 = vsel %vm1757_vm3, %v1798_v50, %v1799_v51  ;;  %v1802_v57 = vsel %vm1757_vm3, %v1799_v51, %v1801_v22 }
 0x137   : > { %v4349_v30 = vpack.c.bf16 %v1482_v3, %v1480_v40  ;;  %v4351_v59 = vpack.c.bf16 %v1802_v57, %v1800_v56  ;;  %v734_v60 = vmax.f32 %v702_v49, 0.0  ;;  %v4375_v49 = vpack.c.bf16 %v4284_v27, %v4273_v58 }
 0x138   : > { %v4353_v12 = vpop.f32.mrf.mxu2 }
 0x139   : > { %v773_v53 = vrot.slane %v734_v60, 1  ;;  %v839_v15 = vrot.slane %v734_v60, 7  ;;  %5627 = vst [vmem:[#allocation12_spill] sm:$0xff] %v4375_v49 }
 0x13a   : > { %v611_v63 = vpop.f32.mrf.mxu0 }
 0x13b   : > { %v667_v13 = vmul.f32 %v3992_v52, %v611_v63  ;;  %v4367_v37 = vsel %vm551_vm0, %v773_v53, %v839_v15 }
 0x13c   : > { %v1483_v55 = vrot.slane %v4367_v37, 1  ;;  %v1803_v58 = vrot.slane %v4367_v37, 2 }
 0x13d   : > { %v703_v16 = vadd.f32 %v3997_v54, %v667_v13  ;;  %3273 = vmatmul.msk.bf16.gmra.mxu2 %vm1266_vm2, %v1257_v14 }
 0x13f   : > { %v735_v19 = vmax.f32 %v703_v16, 0.0  ;;  %v3619_v16 = vld [vmem:[%s3881_s23 + $0x78] sm:$0xff] }
 0x140   : > { %v4369_v41 = vpop.f32.mrf.mxu2  ;;  %1264 = vrot.lane.b32.xlu2 %v3619_v16, %s3777_s17 }
 0x141   : > { %v840_v10 = vrot.slane %v735_v19, 7  ;;  %v917_v25 = vrot.slane %v735_v19, 5 }
 0x142   : > { %v614_v39 = vpop.f32.mrf.mxu0 }
 0x143   : > { %v965_v22 = vsel %vm551_vm0, %v840_v10, %v917_v25  ;;  %v668_v43 = vmul.f32 %v3992_v52, %v614_v39  ;;  %v1074_v48 = vpop.f32.mrf.mxu1  ;;  %v4378_v50 = vsel %vm551_vm0, %v839_v15, %v840_v10 }
 0x144   : > { %v1486_v51 = vrot.slane %v965_v22, 1  ;;  %v1806_v40 = vrot.slane %v965_v22, 2  ;;  %v4381_v3 = vadd.f32 %v4239_v8, %v1074_v48  ;;  %v1484_v57 = vrot.slane %v4378_v50, 1 }
 0x145   : > { %v704_v56 = vadd.f32 %v3997_v54, %v668_v43  ;;  %3387 = vmatmul.msk.bf16.gmra.mxu0 %vm1019_vm5, %v4279_v23  ;;  %v1804_v27 = vrot.slane %v4378_v50, 2  ;;  %v1259_v43 = vpop.permute.xlu0 %1258 }
 0x146   : > { %5628 = vst [vmem:[#allocation13_spill] sm:$0xff] %v4381_v3  ;;  %3190 = vmatmul.msk.bf16.gmra.mxu1 %vm1019_vm5, %v4375_v49  ;;  %v1485_v63 = vsel %vm1437_vm4, %v1483_v55, %v1484_v57  ;;  %v1487_v14 = vsel %vm1437_vm4, %v1484_v57, %v1486_v51  ;;  %v629_v51 = vpop.f32.mrf.mxu3 }
 0x147   : > { %v1805_v8 = vsel %vm1757_vm3, %v1803_v58, %v1804_v27  ;;  %v1807_v60 = vsel %vm1757_vm3, %v1804_v27, %v1806_v40  ;;  %v736_v13 = vmax.f32 %v704_v56, 0.0  ;;  %v4398_v29 = vpack.c.bf16 %v1487_v14, %v1485_v63 }
 0x148   : > { %v4395_v4 = vpack.c.bf16 %v1807_v60, %v1805_v8  ;;  %v4400_v15 = vpop.f32.mrf.mxu2 }
 0x149   : > { %v774_v25 = vrot.slane %v736_v13, 1  ;;  %v842_v39 = vrot.slane %v736_v13, 7 }
 0x14a   : > { %v616_v53 = vpop.f32.mrf.mxu0 }
 0x14b   : > { %v669_v19 = vmul.f32 %v3992_v52, %v616_v53  ;;  %v1076_v10 = vpop.f32.mrf.mxu1  ;;  %v4411_v55 = vsel %vm551_vm0, %v774_v25, %v842_v39 }
 0x14c   : > { %v4405_v22 = vadd.f32 %v4267_v6, %v1076_v10  ;;  %v4417_v6 = vpack.c.bf16 %v4331_v2, %v4320_v31  ;;  %v1488_v14 = vrot.slane %v4411_v55, 1  ;;  %v674_v10 = vmul.f32 %v3992_v52, %v629_v51 }
 0x14d   : > { %v705_v48 = vadd.f32 %v3997_v54, %v669_v19  ;;  %3274 = vmatmul.msk.bf16.gmra.mxu2 %vm1266_vm2, %v1259_v43 }
 0x14e   : > { %5629 = vst [vmem:[#allocation14_spill] sm:$0xff] %v4405_v22  ;;  %v631_v2 = vpop.f32.mrf.mxu3 }
 0x14f   : > { %v737_v40 = vmax.f32 %v705_v48, 0.0  ;;  %v675_v48 = vmul.f32 %v3992_v52, %v631_v2 }
 0x150   : > { %v4413_v27 = vpop.f32.mrf.mxu2 }
 0x151   : > { %v843_v56 = vrot.slane %v737_v40, 7  ;;  %v918_v57 = vrot.slane %v737_v40, 5 }
 0x152   : > { %v619_v58 = vpop.f32.mrf.mxu0 }
 0x153   : > { %v966_v8 = vsel %vm551_vm0, %v843_v56, %v918_v57  ;;  %v670_v60 = vmul.f32 %v3992_v52, %v619_v58  ;;  %v1079_v63 = vpop.f32.mrf.mxu1  ;;  %v4422_v13 = vsel %vm551_vm0, %v842_v39, %v843_v56  ;;  %v1808_v39 = vrot.slane %v4411_v55, 2 }
 0x154   : > { %v1491_v53 = vrot.slane %v966_v8, 1  ;;  %v1811_v16 = vrot.slane %v966_v8, 2  ;;  %v4426_v19 = vadd.f32 %v4275_v20, %v1079_v63  ;;  %v1489_v25 = vrot.slane %v4422_v13, 1 }
 0x155   : > { %v706_v31 = vadd.f32 %v3997_v54, %v670_v60  ;;  %3388 = vmatmul.msk.bf16.gmra.mxu0 %vm1019_vm5, %v4328_v61  ;;  %v1809_v43 = vrot.slane %v4422_v13, 2  ;;  %v710_v20 = vadd.f32 %v3997_v54, %v674_v10  ;;  %v711_v8 = vadd.f32 %v3997_v54, %v675_v48 }
 0x156   : > { %5630 = vst [vmem:[#allocation15_spill] sm:$0xff] %v4426_v19  ;;  %3191 = vmatmul.msk.bf16.gmra.mxu1 %vm1019_vm5, %v4417_v6  ;;  %v1490_v57 = vsel %vm1437_vm4, %v1488_v14, %v1489_v25  ;;  %v1492_v63 = vsel %vm1437_vm4, %v1489_v25, %v1491_v53  ;;  %v3638_v53 = vld [vmem:[%s5596_s3 + $0x88] sm:$0xff] }
 0x157   : > { %v738_v51 = vmax.f32 %v706_v31, 0.0  ;;  %v1810_v40 = vsel %vm1757_vm3, %v1808_v39, %v1809_v43  ;;  %v1812_v56 = vsel %vm1757_vm3, %v1809_v43, %v1811_v16  ;;  %v742_v58 = vmax.f32 %v710_v20, 0.0  ;;  %2287 = vmatpush.bf16.msrb.mxu1 %v3638_v53 }
 0x158   : > { %v4443_v60 = vpack.c.bf16 %v1812_v56, %v1810_v40  ;;  %v4446_v44 = vpack.c.bf16 %v1492_v63, %v1490_v57  ;;  %v4448_v2 = vpop.f32.mrf.mxu2  ;;  %v743_v1 = vmax.f32 %v711_v8, 0.0  ;;  %v634_v40 = vpop.f32.mrf.mxu3 }
 0x159   : > { %v775_v61 = vrot.slane %v738_v51, 1  ;;  %v845_v23 = vrot.slane %v738_v51, 7  ;;  %v777_v31 = vrot.slane %v742_v58, 1  ;;  %v851_v39 = vrot.slane %v742_v58, 7 }
 0x15a   : > { %v621_v10 = vpop.f32.mrf.mxu0  ;;  %v852_v20 = vrot.slane %v743_v1, 7  ;;  %v921_v51 = vrot.slane %v743_v1, 5  ;;  %v676_v57 = vmul.f32 %v3992_v52, %v634_v40  ;;  %v3637_v40 = vld [vmem:[%s5596_s3 + $0x80] sm:$0xff] }
 0x15b   : > { %v671_v16 = vmul.f32 %v3992_v52, %v621_v10  ;;  %v1081_v14 = vpop.f32.mrf.mxu1  ;;  %v951_v25 = vsel %vm551_vm0, %v775_v61, %v845_v23  ;;  %v4460_v56 = vsel %vm551_vm0, %v777_v31, %v851_v39  ;;  %v4479_v31 = vld [vmem:[%s5600_s7] ss:$0 sm:$0xff]  ;;  %2288 = vmatpush.bf16.msrb.mxu1 %v3637_v40 }
 0x15c   : > { %v4452_v43 = vadd.f32 %v4309_v5, %v1081_v14  ;;  %v4464_v5 = vsel %vm551_vm0, %v851_v39, %v852_v20  ;;  %v1503_v58 = vrot.slane %v4460_v56, 1  ;;  %v1823_v8 = vrot.slane %v4460_v56, 2 }
 0x15d   : > { %v707_v48 = vadd.f32 %v3997_v54, %v671_v16  ;;  %3342 = vmatmul.msk.bf16.vlgmr.msrb.gmra.mxu2 %vm1019_vm5, %v4079_v38  ;;  %v4472_v54 = vpack.c.bf16 %v4378_v50, %v4367_v37  ;;  %v969_v1 = vsel %vm551_vm0, %v852_v20, %v921_v51  ;;  %v1504_v52 = vrot.slane %v4464_v5, 1 }
 0x15e   : > { %5631 = vst [vmem:[#allocation16_spill] sm:$0xff] %v4452_v43  ;;  %v1506_v61 = vrot.slane %v969_v1, 1  ;;  %v1826_v10 = vrot.slane %v969_v1, 2  ;;  %v712_v39 = vadd.f32 %v4479_v31, %v676_v57  ;;  %v1824_v16 = vrot.slane %v4464_v5, 2 }
 0x15f   : > { %v739_v63 = vmax.f32 %v707_v48, 0.0  ;;  %5632 = vst [vmem:[#allocation17_spill] sm:$0xff] %v4472_v54  ;;  %v1493_v14 = vrot.slane %v951_v25, 1  ;;  %v1505_v37 = vsel %vm1437_vm4, %v1503_v58, %v1504_v52  ;;  %v4496_v58 = vld [vmem:[%s5599_s6] ss:$0 sm:$0xff] }
 0x160   : > { %v4484_v20 = vpop.f32.mrf.mxu2  ;;  %v744_v51 = vmax.f32 %v712_v39, 0.0  ;;  %v1825_v1 = vsel %vm1757_vm3, %v1823_v8, %v1824_v16  ;;  %v1827_v43 = vsel %vm1757_vm3, %v1824_v16, %v1826_v10  ;;  %v1507_v57 = vsel %vm1437_vm4, %v1504_v52, %v1506_v61  ;;  %v636_v3 = vpop.f32.mrf.mxu3 }
 0x161   : > { %v846_v53 = vrot.slane %v739_v63, 7  ;;  %v919_v48 = vrot.slane %v739_v63, 5  ;;  %v4500_v22 = vpack.c.bf16 %v1827_v43, %v1825_v1  ;;  %v1813_v61 = vrot.slane %v951_v25, 2 }
 0x162   : > { %v624_v50 = vpop.f32.mrf.mxu0  ;;  %v4515_v43 = vpack.c.bf16 %v1507_v57, %v1505_v37 }
 0x163   : > { %v967_v28 = vsel %vm551_vm0, %v846_v53, %v919_v48  ;;  %v672_v63 = vmul.f32 %v4496_v58, %v624_v50  ;;  %v1084_v39 = vpop.f32.mrf.mxu1  ;;  %v847_v19 = vsel %vm551_vm0, %v845_v23, %v846_v53  ;;  %5633 = vst [vmem:[#allocation18_spill] sm:$0xff] %v4500_v22  ;;  %v854_v23 = vrot.slane %v744_v51, 7 }
 0x164   : > { %v1496_v21 = vrot.slane %v967_v28, 1  ;;  %v1816_v8 = vrot.slane %v967_v28, 2  ;;  %v4503_v10 = vadd.f32 %v4322_v36, %v1084_v39  ;;  %v4505_v52 = vpack.c.bf16 %v847_v19, %v951_v25  ;;  %5636 = vst [vmem:[#allocation21_spill] sm:$0xff] %v4515_v43 }
 0x165   : > { %v708_v16 = vadd.f32 %v4479_v31, %v672_v63  ;;  %3389 = vmatmul.msk.bf16.gmra.mxu0 %vm1019_vm5, %v4375_v49  ;;  %v1494_v48 = vrot.slane %v847_v19, 1  ;;  %v1814_v50 = vrot.slane %v847_v19, 2  ;;  %v778_v28 = vrot.slane %v744_v51, 1 }
 0x166   : > { %5634 = vst [vmem:[#allocation19_spill] sm:$0xff] %v4503_v10  ;;  %3192 = vmatmul.msk.bf16.gmra.mxu1 %vm1019_vm5, %v4472_v54  ;;  %3194 = vmatmul.msk.bf16.vlgmr.msrb.gmra.mxu3 %vm1019_vm5, %v4505_v52  ;;  %v677_v36 = vmul.f32 %v4496_v58, %v636_v3 }
 0x167   : > { %5635 = vst [vmem:[#allocation20_spill] sm:$0xff] %v4505_v52  ;;  %v1815_v25 = vsel %vm1757_vm3, %v1813_v61, %v1814_v50  ;;  %v1817_v53 = vsel %vm1757_vm3, %v1814_v50, %v1816_v8  ;;  %v1495_v40 = vsel %vm1437_vm4, %v1493_v14, %v1494_v48  ;;  %v1497_v63 = vsel %vm1437_vm4, %v1494_v48, %v1496_v21 }
 0x168   : > { %v713_v19 = vadd.f32 %v4479_v31, %v677_v36  ;;  %v4521_v1 = vpack.c.bf16 %v1817_v53, %v1815_v25  ;;  %v740_v39 = vmax.f32 %v708_v16, 0.0  ;;  %v4524_v10 = vpop.f32.mrf.mxu2  ;;  %v4527_v3 = vsel %vm551_vm0, %v778_v28, %v854_v23 }
 0x169   : > { %v4529_v51 = vpack.c.bf16 %v1497_v63, %v1495_v40  ;;  %v1508_v21 = vrot.slane %v4527_v3, 1  ;;  %v1828_v28 = vrot.slane %v4527_v3, 2 }
 0x16a   : > { %v626_v49 = vpop.f32.mrf.mxu0  ;;  %v745_v37 = vmax.f32 %v713_v19, 0.0  ;;  %v776_v48 = vrot.slane %v740_v39, 1  ;;  %v848_v36 = vrot.slane %v740_v39, 7  ;;  %v4548_v39 = vpack.c.bf16 %v4422_v13, %v4411_v55 }
 0x16b   : > { %v673_v57 = vmul.f32 %v4496_v58, %v626_v49  ;;  %v1086_v8 = vpop.f32.mrf.mxu1 }
 0x16c   : > { %v4533_v14 = vadd.f32 %v4353_v12, %v1086_v8  ;;  %v855_v61 = vrot.slane %v745_v37, 7  ;;  %v922_v16 = vrot.slane %v745_v37, 5  ;;  %5638 = vst [vmem:[#allocation23_spill] sm:$0xff] %v4548_v39 }
 0x16d   : > { %v709_v50 = vadd.f32 %v4479_v31, %v673_v57  ;;  %3343 = vmatmul.msk.bf16.gmra.mxu2 %vm1019_vm5, %v4040_v42 }
 0x16e   : > { %5637 = vst [vmem:[#allocation22_spill] sm:$0xff] %v4533_v14  ;;  %v4539_v25 = vsel %vm551_vm0, %v854_v23, %v855_v61  ;;  %v970_v12 = vsel %vm551_vm0, %v855_v61, %v922_v16  ;;  %v952_v61 = vsel %vm551_vm0, %v776_v48, %v848_v36 }
 0x16f   : > { %v741_v53 = vmax.f32 %v709_v50, 0.0  ;;  %v1509_v49 = vrot.slane %v4539_v25, 1  ;;  %v1511_v40 = vrot.slane %v970_v12, 1  ;;  %v1831_v19 = vrot.slane %v970_v12, 2 }
 0x170   : > { %v1829_v63 = vrot.slane %v4539_v25, 2  ;;  %v4553_v50 = vpop.f32.mrf.mxu2 }
 0x171   : > { %v849_v37 = vrot.slane %v741_v53, 7  ;;  %v920_v57 = vrot.slane %v741_v53, 5  ;;  %v1510_v23 = vsel %vm1437_vm4, %v1508_v21, %v1509_v49  ;;  %v1512_v42 = vsel %vm1437_vm4, %v1509_v49, %v1511_v40 }
 0x172   : > { %v4551_v8 = vpop.f32.mrf.mxu0  ;;  %v1830_v16 = vsel %vm1757_vm3, %v1828_v28, %v1829_v63  ;;  %v1832_v12 = vsel %vm1757_vm3, %v1829_v63, %v1831_v19  ;;  %v4563_v21 = vpack.c.bf16 %v1512_v42, %v1510_v23  ;;  %v1498_v28 = vrot.slane %v952_v61, 1 }
 0x173   : > { %5639 = vst [vmem:[#allocation24_spill] sm:$0xff] %v4551_v8  ;;  %v968_v53 = vsel %vm551_vm0, %v849_v37, %v920_v57  ;;  %v1089_v14 = vpop.f32.mrf.mxu1  ;;  %v850_v55 = vsel %vm551_vm0, %v848_v36, %v849_v37  ;;  %v4561_v13 = vpack.c.bf16 %v1832_v12, %v1830_v16  ;;  %v1818_v40 = vrot.slane %v952_v61, 2 }
 0x174   : > { %v1501_v8 = vrot.slane %v968_v53, 1  ;;  %v1821_v43 = vrot.slane %v968_v53, 2  ;;  %v4566_v22 = vadd.f32 %v4369_v41, %v1089_v14  ;;  %v4568_v48 = vpack.c.bf16 %v850_v55, %v952_v61 }
 0x175   : > { %3390 = vmatmul.msk.bf16.gmra.mxu0 %vm1019_vm5, %v4417_v6  ;;  %v1499_v49 = vrot.slane %v850_v55, 1  ;;  %v1819_v19 = vrot.slane %v850_v55, 2  ;;  %v4598_v55 = vpack.c.bf16 %v4464_v5, %v4460_v56  ;;  %v3627_v5 = vld [vmem:[%s5596_s3 + $0x30] sm:$0xff] }
 0x176   : > { %5640 = vst [vmem:[#allocation25_spill] sm:$0xff] %v4568_v48  ;;  %3193 = vmatmul.msk.bf16.gmra.mxu1 %vm1019_vm5, %v4548_v39  ;;  %3195 = vmatmul.msk.bf16.gmra.mxu3 %vm1019_vm5, %v4568_v48 }
 0x177   : > { %v1820_v42 = vsel %vm1757_vm3, %v1818_v40, %v1819_v19  ;;  %v1822_v41 = vsel %vm1757_vm3, %v1819_v19, %v1821_v43  ;;  %v1500_v14 = vsel %vm1437_vm4, %v1498_v28, %v1499_v49  ;;  %v1502_v36 = vsel %vm1437_vm4, %v1499_v49, %v1501_v8  ;;  %5643 = vst [vmem:[#allocation28_spill] sm:$0xff] %v4598_v55 }
 0x178   : > { %v4580_v63 = vpack.c.bf16 %v1822_v41, %v1820_v42  ;;  %v4582_v37 = vpack.c.bf16 %v1502_v36, %v1500_v14  ;;  %v1359_v23 = vpop.f32.mrf.mxu2 }
 0x17a   : > { %v4584_v57 = vpop.f32.mrf.mxu0 }
 0x17b   : > { %5641 = vst [vmem:[#allocation26_spill] sm:$0xff] %v4584_v57  ;;  %v1091_v61 = vpop.f32.mrf.mxu1 }
 0x17c   : > { %v4587_v16 = vadd.f32 %v4400_v15, %v1091_v61  ;;  %v3628_v15 = vld [vmem:[%s5596_s3 + $0x38] sm:$0xff] }
 0x17d   : > { %3344 = vmatmul.msk.bf16.gmra.mxu2 %vm1019_vm5, %v4079_v38  ;;  %1640 = vmatpush.bf16.msrb.mxu3 %v3628_v15 }
 0x180   : > { %v1362_v43 = vpop.f32.mrf.mxu2 }
 0x181   : > { %1641 = vmatpush.bf16.msrb.mxu3 %v3627_v5 }
 0x182   : > { %v4591_v12 = vpop.f32.mrf.mxu0 }
 0x183   : > { %5642 = vst [vmem:[#allocation27_spill] sm:$0xff] %v4591_v12  ;;  %v1094_v53 = vpop.f32.mrf.mxu1 }
 0x184   : > { %v4594_v8 = vadd.f32 %v4413_v27, %v1094_v53 }
 0x185   : > { %3391 = vmatmul.msk.bf16.gmra.mxu0 %vm1019_vm5, %v4472_v54 }
 0x186   : > { %3196 = vmatmul.msk.bf16.gmra.mxu3 %vm1019_vm5, %v4598_v55  ;;  %3422 = vmatmul.msk.bf16.vlgmr.msrb.gmra.mxu1 %vm1019_vm5, %v4045_v46 }
 0x188   : > { %v1364_v28 = vpop.f32.mrf.mxu2 }
 0x18a   : > { %v4609_v27 = vpop.f32.mrf.mxu0 }
 0x18b   : > { %5644 = vst [vmem:[#allocation29_spill] sm:$0xff] %v4609_v27  ;;  %v1096_v49 = vpop.f32.mrf.mxu1 }
 0x18c   : > { %v4612_v56 = vadd.f32 %v4448_v2, %v1096_v49  ;;  %v4628_v2 = vpack.c.bf16 %v4539_v25, %v4527_v3  ;;  %v3626_v3 = vld [vmem:[%s5596_s3 + $0x28] sm:$0xff] }
 0x18d   : > { %3345 = vmatmul.msk.bf16.gmra.mxu2 %vm1019_vm5, %v4130_v32  ;;  %1642 = vmatpush.bf16.msrb.mxu3 %v3626_v3 }
 0x190   : > { %v4621_v19 = vpop.f32.mrf.mxu2 }
 0x192   : > { %v4619_v40 = vpop.f32.mrf.mxu0 }
 0x193   : > { %5645 = vst [vmem:[#allocation30_spill] sm:$0xff] %v4619_v40  ;;  %v1099_v42 = vpop.f32.mrf.mxu1 }
 0x194   : > { %v4624_v41 = vadd.f32 %v4484_v20, %v1099_v42 }
 0x195   : > { %3392 = vmatmul.msk.bf16.gmra.mxu0 %vm1019_vm5, %v4548_v39 }
 0x196   : > { %3197 = vmatmul.msk.bf16.gmra.mxu3 %vm1019_vm5, %v4628_v2  ;;  %3423 = vmatmul.msk.bf16.gmra.mxu1 %vm1019_vm5, %v4077_v35 }
 0x198   : > { %v4638_v36 = vpop.f32.mrf.mxu2 }
 0x19a   : > { %v4636_v14 = vpop.f32.mrf.mxu0 }
 0x19b   : > { %5646 = vst [vmem:[#allocation31_spill] sm:$0xff] %v4636_v14  ;;  %v1101_v61 = vpop.f32.mrf.mxu1 }
 0x19c   : > { %v4641_v20 = vadd.f32 %v4524_v10, %v1101_v61  ;;  %v3625_v10 = vld [vmem:[%s5596_s3 + $0x20] sm:$0xff] }
 0x19d   : > { %3346 = vmatmul.msk.bf16.gmra.mxu2 %vm1019_vm5, %v4161_v11  ;;  %1643 = vmatpush.bf16.msrb.mxu3 %v3625_v10 }
 0x1a0   : > { %v4650_v53 = vpop.f32.mrf.mxu2 }
 0x1a2   : > { %v4648_v25 = vpop.f32.mrf.mxu0 }
 0x1a3   : > { %5647 = vst [vmem:[#allocation32_spill] sm:$0xff] %v4648_v25  ;;  %v1104_v15 = vpop.f32.mrf.mxu1 }
 0x1a4   : > { %v4653_v49 = vadd.f32 %v4553_v50, %v1104_v15 }
 0x1a5   : > { %3393 = vmatmul.msk.bf16.gmra.mxu0 %vm1019_vm5, %v4505_v52 }
 0x1a6   : > { %3275 = vmatmul.msk.bf16.vlgmr.msra.gmra.mxu3 %vm1266_vm2, %v4317_v26  ;;  %3424 = vmatmul.msk.bf16.gmra.mxu1 %vm1019_vm5, %v4132_v33 }
 0x1a8   : > { %v4666_v42 = vpop.f32.mrf.mxu2 }
 0x1aa   : > { %v4664_v5 = vpop.f32.mrf.mxu0  ;;  %v639_v25 = vpop.f32.mrf.mxu3 }
 0x1ab   : > { %5648 = vst [vmem:[#allocation33_spill] sm:$0xff] %v4664_v5  ;;  %v1106_v50 = vpop.f32.mrf.mxu1  ;;  %v678_v10 = vmul.f32 %v4496_v58, %v639_v25 }
 0x1ac   : > { %v4668_v61 = vadd.f32 %v1359_v23, %v1106_v50  ;;  %v3644_v50 = vld [vmem:[%s5596_s3 + $0xb8] sm:$0xff] }
 0x1ad   : > { %3347 = vmatmul.msk.bf16.gmra.mxu2 %vm1019_vm5, %v4196_v47  ;;  %v714_v23 = vadd.f32 %v4479_v31, %v678_v10  ;;  %2450 = vmatpush.bf16.msra.mxu3 %v3644_v50 }
 0x1af   : > { %v746_v25 = vmax.f32 %v714_v23, 0.0  ;;  %v3652_v23 = vld [vmem:[%s5596_s3 + $0xf8] sm:$0xff] }
 0x1b0   : > { %v4674_v26 = vpop.f32.mrf.mxu2  ;;  %2758 = vmatpush.bf16.msra.mxu0 %v3652_v23 }
 0x1b1   : > { %v779_v10 = vrot.slane %v746_v25, 1  ;;  %v857_v27 = vrot.slane %v746_v25, 7 }
 0x1b2   : > { %v4672_v3 = vpop.f32.mrf.mxu0  ;;  %v641_v5 = vpop.f32.mrf.mxu3 }
 0x1b3   : > { %5649 = vst [vmem:[#allocation34_spill] sm:$0xff] %v4672_v3  ;;  %v1109_v15 = vpop.f32.mrf.mxu1  ;;  %v679_v12 = vmul.f32 %v4496_v58, %v641_v5  ;;  %v955_v50 = vsel %vm551_vm0, %v779_v10, %v857_v27 }
 0x1b4   : > { %v4676_v14 = vadd.f32 %v1362_v43, %v1109_v15  ;;  %v3648_v43 = vld [vmem:[%s5596_s3 + $0xd8] sm:$0xff]  ;;  %v2237_v5 = vrot.slane %v955_v50, 1  ;;  %v2402_v52 = vrot.slane %v955_v50, 2 }
 0x1b5   : > { %3394 = vmatmul.msk.bf16.gmra.mxu0 %vm1019_vm5, %v4568_v48  ;;  %2604 = vmatpush.bf16.msra.mxu2 %v3648_v43  ;;  %v715_v57 = vadd.f32 %v4479_v31, %v679_v12  ;;  %v3656_v31 = vld [vmem:[%s5596_s3 + $0x118] sm:$0xff]  ;;  %v1265_v12 = vpop.permute.xlu2 %1264 }
 0x1b6   : > { %3276 = vmatmul.msk.bf16.gmra.mxu3 %vm1266_vm2, %v4364_v34  ;;  %3425 = vmatmul.msk.bf16.gmra.mxu1 %vm1019_vm5, %v4159_v9 }
 0x1b7   : > { %v747_v43 = vmax.f32 %v715_v57, 0.0  ;;  %2912 = vmatpush.bf16.msra.mxu1 %v3656_v31 }
 0x1b8   : > { %v4694_v3 = vpop.f32.mrf.mxu2 }
 0x1b9   : > { %v858_v25 = vrot.slane %v747_v43, 7 }
 0x1ba   : > { %v4692_v15 = vpop.f32.mrf.mxu0 }
 0x1bb   : > { %5650 = vst [vmem:[#allocation35_spill] sm:$0xff] %v4692_v15  ;;  %v1111_v34 = vpop.f32.mrf.mxu1  ;;  %v859_v10 = vsel %vm551_vm0, %v857_v27, %v858_v25 }
 0x1bc   : > { %v4696_v40 = vadd.f32 %v1364_v28, %v1111_v34  ;;  %v923_v34 = vrot.slane %v747_v43, 5  ;;  %v2403_v39 = vrot.slane %v859_v10, 2 }
 0x1bd   : > { %3348 = vmatmul.msk.bf16.gmra.mxu2 %vm1019_vm5, %v4228_v18 }
 0x1be   : > { %v971_v57 = vsel %vm551_vm0, %v858_v25, %v923_v34  ;;  %v2404_v34 = vsel %vm1757_vm3, %v2402_v52, %v2403_v39  ;;  %v3650_v52 = vld [vmem:[%s5596_s3 + $0xe8] sm:$0xff] }
 0x1bf   : > { %v2240_v23 = vrot.slane %v971_v57, 1  ;;  %v2405_v43 = vrot.slane %v971_v57, 2 }
 0x1c0   : > { %v4708_v28 = vpop.f32.mrf.mxu2 }
 0x1c1   : > { %v2406_v27 = vsel %vm1757_vm3, %v2403_v39, %v2405_v43 }
 0x1c2   : > { %v4706_v15 = vpop.f32.mrf.mxu0  ;;  %v4729_v31 = vpack.c.bf16 %v2406_v27, %v2404_v34  ;;  %v4765_v34 = vpack.c.bf16 %v859_v10, %v955_v50 }
 0x1c3   : > { %5651 = vst [vmem:[#allocation36_spill] sm:$0xff] %v4706_v15  ;;  %v1114_v58 = vpop.f32.mrf.mxu1  ;;  %v2238_v15 = vrot.slane %v859_v10, 1 }
 0x1c4   : > { %v4714_v48 = vadd.f32 %v4621_v19, %v1114_v58  ;;  %5652 = vst [vmem:[#allocation37_spill] sm:$0xff] %v4729_v31 }
 0x1c5   : > { %3395 = vmatmul.msk.bf16.gmra.mxu0 %vm1019_vm5, %v4598_v55  ;;  %v2239_v19 = vsel %vm1437_vm4, %v2237_v5, %v2238_v15  ;;  %v2241_v58 = vsel %vm1437_vm4, %v2238_v15, %v2240_v23  ;;  %v3649_v15 = vld [vmem:[%s5596_s3 + $0xe0] sm:$0xff] }
 0x1c6   : > { %3277 = vmatmul.msk.bf16.gmra.mxu3 %vm1266_vm2, %v1265_v12  ;;  %3426 = vmatmul.msk.bf16.gmra.mxu1 %vm1019_vm5, %v4194_v45  ;;  %v4727_v25 = vpack.c.bf16 %v2241_v58, %v2239_v19  ;;  %v3651_v12 = vld [vmem:[%s5596_s3 + $0xf0] sm:$0xff] }
 0x1c7   : > { %2759 = vmatpush.bf16.msra.mxu0 %v3651_v12 }
 0x1c8   : > { %v1384_v57 = vpop.f32.mrf.mxu2 }
 0x1ca   : > { %v4734_v54 = vpop.f32.mrf.mxu0 }
 0x1cb   : > { %v1116_v55 = vpop.f32.mrf.mxu1  ;;  %5653 = vst [vmem:[#allocation38_spill] sm:$0xff] %v4734_v54  ;;  %2760 = vmatpush.bf16.msra.mxu0 %v3650_v52 }
 0x1cc   : > { %v4737_v5 = vadd.f32 %v4638_v36, %v1116_v55 }
 0x1cd   : > { %3349 = vmatmul.msk.bf16.gmra.mxu2 %vm1019_vm5, %v4265_v0 }
 0x1cf   : > { %2761 = vmatpush.bf16.msra.mxu0 %v3649_v15 }
 0x1d0   : > { %v1387_v39 = vpop.f32.mrf.mxu2 }
 0x1d2   : > { %v4752_v55 = vpop.f32.mrf.mxu0 }
 0x1d3   : > { %v1119_v23 = vpop.f32.mrf.mxu1  ;;  %5654 = vst [vmem:[#allocation39_spill] sm:$0xff] %v4752_v55 }
 0x1d4   : > { %v4748_v43 = vadd.f32 %v4650_v53, %v1119_v23 }
 0x1d5   : > { %3396 = vmatmul.msk.bf16.gmra.mxu0 %vm1019_vm5, %v4628_v2 }
 0x1d6   : > { %3302 = vmatmul.msk.bf16.vlgmr.msrb.gmra.mxu3 %vm1019_vm5, %v4077_v35  ;;  %3427 = vmatmul.msk.bf16.gmra.mxu1 %vm1019_vm5, %v4226_v17 }
 0x1d8   : > { %v1389_v36 = vpop.f32.mrf.mxu2 }
 0x1da   : > { %v4763_v53 = vpop.f32.mrf.mxu0 }
 0x1db   : > { %v1121_v19 = vpop.f32.mrf.mxu1  ;;  %5655 = vst [vmem:[#allocation40_spill] sm:$0xff] %v4763_v53 }
 0x1dc   : > { %v4759_v58 = vadd.f32 %v4666_v42, %v1121_v19 }
 0x1dd   : > { %3350 = vmatmul.msk.bf16.gmra.mxu2 %vm1019_vm5, %v4311_v7 }
 0x1e0   : > { %v4767_v27 = vpop.f32.mrf.mxu2 }
 0x1e2   : > { %v4778_v15 = vpop.f32.mrf.mxu0 }
 0x1e3   : > { %v1124_v12 = vpop.f32.mrf.mxu1  ;;  %5656 = vst [vmem:[#allocation41_spill] sm:$0xff] %v4778_v15  ;;  %v3655_v15 = vld [vmem:[%s5596_s3 + $0x110] sm:$0xff] }
 0x1e4   : > { %v4770_v52 = vadd.f32 %v4674_v26, %v1124_v12  ;;  %2913 = vmatpush.bf16.msra.mxu1 %v3655_v15 }
 0x1e5   : > { %3397 = vmatmul.msk.bf16.gmra.mxu0 %vm1019_vm5, %v4765_v34 }
 0x1e6   : > { %3303 = vmatmul.msk.bf16.gmra.mxu3 %vm1019_vm5, %v4045_v46  ;;  %3428 = vmatmul.msk.bf16.gmra.mxu1 %vm1019_vm5, %v4263_v62 }
 0x1e8   : > { %v4782_v10 = vpop.f32.mrf.mxu2 }
 0x1e9   : > { %v1134_v42 = vpop.f32.mrf.mxu3  ;;  %5657 = vst [vmem:[#allocation42_spill] sm:$0xff] %v4782_v10 }
 0x1ea   : > { %v4780_v50 = vadd.f32 %v1387_v39, %v1134_v42  ;;  %v4793_v55 = vpop.f32.mrf.mxu0 }
 0x1eb   : > { %v1126_v23 = vpop.f32.mrf.mxu1  ;;  %5659 = vst [vmem:[#allocation44_spill] sm:$0xff] %v4793_v55 }
 0x1ec   : > { %v4785_v26 = vadd.f32 %v4694_v3, %v1126_v23  ;;  %v3643_v3 = vld [vmem:[%s5596_s3 + $0xb0] sm:$0xff] }
 0x1ed   : > { %3351 = vmatmul.msk.bf16.gmra.mxu2 %vm1019_vm5, %v4351_v59  ;;  %2451 = vmatpush.bf16.msra.mxu3 %v3643_v3 }
 0x1f0   : > { %v4791_v46 = vpop.f32.mrf.mxu2 }
 0x1f1   : > { %v1136_v19 = vpop.f32.mrf.mxu3  ;;  %5658 = vst [vmem:[#allocation43_spill] sm:$0xff] %v4791_v46 }
 0x1f2   : > { %v4789_v12 = vadd.f32 %v1389_v36, %v1136_v19  ;;  %v3647_v36 = vld [vmem:[%s5596_s3 + $0xd0] sm:$0xff] }
 0x1f3   : > { %v1129_v53 = vpop.f32.mrf.mxu1  ;;  %2605 = vmatpush.bf16.msra.mxu2 %v3647_v36 }
 0x1f4   : > { %v4796_v39 = vadd.f32 %v4708_v28, %v1129_v53 }
 0x1f5   : > { %3542 = vmatmul.msk.bf16.vlgmr.msra.gmra.mxu0 %vm1019_vm5, %v4077_v35 }
 0x1f6   : > { %3304 = vmatmul.msk.bf16.gmra.mxu3 %vm1019_vm5, %v4077_v35  ;;  %3429 = vmatmul.msk.bf16.gmra.mxu1 %vm1019_vm5, %v4305_v24  ;;  %v4814_v35 = vpop.f32.mrf.mxu0 }
 0x1f7   : > { %5661 = vst [vmem:[#allocation46_spill] sm:$0xff] %v4814_v35 }
 0x1f8   : > { %v4810_v53 = vpop.f32.mrf.mxu2 }
 0x1f9   : > { %v1139_v28 = vpop.f32.mrf.mxu3  ;;  %5660 = vst [vmem:[#allocation45_spill] sm:$0xff] %v4810_v53 }
 0x1fb   : > { %v1131_v42 = vpop.f32.mrf.mxu1 }
 0x1fc   : > { %v4812_v23 = vadd.f32 %v1384_v57, %v1131_v42 }
 0x1fd   : > { %3352 = vmatmul.msk.bf16.gmra.mxu2 %vm1019_vm5, %v4395_v4 }
 0x1fe   : > { %v4831_v57 = vpop.f32.mrf.mxu0 }
 0x1ff   : > { %5664 = vst [vmem:[#allocation49_spill] sm:$0xff] %v4831_v57 }
 0x200   : > { %v4818_v55 = vpop.f32.mrf.mxu2 }
 0x201   : > { %v1141_v19 = vpop.f32.mrf.mxu3  ;;  %5662 = vst [vmem:[#allocation47_spill] sm:$0xff] %v4818_v55 }
 0x203   : > { %v4823_v3 = vpop.f32.mrf.mxu1 }
 0x204   : > { %5663 = vst [vmem:[#allocation48_spill] sm:$0xff] %v4823_v3 }
 0x205   : > { %3543 = vmatmul.msk.bf16.gmra.mxu0 %vm1019_vm5, %v4132_v33 }
 0x206   : > { %3305 = vmatmul.msk.bf16.gmra.mxu3 %vm1019_vm5, %v4132_v33  ;;  %3430 = vmatmul.msk.bf16.gmra.mxu1 %vm1019_vm5, %v4349_v30  ;;  %v4839_v54 = vpop.f32.mrf.mxu0 }
 0x207   : > { %5667 = vst [vmem:[#allocation52_spill] sm:$0xff] %v4839_v54 }
 0x208   : > { %v4833_v42 = vpop.f32.mrf.mxu2 }
 0x209   : > { %v1144_v36 = vpop.f32.mrf.mxu3  ;;  %5665 = vst [vmem:[#allocation50_spill] sm:$0xff] %v4833_v42 }
 0x20b   : > { %v4835_v35 = vpop.f32.mrf.mxu1 }
 0x20c   : > { %5666 = vst [vmem:[#allocation51_spill] sm:$0xff] %v4835_v35 }
 0x20d   : > { %3353 = vmatmul.msk.bf16.gmra.mxu2 %vm1019_vm5, %v4443_v60 }
 0x20e   : > { %v4855_v31 = vpop.f32.mrf.mxu0 }
 0x20f   : > { %5672 = vst [vmem:[#allocation57_spill] sm:$0xff] %v4855_v31 }
 0x210   : > { %v4841_v55 = vpop.f32.mrf.mxu2 }
 0x211   : > { %v1146_v15 = vpop.f32.mrf.mxu3  ;;  %5668 = vst [vmem:[#allocation53_spill] sm:$0xff] %v4841_v55 }
 0x213   : > { %v4843_v53 = vpop.f32.mrf.mxu1 }
 0x214   : > { %5669 = vst [vmem:[#allocation54_spill] sm:$0xff] %v4843_v53 }
 0x215   : > { %3544 = vmatmul.msk.bf16.gmra.mxu0 %vm1019_vm5, %v4159_v9 }
 0x216   : > { %3306 = vmatmul.msk.bf16.gmra.mxu3 %vm1019_vm5, %v4159_v9  ;;  %3431 = vmatmul.msk.bf16.gmra.mxu1 %vm1019_vm5, %v4398_v29  ;;  %v4865_v9 = vpop.f32.mrf.mxu0 }
 0x217   : > { %5675 = vst [vmem:[#allocation60_spill] sm:$0xff] %v4865_v9 }
 0x218   : > { %v4851_v57 = vpop.f32.mrf.mxu2 }
 0x219   : > { %v1149_v33 = vpop.f32.mrf.mxu3  ;;  %5670 = vst [vmem:[#allocation55_spill] sm:$0xff] %v4851_v57 }
 0x21b   : > { %v4853_v42 = vpop.f32.mrf.mxu1 }
 0x21c   : > { %5671 = vst [vmem:[#allocation56_spill] sm:$0xff] %v4853_v42 }
 0x21d   : > { %3354 = vmatmul.msk.bf16.gmra.mxu2 %vm1019_vm5, %v4521_v1 }
 0x220   : > { %v4859_v55 = vpop.f32.mrf.mxu2 }
 0x221   : > { %v1151_v54 = vpop.f32.mrf.mxu3  ;;  %5673 = vst [vmem:[#allocation58_spill] sm:$0xff] %v4859_v55  ;;  %v4879_v55 = vpop.f32.mrf.mxu0 }
 0x222   : > { %5678 = vst [vmem:[#allocation63_spill] sm:$0xff] %v4879_v55 }
 0x223   : > { %v4861_v53 = vpop.f32.mrf.mxu1 }
 0x224   : > { %5674 = vst [vmem:[#allocation59_spill] sm:$0xff] %v4861_v53 }
 0x225   : > { %3545 = vmatmul.msk.bf16.gmra.mxu0 %vm1019_vm5, %v4194_v45 }
 0x226   : > { %3307 = vmatmul.msk.bf16.gmra.mxu3 %vm1019_vm5, %v4194_v45  ;;  %3432 = vmatmul.msk.bf16.gmra.mxu1 %vm1019_vm5, %v4446_v44 }
 0x228   : > { %v4873_v42 = vpop.f32.mrf.mxu2 }
 0x229   : > { %v1392_v31 = vpop.f32.mrf.mxu3  ;;  %5676 = vst [vmem:[#allocation61_spill] sm:$0xff] %v4873_v42  ;;  %v3645_v42 = vld [vmem:[%s5596_s3 + $0xc0] sm:$0xff] }
 0x22a   : > { %v4871_v57 = vadd.f32 %v1392_v31, %v1139_v28  ;;  %v3642_v31 = vld [vmem:[%s5596_s3 + $0xa8] sm:$0xff] }
 0x22b   : > { %v4875_v35 = vpop.f32.mrf.mxu1  ;;  %v3646_v28 = vld [vmem:[%s5596_s3 + $0xc8] sm:$0xff]  ;;  %2452 = vmatpush.bf16.msra.mxu3 %v3642_v31 }
 0x22c   : > { %5677 = vst [vmem:[#allocation62_spill] sm:$0xff] %v4875_v35  ;;  %2606 = vmatpush.bf16.msra.mxu2 %v3646_v28 }
 0x22d   : > { %3355 = vmatmul.msk.bf16.gmra.mxu2 %vm1019_vm5, %v4580_v63 }
 0x230   : > { %v4883_v46 = vpop.f32.mrf.mxu2  ;;  %2607 = vmatpush.bf16.msra.mxu2 %v3645_v42 }
 0x231   : > { %v1394_v53 = vpop.f32.mrf.mxu3  ;;  %5679 = vst [vmem:[#allocation64_spill] sm:$0xff] %v4883_v46 }
 0x232   : > { %v4881_v9 = vadd.f32 %v1394_v53, %v1141_v19  ;;  %v4899_v19 = vpop.f32.mrf.mxu0 }
 0x233   : > { %v4885_v45 = vpop.f32.mrf.mxu1  ;;  %5681 = vst [vmem:[#allocation66_spill] sm:$0xff] %v4899_v19 }
 0x234   : > { %5680 = vst [vmem:[#allocation65_spill] sm:$0xff] %v4885_v45  ;;  %v5684_v45 = vld [vmem:[#allocation18_spill] sm:$0xff] }
 0x235   : > { %3546 = vmatmul.msk.bf16.gmra.mxu0 %vm1019_vm5, %v4226_v17 }
 0x236   : > { %3308 = vmatmul.msk.bf16.gmra.mxu3 %vm1019_vm5, %v4226_v17  ;;  %3433 = vmatmul.msk.bf16.gmra.mxu1 %vm1019_vm5, %v4529_v51 }
 0x238   : > { %v4903_v46 = vpop.f32.mrf.mxu2 }
 0x239   : > { %v1397_v53 = vpop.f32.mrf.mxu3  ;;  %5682 = vst [vmem:[#allocation67_spill] sm:$0xff] %v4903_v46 }
 0x23a   : > { %v4901_v55 = vadd.f32 %v1397_v53, %v1144_v36  ;;  %v4918_v36 = vpop.f32.mrf.mxu0  ;;  %v3654_v53 = vld [vmem:[%s5596_s3 + $0x108] sm:$0xff] }
 0x23b   : > { %v4905_v17 = vpop.f32.mrf.mxu1  ;;  %5687 = vst [vmem:[#allocation70_spill] sm:$0xff] %v4918_v36  ;;  %2914 = vmatpush.bf16.msra.mxu1 %v3654_v53 }
 0x23c   : > { %5683 = vst [vmem:[#allocation68_spill] sm:$0xff] %v4905_v17 }
 0x23d   : > { %3356 = vmatmul.msk.bf16.gmra.mxu2 %vm1019_vm5, %v5684_v45 }
 0x240   : > { %v4914_v28 = vpop.f32.mrf.mxu2 }
 0x241   : > { %v1399_v35 = vpop.f32.mrf.mxu3  ;;  %5685 = vst [vmem:[#allocation18_spill] sm:$0xff] %v4914_v28 }
 0x242   : > { %v4912_v31 = vadd.f32 %v1399_v35, %v1146_v15  ;;  %v4935_v28 = vpop.f32.mrf.mxu0 }
 0x243   : > { %v4916_v19 = vpop.f32.mrf.mxu1  ;;  %5690 = vst [vmem:[#allocation73_spill] sm:$0xff] %v4935_v28  ;;  %v5695_v28 = vld [vmem:[#allocation13_spill] sm:$0xff] }
 0x244   : > { %5686 = vst [vmem:[#allocation69_spill] sm:$0xff] %v4916_v19 }
 0x245   : > { %3547 = vmatmul.msk.bf16.gmra.mxu0 %vm1019_vm5, %v4263_v62 }
 0x246   : > { %3309 = vmatmul.msk.bf16.gmra.mxu3 %vm1019_vm5, %v4263_v62  ;;  %3434 = vmatmul.msk.bf16.gmra.mxu1 %vm1019_vm5, %v4582_v37 }
 0x248   : > { %v4931_v15 = vpop.f32.mrf.mxu2 }
 0x249   : > { %v1402_v35 = vpop.f32.mrf.mxu3  ;;  %5688 = vst [vmem:[#allocation71_spill] sm:$0xff] %v4931_v15 }
 0x24a   : > { %v4929_v42 = vadd.f32 %v1402_v35, %v1149_v33  ;;  %v5693_v33 = vld [vmem:[#allocation21_spill] sm:$0xff]  ;;  %v4951_v53 = vpop.f32.mrf.mxu0 }
 0x24b   : > { %v4933_v36 = vpop.f32.mrf.mxu1  ;;  %5694 = vst [vmem:[#allocation21_spill] sm:$0xff] %v4951_v53 }
 0x24c   : > { %5689 = vst [vmem:[#allocation72_spill] sm:$0xff] %v4933_v36 }
 0x24d   : > { %3357 = vmatmul.msk.bf16.gmra.mxu2 %vm1019_vm5, %v4561_v13 }
 0x250   : > { %v4943_v17 = vpop.f32.mrf.mxu2 }
 0x251   : > { %v1404_v46 = vpop.f32.mrf.mxu3  ;;  %5692 = vst [vmem:[#allocation75_spill] sm:$0xff] %v4943_v17  ;;  %v5698_v17 = vld [vmem:[#allocation6_spill] sm:$0xff] }
 0x252   : > { %v4939_v19 = vadd.f32 %v1404_v46, %v1151_v54  ;;  %v4962_v36 = vpop.f32.mrf.mxu0 }
 0x253   : > { %v4941_v62 = vpop.f32.mrf.mxu1  ;;  %5699 = vst [vmem:[#allocation6_spill] sm:$0xff] %v4962_v36 }
 0x254   : > { %5691 = vst [vmem:[#allocation74_spill] sm:$0xff] %v4941_v62 }
 0x255   : > { %3548 = vmatmul.msk.bf16.gmra.mxu0 %vm1019_vm5, %v4305_v24 }
 0x256   : > { %3310 = vmatmul.msk.bf16.gmra.mxu3 %vm1019_vm5, %v4305_v24  ;;  %3435 = vmatmul.msk.bf16.gmra.mxu1 %vm1019_vm5, %v5693_v33  ;;  %v5700_v24 = vld [vmem:[#allocation14_spill] sm:$0xff] }
 0x258   : > { %v4958_v46 = vpop.f32.mrf.mxu2 }
 0x259   : > { %v1645_v35 = vpop.f32.mrf.mxu3  ;;  %5697 = vst [vmem:[#allocation76_spill] sm:$0xff] %v4958_v46  ;;  %v5707_v46 = vld [vmem:[#allocation7_spill] sm:$0xff] }
 0x25a   : > { %v4954_v15 = vadd.f32 %v1645_v35, %v5695_v28  ;;  %v3653_v28 = vld [vmem:[%s5596_s3 + $0x100] sm:$0xff]  ;;  %v5704_v35 = vld [vmem:[#allocation15_spill] sm:$0xff]  ;;  %v4985_v53 = vpop.f32.mrf.mxu0 }
 0x25b   : > { %v4956_v54 = vpop.f32.mrf.mxu1  ;;  %2915 = vmatpush.bf16.msra.mxu1 %v3653_v28  ;;  %5706 = vst [vmem:[#allocation79_spill] sm:$0xff] %v4985_v53 }
 0x25c   : > { %5696 = vst [vmem:[#allocation13_spill] sm:$0xff] %v4956_v54  ;;  %v5708_v54 = vld [vmem:[#allocation16_spill] sm:$0xff] }
 0x25d   : > { %3502 = vmatmul.msk.bf16.vlgmr.msra.gmra.mxu2 %vm1019_vm5, %v5698_v17 }
 0x260   : > { %v4978_v17 = vpop.f32.mrf.mxu2 }
 0x261   : > { %v1647_v62 = vpop.f32.mrf.mxu3  ;;  %5703 = vst [vmem:[#allocation78_spill] sm:$0xff] %v4978_v17 }
 0x262   : > { %v4965_v3 = vadd.f32 %v1647_v62, %v5700_v24 }
 0x263   : > { %v4967_v10 = vpop.f32.mrf.mxu1 }
 0x264   : > { %5701 = vst [vmem:[#allocation14_spill] sm:$0xff] %v4965_v3 }
 0x265   : > { %5702 = vst [vmem:[#allocation77_spill] sm:$0xff] %v4967_v10  ;;  %3549 = vmatmul.msk.bf16.gmra.mxu0 %vm1019_vm5, %v4349_v30 }
 0x266   : > { %3311 = vmatmul.msk.bf16.gmra.mxu3 %vm1019_vm5, %v4349_v30  ;;  %3436 = vmatmul.msk.bf16.gmra.mxu1 %vm1019_vm5, %v4563_v21 }
 0x268   : > { %v4992_v3 = vpop.f32.mrf.mxu2 }
 0x269   : > { %v1650_v62 = vpop.f32.mrf.mxu3  ;;  %5710 = vst [vmem:[#allocation16_spill] sm:$0xff] %v4992_v3 }
 0x26a   : > { %v4981_v24 = vadd.f32 %v1650_v62, %v5704_v35  ;;  %v4998_v62 = vpop.f32.mrf.mxu0 }
 0x26b   : > { %v4983_v36 = vpop.f32.mrf.mxu1  ;;  %5712 = vst [vmem:[#allocation81_spill] sm:$0xff] %v4998_v62  ;;  %v5716_v62 = vld [vmem:[#allocation8_spill] sm:$0xff] }
 0x26c   : > { %5705 = vst [vmem:[#allocation15_spill] sm:$0xff] %v4983_v36 }
 0x26d   : > { %3503 = vmatmul.msk.bf16.gmra.mxu2 %vm1019_vm5, %v5707_v46  ;;  %v5713_v46 = vld [vmem:[#allocation19_spill] sm:$0xff] }
 0x270   : > { %v5012_v3 = vpop.f32.mrf.mxu2 }
 0x271   : > { %v1652_v10 = vpop.f32.mrf.mxu3  ;;  %5715 = vst [vmem:[#allocation82_spill] sm:$0xff] %v5012_v3 }
 0x272   : > { %v4990_v30 = vadd.f32 %v1652_v10, %v5708_v54  ;;  %v3641_v10 = vld [vmem:[%s5596_s3 + $0xa0] sm:$0xff] }
 0x273   : > { %v4994_v28 = vpop.f32.mrf.mxu1  ;;  %2453 = vmatpush.bf16.msra.mxu3 %v3641_v10 }
 0x274   : > { %5709 = vst [vmem:[#allocation7_spill] sm:$0xff] %v4990_v30 }
 0x275   : > { %5711 = vst [vmem:[#allocation80_spill] sm:$0xff] %v4994_v28  ;;  %3550 = vmatmul.msk.bf16.gmra.mxu0 %vm1019_vm5, %v4398_v29  ;;  %v5718_v28 = vld [vmem:[#allocation22_spill] sm:$0xff] }
 0x276   : > { %3312 = vmatmul.msk.bf16.gmra.mxu3 %vm1019_vm5, %v4398_v29  ;;  %3437 = vmatmul.msk.bf16.gmra.mxu1 %vm1019_vm5, %v4727_v25  ;;  %v5016_v29 = vpop.f32.mrf.mxu0 }
 0x277   : > { %5717 = vst [vmem:[#allocation8_spill] sm:$0xff] %v5016_v29 }
 0x278   : > { %v5029_v10 = vpop.f32.mrf.mxu2 }
 0x279   : > { %v1655_v54 = vpop.f32.mrf.mxu3  ;;  %5720 = vst [vmem:[#allocation83_spill] sm:$0xff] %v5029_v10 }
 0x27a   : > { %v5008_v35 = vadd.f32 %v1655_v54, %v5713_v46 }
 0x27b   : > { %v5010_v53 = vpop.f32.mrf.mxu1 }
 0x27c   : > { %5714 = vst [vmem:[#allocation19_spill] sm:$0xff] %v5010_v53 }
 0x27d   : > { %3504 = vmatmul.msk.bf16.gmra.mxu2 %vm1019_vm5, %v5716_v62 }
 0x27e   : > { %v5031_v54 = vpop.f32.mrf.mxu0 }
 0x27f   : > { %5721 = vst [vmem:[#allocation84_spill] sm:$0xff] %v5031_v54 }
 0x280   : > { %v5040_v29 = vpop.f32.mrf.mxu2 }
 0x281   : > { %v1657_v17 = vpop.f32.mrf.mxu3 }
 0x282   : > { %v5019_v36 = vadd.f32 %v1657_v17, %v5718_v28  ;;  %v5723_v28 = vld [vmem:[#allocation9_spill] sm:$0xff] }
 0x283   : > { %v5021_v30 = vpop.f32.mrf.mxu1  ;;  %5724 = vst [vmem:[#allocation9_spill] sm:$0xff] %v5040_v29 }
 0x284   : > { %5719 = vst [vmem:[#allocation22_spill] sm:$0xff] %v5021_v30 }
 0x285   : > { %3551 = vmatmul.msk.bf16.gmra.mxu0 %vm1019_vm5, %v4446_v44 }
 0x286   : > { %3313 = vmatmul.msk.bf16.gmra.mxu3 %vm1019_vm5, %v4446_v44  ;;  %3582 = vmatmul.msk.bf16.vlgmr.msra.gmra.mxu1 %vm1019_vm5, %v4079_v38  ;;  %v5045_v30 = vpop.f32.mrf.mxu0 }
 0x287   : > { %5725 = vst [vmem:[#allocation86_spill] sm:$0xff] %v5045_v30  ;;  %v5729_v30 = vld [vmem:[#allocation10_spill] sm:$0xff] }
 0x289   : > { %v1660_v62 = vpop.f32.mrf.mxu3 }
 0x28a   : > { %v5034_v46 = vadd.f32 %v1660_v62, %v4566_v22 }
 0x28b   : > { %v5036_v17 = vpop.f32.mrf.mxu1 }
 0x28c   : > { %5722 = vst [vmem:[#allocation85_spill] sm:$0xff] %v5036_v17 }
 0x28d   : > { %3505 = vmatmul.msk.bf16.gmra.mxu2 %vm1019_vm5, %v5723_v28  ;;  %v5058_v28 = vpop.f32.mrf.mxu2 }
 0x28e   : > { %5727 = vst [vmem:[#allocation88_spill] sm:$0xff] %v5058_v28 }
 0x291   : > { %v1662_v3 = vpop.f32.mrf.mxu3 }
 0x292   : > { %v5043_v44 = vadd.f32 %v1662_v3, %v4587_v16  ;;  %v5060_v16 = vpop.f32.mrf.mxu0 }
 0x293   : > { %v5047_v10 = vpop.f32.mrf.mxu1 }
 0x294   : > { %5726 = vst [vmem:[#allocation87_spill] sm:$0xff] %v5047_v10 }
 0x295   : > { %3552 = vmatmul.msk.bf16.gmra.mxu0 %vm1019_vm5, %v4529_v51 }
 0x296   : > { %3314 = vmatmul.msk.bf16.gmra.mxu3 %vm1019_vm5, %v4529_v51  ;;  %3583 = vmatmul.msk.bf16.gmra.mxu1 %vm1019_vm5, %v4130_v32  ;;  %v5069_v51 = vpop.f32.mrf.mxu2 }
 0x297   : > { %5730 = vst [vmem:[#allocation10_spill] sm:$0xff] %v5069_v51 }
 0x299   : > { %v1665_v22 = vpop.f32.mrf.mxu3 }
 0x29a   : > { %v5056_v62 = vadd.f32 %v1665_v22, %v4594_v8  ;;  %v5077_v8 = vpop.f32.mrf.mxu0 }
 0x29b   : > { %v5062_v3 = vpop.f32.mrf.mxu1 }
 0x29c   : > { %5728 = vst [vmem:[#allocation89_spill] sm:$0xff] %v5062_v3 }
 0x29d   : > { %3506 = vmatmul.msk.bf16.gmra.mxu2 %vm1019_vm5, %v5729_v30 }
 0x2a1   : > { %v1667_v54 = vpop.f32.mrf.mxu3 }
 0x2a2   : > { %v5067_v29 = vadd.f32 %v1667_v54, %v4612_v56  ;;  %v5084_v56 = vpop.f32.mrf.mxu2  ;;  %v5733_v54 = vld [vmem:[#allocation11_spill] sm:$0xff]  ;;  %v5088_v3 = vpop.f32.mrf.mxu0 }
 0x2a3   : > { %v5079_v22 = vpop.f32.mrf.mxu1  ;;  %5732 = vst [vmem:[#allocation91_spill] sm:$0xff] %v5084_v56 }
 0x2a4   : > { %5731 = vst [vmem:[#allocation90_spill] sm:$0xff] %v5079_v22 }
 0x2a5   : > { %3553 = vmatmul.msk.bf16.gmra.mxu0 %vm1019_vm5, %v4582_v37 }
 0x2a6   : > { %3315 = vmatmul.msk.bf16.gmra.mxu3 %vm1019_vm5, %v4582_v37  ;;  %3584 = vmatmul.msk.bf16.gmra.mxu1 %vm1019_vm5, %v4161_v11 }
 0x2a9   : > { %v1670_v30 = vpop.f32.mrf.mxu3 }
 0x2aa   : > { %v5082_v28 = vadd.f32 %v1670_v30, %v4624_v41  ;;  %v5101_v41 = vpop.f32.mrf.mxu2  ;;  %v5106_v56 = vpop.f32.mrf.mxu0 }
 0x2ab   : > { %v5093_v10 = vpop.f32.mrf.mxu1  ;;  %5735 = vst [vmem:[#allocation92_spill] sm:$0xff] %v5101_v41 }
 0x2ac   : > { %5734 = vst [vmem:[#allocation11_spill] sm:$0xff] %v5093_v10 }
 0x2ad   : > { %3507 = vmatmul.msk.bf16.gmra.mxu2 %vm1019_vm5, %v5733_v54 }
 0x2b1   : > { %v1672_v51 = vpop.f32.mrf.mxu3 }
 0x2b2   : > { %v5091_v37 = vadd.f32 %v1672_v51, %v4641_v20  ;;  %v5737_v51 = vld [vmem:[#allocation12_spill] sm:$0xff]  ;;  %v5119_v41 = vpop.f32.mrf.mxu0 }
 0x2b3   : > { %v5108_v20 = vpop.f32.mrf.mxu1 }
 0x2b4   : > { %5736 = vst [vmem:[#allocation93_spill] sm:$0xff] %v5108_v20 }
 0x2b5   : > { %3554 = vmatmul.msk.bf16.gmra.mxu0 %vm1019_vm5, %v5693_v33 }
 0x2b6   : > { %3316 = vmatmul.msk.bf16.gmra.mxu3 %vm1019_vm5, %v5693_v33  ;;  %3585 = vmatmul.msk.bf16.gmra.mxu1 %vm1019_vm5, %v4196_v47  ;;  %v5115_v33 = vpop.f32.mrf.mxu2 }
 0x2b7   : > { %5738 = vst [vmem:[#allocation12_spill] sm:$0xff] %v5115_v33 }
 0x2b9   : > { %v1675_v30 = vpop.f32.mrf.mxu3 }
 0x2ba   : > { %v5104_v54 = vadd.f32 %v1675_v30, %v4653_v49 }
 0x2bb   : > { %v5125_v49 = vpop.f32.mrf.mxu1 }
 0x2bc   : > { %5739 = vst [vmem:[#allocation94_spill] sm:$0xff] %v5125_v49  ;;  %v5742_v49 = vld [vmem:[#allocation5_spill] sm:$0xff] }
 0x2bd   : > { %3508 = vmatmul.msk.bf16.gmra.mxu2 %vm1019_vm5, %v5737_v51 }
 0x2c1   : > { %v1677_v10 = vpop.f32.mrf.mxu3 }
 0x2c2   : > { %v5113_v22 = vadd.f32 %v1677_v10, %v4668_v61  ;;  %v5130_v61 = vpop.f32.mrf.mxu2  ;;  %v5134_v10 = vpop.f32.mrf.mxu0 }
 0x2c3   : > { %5740 = vst [vmem:[#allocation95_spill] sm:$0xff] %v5130_v61  ;;  %v5136_v33 = vpop.f32.mrf.mxu1 }
 0x2c4   : > { %5741 = vst [vmem:[#allocation96_spill] sm:$0xff] %v5136_v33 }
 0x2c5   : > { %3555 = vmatmul.msk.bf16.gmra.mxu0 %vm1019_vm5, %v4563_v21 }
 0x2c6   : > { %3317 = vmatmul.msk.bf16.gmra.mxu3 %vm1019_vm5, %v4563_v21  ;;  %3586 = vmatmul.msk.bf16.gmra.mxu1 %vm1019_vm5, %v4228_v18 }
 0x2c9   : > { %v1680_v30 = vpop.f32.mrf.mxu3 }
 0x2ca   : > { %v5128_v51 = vadd.f32 %v1680_v30, %v4676_v14  ;;  %v5147_v14 = vpop.f32.mrf.mxu2  ;;  %v5152_v61 = vpop.f32.mrf.mxu0 }
 0x2cb   : > { %5743 = vst [vmem:[#allocation5_spill] sm:$0xff] %v5147_v14  ;;  %v5154_v33 = vpop.f32.mrf.mxu1 }
 0x2cc   : > { %5744 = vst [vmem:[#allocation97_spill] sm:$0xff] %v5154_v33 }
 0x2cd   : > { %3509 = vmatmul.msk.bf16.gmra.mxu2 %vm1019_vm5, %v4417_v6 }
 0x2d1   : > { %v1682_v20 = vpop.f32.mrf.mxu3 }
 0x2d2   : > { %v5139_v17 = vadd.f32 %v1682_v20, %v4696_v40  ;;  %v5745_v40 = vld [vmem:[#allocation17_spill] sm:$0xff]  ;;  %v5163_v53 = vpop.f32.mrf.mxu0 }
 0x2d3   : > { %v5165_v14 = vpop.f32.mrf.mxu1 }
 0x2d4   : > { %5747 = vst [vmem:[#allocation98_spill] sm:$0xff] %v5165_v14 }
 0x2d5   : > { %3556 = vmatmul.msk.bf16.gmra.mxu0 %vm1019_vm5, %v4727_v25  ;;  %v5158_v25 = vpop.f32.mrf.mxu2 }
 0x2d6   : > { %3462 = vmatmul.msk.bf16.vlgmr.msra.gmra.mxu3 %vm1019_vm5, %v5742_v49  ;;  %3587 = vmatmul.msk.bf16.gmra.mxu1 %vm1019_vm5, %v4265_v0  ;;  %5746 = vst [vmem:[#allocation17_spill] sm:$0xff] %v5158_v25 }
 0x2d9   : > { %v1685_v6 = vpop.f32.mrf.mxu3 }
 0x2da   : > { %v5150_v30 = vadd.f32 %v1685_v6, %v4714_v48 }
 0x2dd   : > { %3510 = vmatmul.msk.bf16.gmra.mxu2 %vm1019_vm5, %v5745_v40  ;;  %v5176_v40 = vpop.f32.mrf.mxu2 }
 0x2de   : > { %5748 = vst [vmem:[#allocation99_spill] sm:$0xff] %v5176_v40 }
 0x2e1   : > { %v1687_v20 = vpop.f32.mrf.mxu3 }
 0x2e2   : > { %v5161_v49 = vadd.f32 %v1687_v20, %v4737_v5  ;;  %v5178_v5 = vpop.f32.mrf.mxu1  ;;  %v5750_v20 = vld [vmem:[#allocation23_spill] sm:$0xff] }
 0x2e3   : > { %5749 = vst [vmem:[#allocation100_spill] sm:$0xff] %v5178_v5 }
 0x2e5   : > { %3557 = vmatmul.msk.bf16.gmra.mxu0 %vm1019_vm5, %v4563_v21  ;;  %v5185_v14 = vpop.f32.mrf.mxu2 }
 0x2e6   : > { %3463 = vmatmul.msk.bf16.gmra.mxu3 %vm1019_vm5, %v4079_v38  ;;  %3588 = vmatmul.msk.bf16.gmra.mxu1 %vm1019_vm5, %v4311_v7  ;;  %5751 = vst [vmem:[#allocation23_spill] sm:$0xff] %v5185_v14 }
 0x2e9   : > { %v1690_v48 = vpop.f32.mrf.mxu3 }
 0x2ea   : > { %v5174_v6 = vadd.f32 %v1690_v48, %v4748_v43  ;;  %v5191_v38 = vpop.f32.mrf.mxu1 }
 0x2eb   : > { %5752 = vst [vmem:[#allocation101_spill] sm:$0xff] %v5191_v38 }
 0x2ed   : > { %3511 = vmatmul.msk.bf16.gmra.mxu2 %vm1019_vm5, %v5750_v20  ;;  %v5196_v40 = vpop.f32.mrf.mxu2  ;;  %v5754_v20 = vld [vmem:[#allocation20_spill] sm:$0xff] }
 0x2ee   : > { %5753 = vst [vmem:[#allocation102_spill] sm:$0xff] %v5196_v40 }
 0x2f1   : > { %v1692_v25 = vpop.f32.mrf.mxu3 }
 0x2f2   : > { %v5183_v21 = vadd.f32 %v1692_v25, %v4759_v58  ;;  %v5203_v14 = vpop.f32.mrf.mxu1 }
 0x2f3   : > { %5755 = vst [vmem:[#allocation20_spill] sm:$0xff] %v5203_v14 }
 0x2f6   : > { %3464 = vmatmul.msk.bf16.gmra.mxu3 %vm1019_vm5, %v4130_v32  ;;  %3589 = vmatmul.msk.bf16.gmra.mxu1 %vm1019_vm5, %v4351_v59  ;;  %v2609_v32 = vpop.f32.mrf.mxu2 }
 0x2f9   : > { %v1695_v43 = vpop.f32.mrf.mxu3 }
 0x2fa   : > { %v5194_v48 = vadd.f32 %v1695_v43, %v4770_v52  ;;  %v5212_v40 = vpop.f32.mrf.mxu1 }
 0x2fb   : > { %5757 = vst [vmem:[#allocation104_spill] sm:$0xff] %v5212_v40 }
 0x2fd   : > { %3512 = vmatmul.msk.bf16.gmra.mxu2 %vm1019_vm5, %v5754_v20  ;;  %v5758_v20 = vld [vmem:[#allocation25_spill] sm:$0xff] }
 0x2fe   : > { %v5219_v14 = vpop.f32.mrf.mxu2 }
 0x301   : > { %v1697_v58 = vpop.f32.mrf.mxu3 }
 0x302   : > { %v5201_v25 = vadd.f32 %v1697_v58, %v4785_v26 }
 0x306   : > { %3465 = vmatmul.msk.bf16.gmra.mxu3 %vm1019_vm5, %v4161_v11  ;;  %3590 = vmatmul.msk.bf16.gmra.mxu1 %vm1019_vm5, %v4395_v4  ;;  %v5225_v11 = vpop.f32.mrf.mxu1  ;;  %v5230_v40 = vpop.f32.mrf.mxu2 }
 0x307   : > { %5760 = vst [vmem:[#allocation105_spill] sm:$0xff] %v5225_v11 }
 0x309   : > { %v1700_v52 = vpop.f32.mrf.mxu3 }
 0x30a   : > { %v5210_v43 = vadd.f32 %v1700_v52, %v4796_v39 }
 0x30c   : > { %5756 = vst [vmem:[#allocation103_spill] sm:$0xff] %v5210_v43  ;;  %v5776_v43 = vld [vmem:[#allocation51_spill] sm:$0xff] }
 0x30d   : > { %3513 = vmatmul.msk.bf16.gmra.mxu2 %vm1019_vm5, %v5758_v20  ;;  %v5762_v20 = vld [vmem:[#allocation28_spill] sm:$0xff] }
 0x311   : > { %v1702_v26 = vpop.f32.mrf.mxu3 }
 0x312   : > { %v5217_v58 = vadd.f32 %v1702_v26, %v4812_v23  ;;  %v2917_v23 = vpop.f32.mrf.mxu1 }
 0x314   : > { %5759 = vst [vmem:[#allocation25_spill] sm:$0xff] %v5217_v58 }
 0x316   : > { %3466 = vmatmul.msk.bf16.gmra.mxu3 %vm1019_vm5, %v4196_v47  ;;  %3591 = vmatmul.msk.bf16.gmra.mxu1 %vm1019_vm5, %v4443_v60  ;;  %v5241_v47 = vpop.f32.mrf.mxu2 }
 0x319   : > { %v1705_v39 = vpop.f32.mrf.mxu3 }
 0x31a   : > { %v5228_v52 = vadd.f32 %v1705_v39, %v4780_v50  ;;  %v2919_v11 = vpop.f32.mrf.mxu1 }
 0x31c   : > { %5761 = vst [vmem:[#allocation106_spill] sm:$0xff] %v5228_v52 }
 0x31d   : > { %3514 = vmatmul.msk.bf16.gmra.mxu2 %vm1019_vm5, %v5762_v20 }
 0x31e   : > { %v5248_v20 = vpop.f32.mrf.mxu2 }
 0x321   : > { %v1707_v26 = vpop.f32.mrf.mxu3 }
 0x322   : > { %v5235_v38 = vadd.f32 %v1707_v26, %v4789_v12 }
 0x324   : > { %5763 = vst [vmem:[#allocation28_spill] sm:$0xff] %v5235_v38 }
 0x326   : > { %3467 = vmatmul.msk.bf16.gmra.mxu3 %vm1019_vm5, %v4228_v18  ;;  %3592 = vmatmul.msk.bf16.gmra.mxu1 %vm1019_vm5, %v4521_v1  ;;  %v2922_v18 = vpop.f32.mrf.mxu1 }
 0x329   : > { %v1710_v50 = vpop.f32.mrf.mxu3 }
 0x32a   : > { %v5244_v39 = vadd.f32 %v1710_v50, %v4871_v57  ;;  %v5260_v50 = vpop.f32.mrf.mxu2 }
 0x32c   : > { %5764 = vst [vmem:[#allocation107_spill] sm:$0xff] %v5244_v39 }
 0x32d   : > { %3515 = vmatmul.msk.bf16.gmra.mxu2 %vm1019_vm5, %v4628_v2 }
 0x32e   : > { %v5262_v33 = vpop.f32.mrf.mxu1 }
 0x331   : > { %v1712_v12 = vpop.f32.mrf.mxu3 }
 0x332   : > { %v5251_v26 = vadd.f32 %v1712_v12, %v4881_v9 }
 0x334   : > { %5765 = vst [vmem:[#allocation108_spill] sm:$0xff] %v5251_v26  ;;  %v5269_v26 = vpop.f32.mrf.mxu2 }
 0x336   : > { %3468 = vmatmul.msk.bf16.gmra.mxu3 %vm1019_vm5, %v4265_v0  ;;  %3593 = vmatmul.msk.bf16.gmra.mxu1 %vm1019_vm5, %v4580_v63  ;;  %v5275_v0 = vpop.f32.mrf.mxu1 }
 0x339   : > { %v1715_v5 = vpop.f32.mrf.mxu3 }
 0x33a   : > { %v5258_v57 = vadd.f32 %v1715_v5, %v4901_v55 }
 0x33c   : > { %5766 = vst [vmem:[#allocation109_spill] sm:$0xff] %v5258_v57  ;;  %v5770_v57 = vld [vmem:[#allocation24_spill] sm:$0xff] }
 0x33d   : > { %3516 = vmatmul.msk.bf16.gmra.mxu2 %vm1019_vm5, %v4765_v34  ;;  %v5280_v34 = vpop.f32.mrf.mxu2 }
 0x341   : > { %v1717_v9 = vpop.f32.mrf.mxu3 }
 0x342   : > { %v5267_v12 = vadd.f32 %v1717_v9, %v4912_v31  ;;  %v2045_v31 = vadd.f32 %v4767_v27, %v4954_v15 }
 0x344   : > { %5767 = vst [vmem:[#allocation110_spill] sm:$0xff] %v5267_v12  ;;  %v5289_v12 = vpop.f32.mrf.mxu1  ;;  %v2203_v39 = vadd.f32 %v5770_v57, %v2045_v31  ;;  %v5775_v31 = vld [vmem:[#allocation43_spill] sm:$0xff] }
 0x345   : > { %v2047_v52 = vadd.f32 %v5775_v31, %v4981_v24  ;;  %v5778_v24 = vld [vmem:[#allocation37_spill] sm:$0xff]  ;;  %v5332_v31 = vpop.f32.mrf.mxu0 }
 0x346   : > { %3469 = vmatmul.msk.bf16.gmra.mxu3 %vm1019_vm5, %v4311_v7  ;;  %3594 = vmatmul.msk.bf16.gmra.mxu1 %vm1019_vm5, %v5684_v45 }
 0x349   : > { %v1720_v55 = vpop.f32.mrf.mxu3 }
 0x34a   : > { %v5278_v5 = vadd.f32 %v1720_v55, %v4929_v42  ;;  %v5771_v42 = vld [vmem:[#allocation14_spill] sm:$0xff] }
 0x34b   : > { %v5772_v55 = vld [vmem:[#allocation42_spill] sm:$0xff] }
 0x34c   : > { %5768 = vst [vmem:[#allocation111_spill] sm:$0xff] %v5278_v5  ;;  %v5773_v5 = vld [vmem:[#allocation48_spill] sm:$0xff]  ;;  %v5303_v57 = vpop.f32.mrf.mxu1 }
 0x34d   : > { %3517 = vmatmul.msk.bf16.gmra.mxu2 %vm1019_vm5, %v4628_v2  ;;  %v2046_v2 = vadd.f32 %v5772_v55, %v5771_v42  ;;  %v2370_v38 = vadd.f32 %v5773_v5, %v2203_v39  ;;  %v5777_v39 = vld [vmem:[#allocation27_spill] sm:$0xff] }
 0x34e   : > { %v2205_v5 = vadd.f32 %v5777_v39, %v2047_v52 }
 0x351   : > { %v1722_v7 = vpop.f32.mrf.mxu3 }
 0x352   : > { %v5287_v9 = vadd.f32 %v1722_v7, %v4939_v19  ;;  %v5774_v7 = vld [vmem:[#allocation26_spill] sm:$0xff] }
 0x354   : > { %5769 = vst [vmem:[#allocation112_spill] sm:$0xff] %v5287_v9  ;;  %v2204_v9 = vadd.f32 %v5774_v7, %v2046_v2  ;;  %v5329_v7 = vpop.f32.mrf.mxu2 }
 0x356   : > { %3470 = vmatmul.msk.bf16.gmra.mxu3 %vm1019_vm5, %v4351_v59  ;;  %3595 = vmatmul.msk.bf16.gmra.mxu1 %vm1019_vm5, %v4561_v13  ;;  %v2371_v42 = vadd.f32 %v5776_v43, %v2204_v9  ;;  %v5320_v43 = vpop.f32.mrf.mxu1  ;;  %v5780_v9 = vld [vmem:[#allocation45_spill] sm:$0xff] }
 0x359   : > { %v2455_v27 = vpop.f32.mrf.mxu3 }
 0x35a   : > { %v2535_v15 = vadd.f32 %v2455_v27, %v2370_v38  ;;  %v5781_v27 = vld [vmem:[#allocation54_spill] sm:$0xff] }
 0x35c   : > { %v2689_v19 = vadd.f32 %v2609_v32, %v2535_v15  ;;  %v2372_v15 = vadd.f32 %v5781_v27, %v2205_v5  ;;  %v5787_v27 = vld [vmem:[#allocation59_spill] sm:$0xff] }
 0x35e   : > { %v2843_v59 = vadd.f32 %v5060_v16, %v2689_v19  ;;  %v5782_v19 = vld [vmem:[#allocation29_spill] sm:$0xff]  ;;  %v5337_v39 = vpop.f32.mrf.mxu1 }
 0x360   : > { %v2997_v58 = vadd.f32 %v2917_v23, %v2843_v59  ;;  %v5779_v23 = vld [vmem:[#allocation7_spill] sm:$0xff] }
 0x361   : > { %v2457_v55 = vpop.f32.mrf.mxu3  ;;  %v2048_v2 = vadd.f32 %v5780_v9, %v5779_v23  ;;  %v5785_v23 = vld [vmem:[#allocation30_spill] sm:$0xff] }
 0x362   : > { %3029 = vst.msk [vmem:[%s5309_s13] sm:$0xff] %vm1019_vm5, %v2997_v58  ;;  %v2536_v38 = vadd.f32 %v2457_v55, %v2371_v42  ;;  %v5783_v42 = vld [vmem:[#allocation47_spill] sm:$0xff] }
 0x363   : > { %v2049_v55 = vadd.f32 %v5783_v42, %v5008_v35  ;;  %v5348_v35 = vpop.f32.mrf.mxu2  ;;  %v5790_v42 = vld [vmem:[#allocation62_spill] sm:$0xff] }
 0x364   : > { %v2690_v32 = vadd.f32 %v5219_v14, %v2536_v38  ;;  %v5784_v38 = vld [vmem:[#allocation56_spill] sm:$0xff] }
 0x365   : > { %v2207_v9 = vadd.f32 %v5785_v23, %v2049_v55 }
 0x366   : > { %v2844_v16 = vadd.f32 %v5077_v8, %v2690_v32  ;;  %3471 = vmatmul.msk.bf16.gmra.mxu3 %vm1019_vm5, %v4395_v4  ;;  %3596 = vmatmul.msk.bf16.gmra.mxu1 %vm1019_vm5, %v5778_v24  ;;  %v2206_v4 = vadd.f32 %v5782_v19, %v2048_v2 }
 0x368   : > { %v2998_v58 = vadd.f32 %v2919_v11, %v2844_v16  ;;  %v2373_v32 = vadd.f32 %v5784_v38, %v2206_v4 }
 0x369   : > { %v2460_v14 = vpop.f32.mrf.mxu3 }
 0x36a   : > { %3030 = vst.msk [vmem:[%s5309_s13 + $0x8] sm:$0xff] %vm1019_vm5, %v2998_v58  ;;  %v2537_v52 = vadd.f32 %v2460_v14, %v2372_v15  ;;  %v5354_v15 = vpop.f32.mrf.mxu0 }
 0x36c   : > { %v2691_v8 = vadd.f32 %v5230_v40, %v2537_v52 }
 0x36e   : > { %v2845_v59 = vadd.f32 %v5088_v3, %v2691_v8  ;;  %v5788_v8 = vld [vmem:[#allocation31_spill] sm:$0xff] }
 0x370   : > { %v2999_v11 = vadd.f32 %v2922_v18, %v2845_v59  ;;  %v5786_v18 = vld [vmem:[#allocation50_spill] sm:$0xff] }
 0x371   : > { %v2462_v5 = vpop.f32.mrf.mxu3  ;;  %v2050_v2 = vadd.f32 %v5786_v18, %v5019_v36  ;;  %v5789_v36 = vld [vmem:[#allocation53_spill] sm:$0xff] }
 0x372   : > { %3031 = vst.msk [vmem:[%s5309_s13 + $0x10] sm:$0xff] %vm1019_vm5, %v2999_v11  ;;  %v2538_v40 = vadd.f32 %v2462_v5, %v2373_v32  ;;  %v2051_v59 = vadd.f32 %v5789_v36, %v5034_v46  ;;  %v5367_v11 = vpop.f32.mrf.mxu2  ;;  %v5371_v5 = vpop.f32.mrf.mxu0 }
 0x373   : > { %v2208_v19 = vadd.f32 %v5788_v8, %v2050_v2  ;;  %v5796_v8 = vld [vmem:[#allocation68_spill] sm:$0xff] }
 0x374   : > { %v2692_v16 = vadd.f32 %v5241_v47, %v2538_v40  ;;  %v2374_v47 = vadd.f32 %v5787_v27, %v2207_v9  ;;  %v5791_v40 = vld [vmem:[#allocation32_spill] sm:$0xff] }
 0x375   : > { %v2375_v55 = vadd.f32 %v5790_v42, %v2208_v19 }
 0x376   : > { %v2846_v3 = vadd.f32 %v5106_v56, %v2692_v16  ;;  %3472 = vmatmul.msk.bf16.gmra.mxu3 %vm1019_vm5, %v4443_v60  ;;  %3597 = vmatmul.msk.bf16.gmra.mxu1 %vm1019_vm5, %v4561_v13  ;;  %v5358_v60 = vpop.f32.mrf.mxu1 }
 0x378   : > { %v3000_v58 = vadd.f32 %v5262_v33, %v2846_v3  ;;  %v5793_v3 = vld [vmem:[#allocation65_spill] sm:$0xff] }
 0x379   : > { %v2465_v14 = vpop.f32.mrf.mxu3 }
 0x37a   : > { %3032 = vst.msk [vmem:[%s5309_s13 + $0x18] sm:$0xff] %vm1019_vm5, %v3000_v58  ;;  %v2539_v56 = vadd.f32 %v2465_v14, %v2374_v47  ;;  %v2636_v58 = vpop.f32.mrf.mxu2  ;;  %v5794_v47 = vld [vmem:[#allocation33_spill] sm:$0xff]  ;;  %v2790_v14 = vpop.f32.mrf.mxu0 }
 0x37c   : > { %v2693_v52 = vadd.f32 %v5248_v20, %v2539_v56 }
 0x37e   : > { %v2847_v4 = vadd.f32 %v5119_v41, %v2693_v52  ;;  %v2209_v41 = vadd.f32 %v5791_v40, %v2051_v59  ;;  %v5375_v16 = vpop.f32.mrf.mxu1  ;;  %v5797_v59 = vld [vmem:[#allocation34_spill] sm:$0xff] }
 0x380   : > { %v3001_v33 = vadd.f32 %v5275_v0, %v2847_v4  ;;  %v5792_v0 = vld [vmem:[#allocation55_spill] sm:$0xff]  ;;  %v2376_v18 = vadd.f32 %v5793_v3, %v2209_v41 }
 0x381   : > { %v2467_v38 = vpop.f32.mrf.mxu3  ;;  %v2052_v23 = vadd.f32 %v5792_v0, %v5043_v44  ;;  %v5795_v44 = vld [vmem:[#allocation58_spill] sm:$0xff] }
 0x382   : > { %3033 = vst.msk [vmem:[%s5309_s13 + $0x20] sm:$0xff] %vm1019_vm5, %v3001_v33  ;;  %v2540_v32 = vadd.f32 %v2467_v38, %v2375_v55  ;;  %v2053_v52 = vadd.f32 %v5795_v44, %v5056_v62  ;;  %v2639_v42 = vpop.f32.mrf.mxu2  ;;  %v2793_v62 = vpop.f32.mrf.mxu0 }
 0x384   : > { %v2694_v20 = vadd.f32 %v5260_v50, %v2540_v32  ;;  %v2211_v33 = vadd.f32 %v5797_v59, %v2053_v52  ;;  %v5799_v32 = vld [vmem:[#allocation69_spill] sm:$0xff]  ;;  %v5805_v52 = vld [vmem:[#allocation74_spill] sm:$0xff] }
 0x386   : > { %v2848_v46 = vadd.f32 %v5134_v10, %v2694_v20  ;;  %3473 = vmatmul.msk.bf16.gmra.mxu3 %vm1019_vm5, %v4521_v1  ;;  %v2210_v10 = vadd.f32 %v5794_v47, %v2052_v23  ;;  %v2944_v56 = vpop.f32.mrf.mxu1  ;;  %v2378_v20 = vadd.f32 %v5799_v32, %v2211_v33 }
 0x388   : > { %v3002_v9 = vadd.f32 %v5289_v12, %v2848_v46  ;;  %v2377_v19 = vadd.f32 %v5796_v8, %v2210_v10  ;;  %v5803_v10 = vld [vmem:[#allocation36_spill] sm:$0xff] }
 0x389   : > { %v2470_v2 = vpop.f32.mrf.mxu3 }
 0x38a   : > { %3034 = vst.msk [vmem:[%s5309_s13 + $0x28] sm:$0xff] %vm1019_vm5, %v3002_v9  ;;  %v2541_v50 = vadd.f32 %v2470_v2, %v2376_v18  ;;  %v2641_v23 = vpop.f32.mrf.mxu2  ;;  %v5801_v9 = vld [vmem:[#allocation64_spill] sm:$0xff]  ;;  %v2795_v2 = vpop.f32.mrf.mxu0 }
 0x38c   : > { %v2695_v27 = vadd.f32 %v5269_v26, %v2541_v50 }
 0x38e   : > { %v2849_v1 = vadd.f32 %v5152_v61, %v2695_v27  ;;  %v2947_v40 = vpop.f32.mrf.mxu1 }
 0x390   : > { %v3003_v12 = vadd.f32 %v5303_v57, %v2849_v1  ;;  %v5798_v57 = vld [vmem:[#allocation61_spill] sm:$0xff] }
 0x391   : > { %v2472_v4 = vpop.f32.mrf.mxu3  ;;  %v2054_v55 = vadd.f32 %v5798_v57, %v5067_v29  ;;  %v2055_v29 = vadd.f32 %v5801_v9, %v5082_v28  ;;  %v5804_v28 = vld [vmem:[#allocation67_spill] sm:$0xff] }
 0x392   : > { %3035 = vst.msk [vmem:[%s5309_s13 + $0x30] sm:$0xff] %vm1019_vm5, %v3003_v12  ;;  %v2542_v36 = vadd.f32 %v2472_v4, %v2377_v19  ;;  %v2644_v8 = vpop.f32.mrf.mxu2  ;;  %v2798_v4 = vpop.f32.mrf.mxu0 }
 0x393   : > { %v2213_v1 = vadd.f32 %v5803_v10, %v2055_v29  ;;  %v5814_v10 = vld [vmem:[#allocation15_spill] sm:$0xff] }
 0x394   : > { %v2696_v26 = vadd.f32 %v5280_v34, %v2542_v36 }
 0x395   : > { %v2380_v12 = vadd.f32 %v5805_v52, %v2213_v1  ;;  %v5816_v52 = vld [vmem:[#allocation76_spill] sm:$0xff] }
 0x396   : > { %v2850_v61 = vadd.f32 %v5163_v53, %v2696_v26  ;;  %3474 = vmatmul.msk.bf16.gmra.mxu3 %vm1019_vm5, %v4580_v63  ;;  %v5800_v53 = vld [vmem:[#allocation35_spill] sm:$0xff]  ;;  %v2949_v47 = vpop.f32.mrf.mxu1 }
 0x397   : > { %v2212_v0 = vadd.f32 %v5800_v53, %v2054_v55 }
 0x398   : > { %v3004_v38 = vadd.f32 %v5320_v43, %v2850_v61  ;;  %v5802_v43 = vld [vmem:[#allocation72_spill] sm:$0xff]  ;;  %v5808_v61 = vld [vmem:[#allocation13_spill] sm:$0xff] }
 0x399   : > { %v2475_v41 = vpop.f32.mrf.mxu3  ;;  %v2379_v18 = vadd.f32 %v5802_v43, %v2212_v0  ;;  %v5811_v0 = vld [vmem:[#allocation77_spill] sm:$0xff] }
 0x39a   : > { %3036 = vst.msk [vmem:[%s5309_s13 + $0x38] sm:$0xff] %vm1019_vm5, %v3004_v38  ;;  %v2543_v34 = vadd.f32 %v2475_v41, %v2378_v20  ;;  %v2646_v32 = vpop.f32.mrf.mxu2 }
 0x39c   : > { %v2697_v46 = vadd.f32 %v5329_v7, %v2543_v34  ;;  %v2800_v34 = vpop.f32.mrf.mxu0 }
 0x39e   : > { %v2851_v63 = vadd.f32 %v5332_v31, %v2697_v46  ;;  %v2952_v59 = vpop.f32.mrf.mxu1 }
 0x3a0   : > { %v3005_v3 = vadd.f32 %v5337_v39, %v2851_v63  ;;  %v2056_v39 = vadd.f32 %v5804_v28, %v5091_v37  ;;  %v5807_v37 = vld [vmem:[#allocation18_spill] sm:$0xff] }
 0x3a1   : > { %v2477_v50 = vpop.f32.mrf.mxu3  ;;  %v2057_v33 = vadd.f32 %v5807_v37, %v5104_v54  ;;  %v5810_v54 = vld [vmem:[#allocation71_spill] sm:$0xff] }
 0x3a2   : > { %3037 = vst.msk [vmem:[%s5309_s13 + $0x40] sm:$0xff] %vm1019_vm5, %v3005_v3  ;;  %v2544_v27 = vadd.f32 %v2477_v50, %v2379_v18  ;;  %v5812_v3 = vld [vmem:[#allocation40_spill] sm:$0xff]  ;;  %v2649_v18 = vpop.f32.mrf.mxu2 }
 0x3a4   : > { %v2698_v7 = vadd.f32 %v5348_v35, %v2544_v27  ;;  %v2803_v50 = vpop.f32.mrf.mxu0 }
 0x3a6   : > { %v2852_v31 = vadd.f32 %v5354_v15, %v2698_v7  ;;  %3475 = vmatmul.msk.bf16.gmra.mxu3 %vm1019_vm5, %v5684_v45  ;;  %v5806_v15 = vld [vmem:[#allocation38_spill] sm:$0xff] }
 0x3a7   : > { %v2214_v26 = vadd.f32 %v5806_v15, %v2056_v39  ;;  %v5815_v39 = vld [vmem:[#allocation41_spill] sm:$0xff] }
 0x3a8   : > { %v3006_v44 = vadd.f32 %v5358_v60, %v2852_v31 }
 0x3a9   : > { %v2480_v19 = vpop.f32.mrf.mxu3  ;;  %v2381_v57 = vadd.f32 %v5808_v61, %v2214_v26 }
 0x3aa   : > { %3038 = vst.msk [vmem:[%s5309_s13 + $0x48] sm:$0xff] %vm1019_vm5, %v3006_v44  ;;  %v2545_v35 = vadd.f32 %v2480_v19, %v2380_v12  ;;  %v5817_v12 = vld [vmem:[#allocation80_spill] sm:$0xff] }
 0x3ac   : > { %v2699_v36 = vadd.f32 %v5367_v11, %v2545_v35  ;;  %v5809_v11 = vld [vmem:[#allocation39_spill] sm:$0xff]  ;;  %v2805_v35 = vpop.f32.mrf.mxu0 }
 0x3ad   : > { %v2215_v41 = vadd.f32 %v5809_v11, %v2057_v33  ;;  %v5821_v11 = vld [vmem:[#allocation46_spill] sm:$0xff] }
 0x3ae   : > { %v2853_v45 = vadd.f32 %v5371_v5, %v2699_v36  ;;  %v2954_v5 = vpop.f32.mrf.mxu1 }
 0x3af   : > { %v2382_v63 = vadd.f32 %v5811_v0, %v2215_v41 }
 0x3b0   : > { %v3007_v60 = vadd.f32 %v5375_v16, %v2853_v45  ;;  %v2058_v16 = vadd.f32 %v5810_v54, %v5113_v22  ;;  %v5818_v45 = vld [vmem:[#allocation44_spill] sm:$0xff] }
 0x3b1   : > { %v2482_v55 = vpop.f32.mrf.mxu3 }
 0x3b2   : > { %3039 = vst.msk [vmem:[%s5309_s13 + $0x50] sm:$0xff] %vm1019_vm5, %v3007_v60  ;;  %v2546_v38 = vadd.f32 %v2482_v55, %v2381_v57  ;;  %v2216_v43 = vadd.f32 %v5812_v3, %v2058_v16  ;;  %v5823_v16 = vld [vmem:[#allocation22_spill] sm:$0xff] }
 0x3b4   : > { %v2700_v20 = vadd.f32 %v2636_v58, %v2546_v38  ;;  %v2383_v22 = vadd.f32 %v5814_v10, %v2216_v43  ;;  %v2808_v38 = vpop.f32.mrf.mxu0 }
 0x3b6   : > { %v2854_v46 = vadd.f32 %v2790_v14, %v2700_v20  ;;  %3476 = vmatmul.msk.bf16.gmra.mxu3 %vm1019_vm5, %v4561_v13  ;;  %v5813_v13 = vld [vmem:[#allocation75_spill] sm:$0xff] }
 0x3b7   : > { %v2059_v27 = vadd.f32 %v5813_v13, %v5128_v51  ;;  %v2060_v51 = vadd.f32 %v5816_v52, %v5139_v17  ;;  %v5820_v17 = vld [vmem:[#allocation19_spill] sm:$0xff]  ;;  %v5826_v13 = vld [vmem:[#allocation85_spill] sm:$0xff] }
 0x3b8   : > { %v3008_v53 = vadd.f32 %v2944_v56, %v2854_v46  ;;  %v2957_v56 = vpop.f32.mrf.mxu1 }
 0x3b9   : > { %v2485_v9 = vpop.f32.mrf.mxu3 }
 0x3ba   : > { %3040 = vst.msk [vmem:[%s5309_s13 + $0x58] sm:$0xff] %vm1019_vm5, %v3008_v53  ;;  %v2547_v29 = vadd.f32 %v2485_v9, %v2382_v63 }
 0x3bc   : > { %v2701_v58 = vadd.f32 %v2639_v42, %v2547_v29  ;;  %v2217_v42 = vadd.f32 %v5815_v39, %v2059_v27  ;;  %v5824_v29 = vld [vmem:[#allocation49_spill] sm:$0xff] }
 0x3be   : > { %v2855_v14 = vadd.f32 %v2793_v62, %v2701_v58  ;;  %v2651_v62 = vpop.f32.mrf.mxu2  ;;  %v2384_v19 = vadd.f32 %v5817_v12, %v2217_v42  ;;  %v5830_v12 = vld [vmem:[#allocation57_spill] sm:$0xff] }
 0x3c0   : > { %v3009_v7 = vadd.f32 %v2947_v40, %v2855_v14 }
 0x3c1   : > { %v2487_v1 = vpop.f32.mrf.mxu3 }
 0x3c2   : > { %3041 = vst.msk [vmem:[%s5309_s13 + $0x60] sm:$0xff] %vm1019_vm5, %v3009_v7  ;;  %v2548_v31 = vadd.f32 %v2487_v1, %v2383_v22  ;;  %v5827_v22 = vld [vmem:[#allocation52_spill] sm:$0xff] }
 0x3c4   : > { %v2702_v28 = vadd.f32 %v2641_v23, %v2548_v31  ;;  %v2959_v23 = vpop.f32.mrf.mxu1 }
 0x3c6   : > { %v2856_v44 = vadd.f32 %v2795_v2, %v2702_v28  ;;  %3477 = vmatmul.msk.bf16.gmra.mxu3 %vm1019_vm5, %v5778_v24  ;;  %v2218_v2 = vadd.f32 %v5818_v45, %v2060_v51  ;;  %v5819_v24 = vld [vmem:[#allocation78_spill] sm:$0xff] }
 0x3c7   : > { %v2061_v33 = vadd.f32 %v5819_v24, %v5150_v30 }
 0x3c8   : > { %v3010_v40 = vadd.f32 %v2949_v47, %v2856_v44  ;;  %v2385_v61 = vadd.f32 %v5820_v17, %v2218_v2  ;;  %v2654_v47 = vpop.f32.mrf.mxu2 }
 0x3c9   : > { %v2490_v36 = vpop.f32.mrf.mxu3  ;;  %v2219_v41 = vadd.f32 %v5821_v11, %v2061_v33 }
 0x3ca   : > { %3042 = vst.msk [vmem:[%s5309_s13 + $0x68] sm:$0xff] %vm1019_vm5, %v3010_v40  ;;  %v2549_v15 = vadd.f32 %v2490_v36, %v2384_v19 }
 0x3cc   : > { %v2703_v26 = vadd.f32 %v2644_v8, %v2549_v15  ;;  %v2962_v8 = vpop.f32.mrf.mxu1 }
 0x3ce   : > { %v2857_v37 = vadd.f32 %v2798_v4, %v2703_v26  ;;  %v5822_v4 = vld [vmem:[#allocation16_spill] sm:$0xff] }
 0x3cf   : > { %v2062_v54 = vadd.f32 %v5822_v4, %v5161_v49  ;;  %v5836_v4 = vld [vmem:[#allocation63_spill] sm:$0xff] }
 0x3d0   : > { %v3011_v60 = vadd.f32 %v2952_v59, %v2857_v37  ;;  %v2386_v59 = vadd.f32 %v5823_v16, %v2219_v41  ;;  %v2656_v63 = vpop.f32.mrf.mxu2 }
 0x3d1   : > { %v2492_v57 = vpop.f32.mrf.mxu3  ;;  %v2220_v58 = vadd.f32 %v5824_v29, %v2062_v54 }
 0x3d2   : > { %3043 = vst.msk [vmem:[%s5309_s13 + $0x70] sm:$0xff] %vm1019_vm5, %v3011_v60  ;;  %v2550_v55 = vadd.f32 %v2492_v57, %v2385_v61  ;;  %v5833_v60 = vld [vmem:[#allocation60_spill] sm:$0xff] }
 0x3d4   : > { %v2704_v20 = vadd.f32 %v2646_v32, %v2550_v55  ;;  %v2810_v32 = vpop.f32.mrf.mxu0  ;;  %v2964_v43 = vpop.f32.mrf.mxu1 }
 0x3d6   : > { %v2858_v46 = vadd.f32 %v2800_v34, %v2704_v20  ;;  %v5825_v34 = vld [vmem:[#allocation82_spill] sm:$0xff] }
 0x3d7   : > { %v2063_v14 = vadd.f32 %v5825_v34, %v5174_v6  ;;  %v5829_v6 = vld [vmem:[#allocation87_spill] sm:$0xff] }
 0x3d8   : > { %v3012_v30 = vadd.f32 %v2954_v5, %v2858_v46  ;;  %v2387_v5 = vadd.f32 %v5826_v13, %v2220_v58 }
 0x3d9   : > { %v2495_v53 = vpop.f32.mrf.mxu3  ;;  %v2221_v1 = vadd.f32 %v5827_v22, %v2063_v14  ;;  %v5843_v22 = vld [vmem:[#allocation93_spill] sm:$0xff] }
 0x3da   : > { %3044 = vst.msk [vmem:[%s5309_s13 + $0x78] sm:$0xff] %vm1019_vm5, %v3012_v30  ;;  %v2551_v0 = vadd.f32 %v2495_v53, %v2386_v59  ;;  %v5837_v59 = vld [vmem:[#allocation103_spill] sm:$0xff]  ;;  %v5838_v53 = vld [vmem:[#allocation10_spill] sm:$0xff] }
 0x3db   : > { %v2388_v44 = vadd.f32 %v5829_v6, %v2221_v1 }
 0x3dc   : > { %v2705_v9 = vadd.f32 %v2649_v18, %v2551_v0  ;;  %v2659_v18 = vpop.f32.mrf.mxu2  ;;  %v2813_v28 = vpop.f32.mrf.mxu0  ;;  %v2067_v0 = vadd.f32 %v5838_v53, %v5837_v59 }
 0x3de   : > { %v2859_v3 = vadd.f32 %v2803_v50, %v2705_v9  ;;  %v5828_v50 = vld [vmem:[#allocation83_spill] sm:$0xff] }
 0x3df   : > { %v2064_v39 = vadd.f32 %v5828_v50, %v5183_v21  ;;  %v5832_v21 = vld [vmem:[#allocation89_spill] sm:$0xff]  ;;  %v5844_v50 = vld [vmem:[#allocation70_spill] sm:$0xff] }
 0x3e0   : > { %v3013_v49 = vadd.f32 %v2957_v56, %v2859_v3  ;;  %v2967_v56 = vpop.f32.mrf.mxu1 }
 0x3e1   : > { %v2497_v27 = vpop.f32.mrf.mxu3 }
 0x3e2   : > { %3045 = vst.msk [vmem:[%s5309_s13 + $0x80] sm:$0xff] %vm1019_vm5, %v3013_v49  ;;  %v2552_v7 = vadd.f32 %v2497_v27, %v2387_v5  ;;  %v5841_v5 = vld [vmem:[#allocation25_spill] sm:$0xff]  ;;  %v5842_v27 = vld [vmem:[#allocation91_spill] sm:$0xff] }
 0x3e4   : > { %v2706_v10 = vadd.f32 %v2651_v62, %v2552_v7  ;;  %v2222_v62 = vadd.f32 %v5830_v12, %v2064_v39  ;;  %v2661_v36 = vpop.f32.mrf.mxu2  ;;  %v2068_v7 = vadd.f32 %v5842_v27, %v5841_v5  ;;  %v5847_v12 = vld [vmem:[#allocation94_spill] sm:$0xff] }
 0x3e6   : > { %v2860_v31 = vadd.f32 %v2805_v35, %v2706_v10  ;;  %v5831_v35 = vld [vmem:[#allocation9_spill] sm:$0xff]  ;;  %v2389_v45 = vadd.f32 %v5832_v21, %v2222_v62  ;;  %v2226_v39 = vadd.f32 %v5844_v50, %v2068_v7 }
 0x3e7   : > { %v2065_v15 = vadd.f32 %v5831_v35, %v5194_v48  ;;  %v5835_v48 = vld [vmem:[#allocation90_spill] sm:$0xff]  ;;  %v5862_v50 = vld [vmem:[#allocation17_spill] sm:$0xff] }
 0x3e8   : > { %v3014_v42 = vadd.f32 %v2959_v23, %v2860_v31  ;;  %v2815_v23 = vpop.f32.mrf.mxu0  ;;  %v2969_v24 = vpop.f32.mrf.mxu1  ;;  %v2393_v62 = vadd.f32 %v5847_v12, %v2226_v39 }
 0x3e9   : > { %v2500_v52 = vpop.f32.mrf.mxu3  ;;  %v2223_v17 = vadd.f32 %v5833_v60, %v2065_v15  ;;  %v5851_v60 = vld [vmem:[#allocation96_spill] sm:$0xff] }
 0x3ea   : > { %3046 = vst.msk [vmem:[%s5309_s13 + $0x88] sm:$0xff] %vm1019_vm5, %v3014_v42  ;;  %v2553_v51 = vadd.f32 %v2500_v52, %v2388_v44  ;;  %v5846_v52 = vld [vmem:[#allocation92_spill] sm:$0xff] }
 0x3ec   : > { %v2707_v40 = vadd.f32 %v2654_v47, %v2553_v51  ;;  %v5834_v47 = vld [vmem:[#allocation88_spill] sm:$0xff]  ;;  %v2664_v20 = vpop.f32.mrf.mxu2 }
 0x3ed   : > { %v2066_v57 = vadd.f32 %v5834_v47, %v5201_v25 }
 0x3ee   : > { %v2861_v19 = vadd.f32 %v2808_v38, %v2707_v40  ;;  %v2390_v38 = vadd.f32 %v5835_v48, %v2223_v17 }
 0x3ef   : > { %v2224_v54 = vadd.f32 %v5836_v4, %v2066_v57 }
 0x3f0   : > { %v3015_v26 = vadd.f32 %v2962_v8, %v2861_v19  ;;  %v2818_v8 = vpop.f32.mrf.mxu0  ;;  %v2972_v30 = vpop.f32.mrf.mxu1 }
 0x3f1   : > { %v2502_v2 = vpop.f32.mrf.mxu3 }
 0x3f2   : > { %3047 = vst.msk [vmem:[%s5309_s13 + $0x90] sm:$0xff] %vm1019_vm5, %v3015_v26  ;;  %v2554_v37 = vadd.f32 %v2502_v2, %v2389_v45  ;;  %v5848_v26 = vld [vmem:[#allocation73_spill] sm:$0xff]  ;;  %v5849_v2 = vld [vmem:[#allocation28_spill] sm:$0xff] }
 0x3f4   : > { %v2708_v33 = vadd.f32 %v2656_v63, %v2554_v37  ;;  %v5839_v63 = vld [vmem:[#allocation11_spill] sm:$0xff]  ;;  %v5850_v37 = vld [vmem:[#allocation12_spill] sm:$0xff] }
 0x3f5   : > { %v2391_v9 = vadd.f32 %v5839_v63, %v2224_v54  ;;  %v5855_v54 = vld [vmem:[#allocation97_spill] sm:$0xff]  ;;  %v5856_v63 = vld [vmem:[#allocation6_spill] sm:$0xff] }
 0x3f6   : > { %v2862_v61 = vadd.f32 %v2810_v32, %v2708_v33  ;;  %v2666_v32 = vpop.f32.mrf.mxu2 }
 0x3f8   : > { %v3016_v55 = vadd.f32 %v2964_v43, %v2862_v61  ;;  %v5840_v43 = vld [vmem:[#allocation66_spill] sm:$0xff]  ;;  %v2820_v14 = vpop.f32.mrf.mxu0  ;;  %v2974_v13 = vpop.f32.mrf.mxu1 }
 0x3f9   : > { %v2505_v11 = vpop.f32.mrf.mxu3  ;;  %v2225_v34 = vadd.f32 %v5840_v43, %v2067_v0 }
 0x3fa   : > { %3048 = vst.msk [vmem:[%s5309_s13 + $0x98] sm:$0xff] %vm1019_vm5, %v3016_v55  ;;  %v2555_v41 = vadd.f32 %v2505_v11, %v2390_v38  ;;  %v5852_v38 = vld [vmem:[#allocation21_spill] sm:$0xff] }
 0x3fb   : > { %v2392_v1 = vadd.f32 %v5843_v22, %v2225_v34 }
 0x3fc   : > { %v2709_v46 = vadd.f32 %v2659_v18, %v2555_v41  ;;  %v5853_v41 = vld [vmem:[#allocation107_spill] sm:$0xff] }
 0x3fe   : > { %v2863_v16 = vadd.f32 %v2813_v28, %v2709_v46  ;;  %v2669_v42 = vpop.f32.mrf.mxu2 }
 0x400   : > { %v3017_v25 = vadd.f32 %v2967_v56, %v2863_v16  ;;  %v2823_v44 = vpop.f32.mrf.mxu0  ;;  %v5845_v56 = vld [vmem:[#allocation106_spill] sm:$0xff]  ;;  %v2977_v19 = vpop.f32.mrf.mxu1 }
 0x401   : > { %v2507_v29 = vpop.f32.mrf.mxu3  ;;  %v2069_v51 = vadd.f32 %v5846_v52, %v5845_v56 }
 0x402   : > { %3049 = vst.msk [vmem:[%s5309_s13 + $0xa0] sm:$0xff] %vm1019_vm5, %v3017_v25  ;;  %v2556_v58 = vadd.f32 %v2507_v29, %v2391_v9 }
 0x403   : > { %v2227_v21 = vadd.f32 %v5848_v26, %v2069_v51 }
 0x404   : > { %v2710_v3 = vadd.f32 %v2661_v36, %v2556_v58 }
 0x405   : > { %v2394_v17 = vadd.f32 %v5851_v60, %v2227_v21  ;;  %v5868_v60 = vld [vmem:[#allocation8_spill] sm:$0xff] }
 0x406   : > { %v2864_v49 = vadd.f32 %v2815_v23, %v2710_v3  ;;  %v2671_v23 = vpop.f32.mrf.mxu2  ;;  %v5858_v3 = vld [vmem:[#allocation5_spill] sm:$0xff] }
 0x408   : > { %v3018_v10 = vadd.f32 %v2969_v24, %v2864_v49  ;;  %v2070_v24 = vadd.f32 %v5850_v37, %v5849_v2  ;;  %v2825_v61 = vpop.f32.mrf.mxu0  ;;  %v2979_v55 = vpop.f32.mrf.mxu1 }
 0x409   : > { %v2510_v18 = vpop.f32.mrf.mxu3 }
 0x40a   : > { %3050 = vst.msk [vmem:[%s5309_s13 + $0xa8] sm:$0xff] %vm1019_vm5, %v3018_v10  ;;  %v2557_v31 = vadd.f32 %v2510_v18, %v2392_v1  ;;  %v5860_v10 = vld [vmem:[#allocation79_spill] sm:$0xff] }
 0x40c   : > { %v2711_v28 = vadd.f32 %v2664_v20, %v2557_v31  ;;  %v2228_v20 = vadd.f32 %v5852_v38, %v2070_v24 }
 0x40e   : > { %v2865_v6 = vadd.f32 %v2818_v8, %v2711_v28  ;;  %v5854_v8 = vld [vmem:[#allocation95_spill] sm:$0xff]  ;;  %v2674_v16 = vpop.f32.mrf.mxu2  ;;  %v5861_v28 = vld [vmem:[#allocation109_spill] sm:$0xff] }
 0x40f   : > { %v2071_v46 = vadd.f32 %v5854_v8, %v5853_v41  ;;  %v2073_v39 = vadd.f32 %v5862_v50, %v5861_v28 }
 0x410   : > { %v3019_v40 = vadd.f32 %v2972_v30, %v2865_v6  ;;  %v2395_v30 = vadd.f32 %v5855_v54, %v2228_v20  ;;  %v2828_v0 = vpop.f32.mrf.mxu0  ;;  %v2982_v29 = vpop.f32.mrf.mxu1  ;;  %v5863_v6 = vld [vmem:[#allocation100_spill] sm:$0xff] }
 0x411   : > { %v2512_v36 = vpop.f32.mrf.mxu3  ;;  %v2229_v9 = vadd.f32 %v5856_v63, %v2071_v46  ;;  %v5871_v20 = vld [vmem:[#allocation20_spill] sm:$0xff] }
 0x412   : > { %3051 = vst.msk [vmem:[%s5309_s13 + $0xb0] sm:$0xff] %vm1019_vm5, %v3019_v40  ;;  %v2558_v35 = vadd.f32 %v2512_v36, %v2393_v62  ;;  %v5864_v40 = vld [vmem:[#allocation81_spill] sm:$0xff] }
 0x413   : > { %v2231_v12 = vadd.f32 %v5864_v40, %v2073_v39 }
 0x414   : > { %v2712_v15 = vadd.f32 %v2666_v32, %v2558_v35  ;;  %v5857_v32 = vld [vmem:[#allocation108_spill] sm:$0xff]  ;;  %v5865_v35 = vld [vmem:[#allocation110_spill] sm:$0xff] }
 0x415   : > { %v2072_v43 = vadd.f32 %v5858_v3, %v5857_v32 }
 0x416   : > { %v2866_v45 = vadd.f32 %v2820_v14, %v2712_v15  ;;  %v5859_v14 = vld [vmem:[#allocation98_spill] sm:$0xff]  ;;  %v2676_v27 = vpop.f32.mrf.mxu2  ;;  %v5866_v15 = vld [vmem:[#allocation99_spill] sm:$0xff] }
 0x417   : > { %v2396_v49 = vadd.f32 %v5859_v14, %v2229_v9  ;;  %v2230_v22 = vadd.f32 %v5860_v10, %v2072_v43  ;;  %v2074_v26 = vadd.f32 %v5866_v15, %v5865_v35  ;;  %v5875_v9 = vld [vmem:[#allocation104_spill] sm:$0xff]  ;;  %v5876_v14 = vld [vmem:[#allocation86_spill] sm:$0xff] }
 0x418   : > { %v3020_v33 = vadd.f32 %v2974_v13, %v2866_v45  ;;  %v2830_v1 = vpop.f32.mrf.mxu0  ;;  %v2984_v31 = vpop.f32.mrf.mxu1  ;;  %v5867_v45 = vld [vmem:[#allocation101_spill] sm:$0xff] }
 0x419   : > { %v2515_v47 = vpop.f32.mrf.mxu3 }
 0x41a   : > { %3052 = vst.msk [vmem:[%s5309_s13 + $0xb8] sm:$0xff] %vm1019_vm5, %v3020_v33  ;;  %v2559_v57 = vadd.f32 %v2515_v47, %v2394_v17  ;;  %v2232_v17 = vadd.f32 %v5868_v60, %v2074_v26 }
 0x41c   : > { %v2713_v48 = vadd.f32 %v2669_v42, %v2559_v57  ;;  %v5869_v57 = vld [vmem:[#allocation111_spill] sm:$0xff] }
 0x41e   : > { %v2867_v11 = vadd.f32 %v2823_v44, %v2713_v48  ;;  %v2397_v44 = vadd.f32 %v5863_v6, %v2230_v22  ;;  %v2679_v62 = vpop.f32.mrf.mxu2 }
 0x420   : > { %v3021_v4 = vadd.f32 %v2977_v19, %v2867_v11  ;;  %v2833_v36 = vpop.f32.mrf.mxu0  ;;  %v2987_v2 = vpop.f32.mrf.mxu1  ;;  %v2399_v11 = vadd.f32 %v5871_v20, %v2232_v17 }
 0x421   : > { %v2517_v59 = vpop.f32.mrf.mxu3 }
 0x422   : > { %3053 = vst.msk [vmem:[%s5309_s13 + $0xc0] sm:$0xff] %vm1019_vm5, %v3021_v4  ;;  %v2560_v53 = vadd.f32 %v2517_v59, %v2395_v30  ;;  %v5872_v30 = vld [vmem:[#allocation84_spill] sm:$0xff] }
 0x424   : > { %v2714_v25 = vadd.f32 %v2671_v23, %v2560_v53  ;;  %v2398_v23 = vadd.f32 %v5867_v45, %v2231_v12  ;;  %v5873_v53 = vld [vmem:[#allocation112_spill] sm:$0xff] }
 0x426   : > { %v2868_v58 = vadd.f32 %v2825_v61, %v2714_v25  ;;  %v2681_v47 = vpop.f32.mrf.mxu2 }
 0x428   : > { %v3022_v34 = vadd.f32 %v2979_v55, %v2868_v58  ;;  %v5870_v55 = vld [vmem:[#allocation23_spill] sm:$0xff]  ;;  %v2835_v41 = vpop.f32.mrf.mxu0  ;;  %v2989_v4 = vpop.f32.mrf.mxu1 }
 0x429   : > { %v2520_v13 = vpop.f32.mrf.mxu3  ;;  %v2075_v48 = vadd.f32 %v5870_v55, %v5869_v57 }
 0x42a   : > { %3054 = vst.msk [vmem:[%s5309_s13 + $0xc8] sm:$0xff] %vm1019_vm5, %v3022_v34  ;;  %v2561_v5 = vadd.f32 %v2520_v13, %v2396_v49 }
 0x42c   : > { %v2715_v7 = vadd.f32 %v2674_v16, %v2561_v5  ;;  %v2233_v16 = vadd.f32 %v5872_v30, %v2075_v48 }
 0x42e   : > { %v2869_v18 = vadd.f32 %v2828_v0, %v2715_v7  ;;  %v5874_v0 = vld [vmem:[#allocation102_spill] sm:$0xff]  ;;  %v2684_v58 = vpop.f32.mrf.mxu2  ;;  %v5877_v7 = vld [vmem:[#allocation105_spill] sm:$0xff] }
 0x42f   : > { %v2076_v25 = vadd.f32 %v5874_v0, %v5873_v53 }
 0x430   : > { %v3023_v42 = vadd.f32 %v2982_v29, %v2869_v18  ;;  %v2400_v29 = vadd.f32 %v5875_v9, %v2233_v16  ;;  %v2838_v43 = vpop.f32.mrf.mxu0  ;;  %v2992_v13 = vpop.f32.mrf.mxu1 }
 0x431   : > { %v2522_v56 = vpop.f32.mrf.mxu3  ;;  %v2234_v49 = vadd.f32 %v5876_v14, %v2076_v25 }
 0x432   : > { %3055 = vst.msk [vmem:[%s5309_s13 + $0xd0] sm:$0xff] %vm1019_vm5, %v3023_v42  ;;  %v2562_v52 = vadd.f32 %v2522_v56, %v2397_v44 }
 0x433   : > { %v2401_v10 = vadd.f32 %v5877_v7, %v2234_v49 }
 0x434   : > { %v2716_v51 = vadd.f32 %v2676_v27, %v2562_v52 }
 0x436   : > { %v2870_v19 = vadd.f32 %v2830_v1, %v2716_v51  ;;  %v2686_v18 = vpop.f32.mrf.mxu2 }
 0x438   : > { %v3024_v21 = vadd.f32 %v2984_v31, %v2870_v19  ;;  %v2840_v28 = vpop.f32.mrf.mxu0  ;;  %v2994_v39 = vpop.f32.mrf.mxu1 }
 0x439   : > { %v2525_v37 = vpop.f32.mrf.mxu3 }
 0x43a   : > { %3056 = vst.msk [vmem:[%s5309_s13 + $0xd8] sm:$0xff] %vm1019_vm5, %v3024_v21  ;;  %v2563_v24 = vadd.f32 %v2525_v37, %v2398_v23 }
 0x43c   : > { %v2717_v33 = vadd.f32 %v2679_v62, %v2563_v24 }
 0x43e   : > { %v2871_v61 = vadd.f32 %v2833_v36, %v2717_v33 }
 0x440   : > { %v3025_v38 = vadd.f32 %v2987_v2, %v2871_v61 }
 0x441   : > { %v2527_v8 = vpop.f32.mrf.mxu3 }
 0x442   : > { %3057 = vst.msk [vmem:[%s5309_s13 + $0xe0] sm:$0xff] %vm1019_vm5, %v3025_v38  ;;  %v2564_v46 = vadd.f32 %v2527_v8, %v2399_v11 }
 0x444   : > { %v2718_v54 = vadd.f32 %v2681_v47, %v2564_v46 }
 0x446   : > { %v2872_v59 = vadd.f32 %v2835_v41, %v2718_v54 }
 0x448   : > { %v3026_v63 = vadd.f32 %v2989_v4, %v2872_v59 }
 0x449   : > { %v2530_v32 = vpop.f32.mrf.mxu3 }
 0x44a   : > { %3058 = vst.msk [vmem:[%s5309_s13 + $0xe8] sm:$0xff] %vm1019_vm5, %v3026_v63  ;;  %v2565_v3 = vadd.f32 %v2530_v32, %v2400_v29 }
 0x44c   : > { %v2719_v34 = vadd.f32 %v2684_v58, %v2565_v3 }
 0x44e   : > { %v2873_v5 = vadd.f32 %v2838_v43, %v2719_v34 }
 0x450   : > { %v3027_v27 = vadd.f32 %v2992_v13, %v2873_v5 }
 0x451   : > { %v2532_v22 = vpop.f32.mrf.mxu3 }
 0x452   : > { %3059 = vst.msk [vmem:[%s5309_s13 + $0xf0] sm:$0xff] %vm1019_vm5, %v3027_v27  ;;  %v2566_v1 = vadd.f32 %v2532_v22, %v2401_v10 }
 0x454   : > { %v2720_v31 = vadd.f32 %v2686_v18, %v2566_v1 }
 0x456   : > { %v2874_v50 = vadd.f32 %v2840_v28, %v2720_v31 }
 0x458   : > { %v3028_v42 = vadd.f32 %v2994_v39, %v2874_v50 }
 0x45a   : > { %3060 = vst.msk [vmem:[%s5309_s13 + $0xf8] sm:$0xff] %vm1019_vm5, %v3028_v42 }
 0x45b   : > { %3740 = shalt.err (!%p3737_p3)
}
 0x45c   : > { %s3778_s10 = smov 128   ;;  %s3779_s13 = smov 8  }
 0x45d   : > { %3665 = dma.vmem_to_hbm [thread:$0]  (%p3863_p5), %s3075_s20, 4096, %s3077_s21, %s3062_s9, %s3778_s10, %s3778_s10, %s3779_s13  }
 0x45e PF: > { %p3671_p4 = scmp.ge.s32.totalorder %s3775_s30, 2  ;;  %s3091_s17 = sand.u32 1, %s3763_s27  }
 0x45f   : > { %s3092_s19 = scalar_lea.sflag [#allocation3], %s3091_s17 }
 0x460   : > { %p3668_p7 = pnand %p3671_p4, %p3867_p6 }
 0x462   : > { %p3669_p8 = pneg %p3668_p7 }
 0x464   : > { %3758 = dma.done.wait (%p3669_p8), %s3092_s19, 4096  }
 0x465   : > { %3760 = vsyncadd (%p3669_p8), %s3092_s19, 4294963200  ;;  %p18_p9 = scmp.ge.s32.totalorder %s3850_s11, 4   ;;  %s5878_s27 = smov %s3767_s28 }
 0x466   : > { %s5879_s28 = smov %s3771_s29  ;;  %s5880_s29 = smov %s3861_s14 }
 0x467   : > { %s5881_s30 = smov %s3850_s11  ;;  %20 = sbr.rel (!%p18_p9) target bundleno = 3 (0x3), region = 95 }
 0x46c   :  { %3098 = vsyncpa [#allocation3], 1 }
 0x46d   :  { %3100 = vsyncpa [#allocation3 + $0x1], 1 }

</bundles_post_ra>
